<compile_context>
chip_gen: v7x
topology: tpu7x:2x2x1
jax: 0.10.0
libtpu: 0.0.40
codegen_flags: <defaults>
</compile_context>

<pallas_src>
import functools

import jax
import jax.numpy as jnp
from jax.experimental import pallas as pl
from jax.experimental.pallas import tpu as pltpu  # noqa: F401  (TPU backend)


# ----------------------------------------------------------------------------
# helpers
# ----------------------------------------------------------------------------
def _full_spec(shape):
    # Whole-array block, single (grid-less) invocation.
    return pl.BlockSpec(shape, lambda: (0,) * len(shape))


# ----------------------------------------------------------------------------
# fused forward kernel
# ----------------------------------------------------------------------------
def _fused_roberta_kernel(
    x_ref, mask_ref,
    eg_ref, eb_ref,
    wqkv_ref, bqkv_ref, wo_ref, bo_ref,
    ln1g_ref, ln1b_ref,
    w1_ref, b1_ref, w2_ref, b2_ref,
    ln2g_ref, ln2b_ref,
    poolw_ref, poolb_ref,
    c1w_ref, c1b_ref, c2w_ref, c2b_ref,
    out_ref,
    *, B, S, nH, Dh, L, eps, n_classes,
):
    f32 = jnp.float32
    H = nH * Dh

    def layernorm(h, g, b):
        mu = jnp.mean(h, axis=-1, keepdims=True)
        var = jnp.mean((h - mu) * (h - mu), axis=-1, keepdims=True)
        return (h - mu) * jax.lax.rsqrt(var + eps) * g + b

    def matmul(a, w):
        return jax.lax.dot_general(a, w, (((1,), (0,)), ((), ())),
                                   preferred_element_type=f32)

    # --- embedding LayerNorm (embedding dropout is identity at inference) ---
    x = layernorm(x_ref[...], eg_ref[...], eb_ref[...])      # (B*S, H)

    mask_add = mask_ref[...]                                  # (B, S) additive
    scale = f32(1.0 / (Dh ** 0.5))

    # --- transformer layers (L=2, statically unrolled) ---
    for l in range(L):
        # fused QKV projection: one (BS,H) x (H,3H) MXU pass
        qkv = matmul(x, wqkv_ref[l]) + bqkv_ref[l]            # (BS, 3H)
        q = qkv[:, 0:H] * scale
        k = qkv[:, H:2 * H]
        v = qkv[:, 2 * H:3 * H]

        # attention per (batch, head); context re-assembled lane-dense (BS, H)
        ctx_batches = []
        for b in range(B):
            m_b = mask_add[b:b + 1, :]                        # (1, S) broadcast
            head_ctx = []
            for h in range(nH):
                rs, cs = b * S, h * Dh
                qs = q[rs:rs + S, cs:cs + Dh]
                ks = k[rs:rs + S, cs:cs + Dh]
                vs = v[rs:rs + S, cs:cs + Dh]
                s = jax.lax.dot_general(qs, ks, (((1,), (1,)), ((), ())),
                                        preferred_element_type=f32) + m_b
                mx = jnp.max(s, axis=-1, keepdims=True)
                p = jnp.exp(s - mx)
                p = p * pl.reciprocal(jnp.sum(p, axis=-1, keepdims=True),
                                      approx=True)
                head_ctx.append(matmul(p, vs))                # (S, Dh)
            ctx_batches.append(jnp.concatenate(head_ctx, axis=-1))  # (S, H)
        ctx = jnp.concatenate(ctx_batches, axis=0)            # (BS, H)

        # attention output projection + residual + LN1 (fused epilogue)
        x1 = layernorm(matmul(ctx, wo_ref[l]) + bo_ref[l] + x,
                       ln1g_ref[l], ln1b_ref[l])

        # FFN: dense -> GELU -> dense, + residual + LN2 (fused epilogue)
        hdn = matmul(x1, w1_ref[l]) + b1_ref[l]
        # TODO(synk): HF RoBERTa uses exact (erf) GELU; tanh approximation here.
        c = f32(0.7978845608028654)  # sqrt(2/pi)
        hdn = 0.5 * hdn * (1.0 + jnp.tanh(c * (hdn + 0.044715 * hdn * hdn * hdn)))
        x = layernorm(matmul(hdn, w2_ref[l]) + b2_ref[l] + x1,
                      ln2g_ref[l], ln2b_ref[l])

    # --- pooler: CLS token of each sequence -> Linear(H,H) -> tanh ---
    cls = jnp.concatenate([x[b * S:b * S + 1, :] for b in range(B)], axis=0)
    pooled = jnp.tanh(matmul(cls, poolw_ref[...]) + poolb_ref[...])   # (B, H)

    # --- classifier: Dropout(identity) -> Linear(H,50 pad128) -> ReLU
    #                 -> Linear(50,2 pad128) -> LogSoftmax over 2 valid cols ---
    h1 = jnp.maximum(matmul(pooled, c1w_ref[...]) + c1b_ref[...], 0.0)
    logits = matmul(h1, c2w_ref[...]) + c2b_ref[...]          # (B, 128) slab
    col = jax.lax.broadcasted_iota(jnp.int32, logits.shape, 1)
    valid = col < n_classes
    lg = jnp.where(valid, logits, jnp.float32(-1e30))
    mx = jnp.max(lg, axis=-1, keepdims=True)
    z = lg - mx
    sumexp = jnp.sum(jnp.where(valid, jnp.exp(z), 0.0), axis=-1, keepdims=True)
    out_ref[...] = (z - jnp.log(sumexp)).astype(out_ref.dtype)


# ----------------------------------------------------------------------------
# parameter init (deterministic, synthetic)
# ----------------------------------------------------------------------------
def init_params(key, cfg):
    H, I = cfg["hidden"], cfg["intermediate"]
    V, P, L = cfg["vocab"], cfg["max_pos"], cfg["layers"]
    D1, NC, DPAD = 50, 2, 128
    std = 0.02

    def nrm(k, shape):
        return jax.random.normal(k, shape, dtype=jnp.float32) * std

    ks = iter(jax.random.split(key, 16))

    word = nrm(next(ks), (V, H)).at[cfg["pad_id"]].set(0.0)   # zero padding_idx
    pos = nrm(next(ks), (P, H)).at[cfg["pad_id"]].set(0.0)    # zero padding_idx

    params = {
        "emb": {
            "word": word,
            "pos": pos,
            "type": nrm(next(ks), (1, H)),
            "ln_g": jnp.ones((1, H), jnp.float32),
            "ln_b": jnp.zeros((1, H), jnp.float32),
        },
        # fused & layer-stacked transformer weights
        "wqkv": nrm(next(ks), (L, H, 3 * H)),
        "bqkv": jnp.zeros((L, 1, 3 * H), jnp.float32),
        "wo": nrm(next(ks), (L, H, H)),
        "bo": jnp.zeros((L, 1, H), jnp.float32),
        "ln1_g": jnp.ones((L, 1, H), jnp.float32),
        "ln1_b": jnp.zeros((L, 1, H), jnp.float32),
        "w1": nrm(next(ks), (L, H, I)),
        "b1": jnp.zeros((L, 1, I), jnp.float32),
        "w2": nrm(next(ks), (L, I, H)),
        "b2": jnp.zeros((L, 1, H), jnp.float32),
        "ln2_g": jnp.ones((L, 1, H), jnp.float32),
        "ln2_b": jnp.zeros((L, 1, H), jnp.float32),
        # pooler
        "pool_w": nrm(next(ks), (H, H)),
        "pool_b": jnp.zeros((1, H), jnp.float32),
        # classifier head, zero-padded to 128 lanes for lane-dense compute/store
        "c1_w": jnp.zeros((H, DPAD), jnp.float32).at[:, :D1].set(nrm(next(ks), (H, D1))),
        "c1_b": jnp.zeros((1, DPAD), jnp.float32),
        "c2_w": jnp.zeros((DPAD, DPAD), jnp.float32).at[:D1, :NC].set(nrm(next(ks), (D1, NC))),
        "c2_b": jnp.zeros((1, DPAD), jnp.float32),
    }
    return params


# ----------------------------------------------------------------------------
# forward pass (embedding gather in JAX, everything else in ONE Pallas kernel)
# ----------------------------------------------------------------------------
def roberta_fake_news_forward(params, input_ids, attention_mask, cfg):
    B, S = input_ids.shape
    H, nH, L = cfg["hidden"], cfg["heads"], cfg["layers"]
    Dh = H // nH
    pad = cfg["pad_id"]
    n_classes = 2

    # --- embeddings (gather is glue, done in plain JAX) ---
    mask_i = (input_ids != pad).astype(jnp.int32)
    pos_ids = jnp.cumsum(mask_i, axis=1) * mask_i + pad   # RoBERTa position ids
    emb = params["emb"]
    x = (jnp.take(emb["word"], input_ids, axis=0)
         + jnp.take(emb["pos"], pos_ids, axis=0)
         + emb["type"].reshape(1, 1, H)).reshape(B * S, H).astype(jnp.float32)

    # additive attention mask, (B, S); broadcast over heads/queries in-kernel
    mask_add = (1.0 - attention_mask.astype(jnp.float32)) * -1e9

    operands = (
        x, mask_add,
        emb["ln_g"], emb["ln_b"],
        params["wqkv"], params["bqkv"], params["wo"], params["bo"],
        params["ln1_g"], params["ln1_b"],
        params["w1"], params["b1"], params["w2"], params["b2"],
        params["ln2_g"], params["ln2_b"],
        params["pool_w"], params["pool_b"],
        params["c1_w"], params["c1_b"], params["c2_w"], params["c2_b"],
    )

    out = pl.pallas_call(
        functools.partial(_fused_roberta_kernel, B=B, S=S, nH=nH, Dh=Dh, L=L,
                          eps=1e-5, n_classes=n_classes),
        out_shape=jax.ShapeDtypeStruct((B, 128), jnp.float32),
        in_specs=[_full_spec(a.shape) for a in operands],
        out_specs=_full_spec((B, 128)),
    )(*operands)

    # lane-padded (B, 128) slab -> (B, 2) log-probs
    return out[:, :n_classes]


# ----------------------------------------------------------------------------
# main
# ----------------------------------------------------------------------------
if __name__ == "__main__":
    cfg = {
        "vocab": 256,
        "hidden": 128,
        "heads": 2,
        "layers": 2,
        "intermediate": 256,
        "max_pos": 32,
        "pad_id": 1,
    }
    B, S = 2, 8

    key = jax.random.PRNGKey(0)
    k_param, k_ids = jax.random.split(key)
    params = init_params(k_param, cfg)

    input_ids = jax.random.randint(k_ids, (B, S), 3, cfg["vocab"], dtype=jnp.int32)
    # pad out the last 2 positions of the second sequence
    input_ids = input_ids.at[1, -2:].set(cfg["pad_id"])
    attention_mask = jnp.ones((B, S), jnp.int32).at[1, -2:].set(0)

    fwd = jax.jit(functools.partial(roberta_fake_news_forward, cfg=cfg))
    logits = fwd(params, input_ids, attention_mask)
    logits = jax.block_until_ready(logits)

    assert logits.shape == (B, 2)
    assert bool(jnp.all(jnp.isfinite(logits)))
    # rows of LogSoftmax output must exp-sum to 1
    assert bool(jnp.allclose(jnp.exp(logits).sum(axis=1), 1.0, atol=1e-4))
    print("KERNEL_OK")
</pallas_src>

<mosaic_0001>
module attributes {stable_mosaic.version = 11 : i64} {
  func.func @_fused_roberta_kernel(%arg0: memref<16x128xf32, #tpu.memory_space<vmem>>, %arg1: memref<2x8xf32, #tpu.memory_space<vmem>>, %arg2: memref<1x128xf32, #tpu.memory_space<vmem>>, %arg3: memref<1x128xf32, #tpu.memory_space<vmem>>, %arg4: memref<2x128x384xf32, #tpu.memory_space<vmem>>, %arg5: memref<2x1x384xf32, #tpu.memory_space<vmem>>, %arg6: memref<2x128x128xf32, #tpu.memory_space<vmem>>, %arg7: memref<2x1x128xf32, #tpu.memory_space<vmem>>, %arg8: memref<2x1x128xf32, #tpu.memory_space<vmem>>, %arg9: memref<2x1x128xf32, #tpu.memory_space<vmem>>, %arg10: memref<2x128x256xf32, #tpu.memory_space<vmem>>, %arg11: memref<2x1x256xf32, #tpu.memory_space<vmem>>, %arg12: memref<2x256x128xf32, #tpu.memory_space<vmem>>, %arg13: memref<2x1x128xf32, #tpu.memory_space<vmem>>, %arg14: memref<2x1x128xf32, #tpu.memory_space<vmem>>, %arg15: memref<2x1x128xf32, #tpu.memory_space<vmem>>, %arg16: memref<128x128xf32, #tpu.memory_space<vmem>>, %arg17: memref<1x128xf32, #tpu.memory_space<vmem>>, %arg18: memref<128x128xf32, #tpu.memory_space<vmem>>, %arg19: memref<1x128xf32, #tpu.memory_space<vmem>>, %arg20: memref<128x128xf32, #tpu.memory_space<vmem>>, %arg21: memref<1x128xf32, #tpu.memory_space<vmem>>, %arg22: memref<2x128xf32, #tpu.memory_space<vmem>>) attributes {dimension_semantics = [], scalar_prefetch = 0 : i64, scratch_operands = 0 : i64, tpu.core_type = #tpu.core_type<tc>} {
    %c0 = arith.constant 0 : index
    %c0_0 = arith.constant 0 : index
    %0 = vector.load %arg0[%c0, %c0_0] : memref<16x128xf32, #tpu.memory_space<vmem>>, vector<16x128xf32>
    %c0_1 = arith.constant 0 : index
    %c0_2 = arith.constant 0 : index
    %1 = vector.load %arg2[%c0_1, %c0_2] : memref<1x128xf32, #tpu.memory_space<vmem>>, vector<1x128xf32>
    %c0_3 = arith.constant 0 : index
    %c0_4 = arith.constant 0 : index
    %2 = vector.load %arg3[%c0_3, %c0_4] : memref<1x128xf32, #tpu.memory_space<vmem>>, vector<1x128xf32>
    %cst = arith.constant dense<0.000000e+00> : vector<16xf32>
    %3 = vector.multi_reduction <add>, %0, %cst [1] : vector<16x128xf32> to vector<16xf32>
    %4 = vector.shape_cast %3 : vector<16xf32> to vector<16x1xf32>
    %cst_5 = arith.constant 1.280000e+02 : f32
    %5 = vector.broadcast %cst_5 : f32 to vector<16x1xf32>
    %6 = arith.divf %4, %5 : vector<16x1xf32>
    %7 = vector.broadcast %6 : vector<16x1xf32> to vector<16x128xf32>
    %8 = arith.subf %0, %7 : vector<16x128xf32>
    %9 = vector.broadcast %6 : vector<16x1xf32> to vector<16x128xf32>
    %10 = arith.subf %0, %9 : vector<16x128xf32>
    %11 = arith.mulf %8, %10 : vector<16x128xf32>
    %cst_6 = arith.constant dense<0.000000e+00> : vector<16xf32>
    %12 = vector.multi_reduction <add>, %11, %cst_6 [1] : vector<16x128xf32> to vector<16xf32>
    %13 = vector.shape_cast %12 : vector<16xf32> to vector<16x1xf32>
    %cst_7 = arith.constant 1.280000e+02 : f32
    %14 = vector.broadcast %cst_7 : f32 to vector<16x1xf32>
    %15 = arith.divf %13, %14 : vector<16x1xf32>
    %16 = vector.broadcast %6 : vector<16x1xf32> to vector<16x128xf32>
    %17 = arith.subf %0, %16 : vector<16x128xf32>
    %cst_8 = arith.constant 9.99999974E-6 : f32
    %18 = vector.broadcast %cst_8 : f32 to vector<16x1xf32>
    %19 = arith.addf %15, %18 : vector<16x1xf32>
    %20 = math.rsqrt %19 : vector<16x1xf32>
    %21 = vector.broadcast %20 : vector<16x1xf32> to vector<16x128xf32>
    %22 = arith.mulf %17, %21 : vector<16x128xf32>
    %23 = vector.broadcast %1 : vector<1x128xf32> to vector<16x128xf32>
    %24 = arith.mulf %22, %23 : vector<16x128xf32>
    %25 = vector.broadcast %2 : vector<1x128xf32> to vector<16x128xf32>
    %26 = arith.addf %24, %25 : vector<16x128xf32>
    %c0_9 = arith.constant 0 : index
    %c0_10 = arith.constant 0 : index
    %27 = vector.load %arg1[%c0_9, %c0_10] : memref<2x8xf32, #tpu.memory_space<vmem>>, vector<2x8xf32>
    %c0_11 = arith.constant 0 : index
    %c0_12 = arith.constant 0 : index
    %c0_13 = arith.constant 0 : index
    %28 = vector.load %arg4[%c0_11, %c0_12, %c0_13] : memref<2x128x384xf32, #tpu.memory_space<vmem>>, vector<1x128x384xf32>
    %29 = vector.shape_cast %28 : vector<1x128x384xf32> to vector<128x384xf32>
    %cst_14 = arith.constant dense<0.000000e+00> : vector<16x384xf32>
    %30 = tpu.matmul %26, %29, %cst_14 {dimension_numbers = #tpu.dot_dimension_numbers<[1], [0], [0], [1], [0, 0, 1, 1], [], []>} : vector<16x128xf32>, vector<128x384xf32>, vector<16x384xf32> -> vector<16x384xf32>
    %c0_15 = arith.constant 0 : index
    %c0_16 = arith.constant 0 : index
    %c0_17 = arith.constant 0 : index
    %31 = vector.load %arg5[%c0_15, %c0_16, %c0_17] : memref<2x1x384xf32, #tpu.memory_space<vmem>>, vector<1x1x384xf32>
    %32 = vector.shape_cast %31 : vector<1x1x384xf32> to vector<1x384xf32>
    %33 = vector.broadcast %32 : vector<1x384xf32> to vector<16x384xf32>
    %34 = arith.addf %30, %33 : vector<16x384xf32>
    %35 = vector.extract_strided_slice %34 {offsets = [0, 0], sizes = [16, 128], strides = [1, 1]} : vector<16x384xf32> to vector<16x128xf32>
    %cst_18 = arith.constant 1.250000e-01 : f32
    %36 = vector.broadcast %cst_18 : f32 to vector<16x128xf32>
    %37 = arith.mulf %35, %36 : vector<16x128xf32>
    %38 = vector.extract_strided_slice %34 {offsets = [0, 128], sizes = [16, 128], strides = [1, 1]} : vector<16x384xf32> to vector<16x128xf32>
    %39 = vector.extract_strided_slice %34 {offsets = [0, 256], sizes = [16, 128], strides = [1, 1]} : vector<16x384xf32> to vector<16x128xf32>
    %40 = vector.extract_strided_slice %27 {offsets = [0, 0], sizes = [1, 8], strides = [1, 1]} : vector<2x8xf32> to vector<1x8xf32>
    %41 = vector.extract_strided_slice %37 {offsets = [0, 0], sizes = [8, 64], strides = [1, 1]} : vector<16x128xf32> to vector<8x64xf32>
    %42 = vector.extract_strided_slice %38 {offsets = [0, 0], sizes = [8, 64], strides = [1, 1]} : vector<16x128xf32> to vector<8x64xf32>
    %43 = vector.extract_strided_slice %39 {offsets = [0, 0], sizes = [8, 64], strides = [1, 1]} : vector<16x128xf32> to vector<8x64xf32>
    %cst_19 = arith.constant dense<0.000000e+00> : vector<8x8xf32>
    %44 = tpu.matmul %41, %42, %cst_19 {dimension_numbers = #tpu.dot_dimension_numbers<[1], [1], [0], [0], [0, 0, 1, 0], [], []>} : vector<8x64xf32>, vector<8x64xf32>, vector<8x8xf32> -> vector<8x8xf32>
    %45 = vector.broadcast %40 : vector<1x8xf32> to vector<8x8xf32>
    %46 = arith.addf %44, %45 : vector<8x8xf32>
    %cst_20 = arith.constant dense<0xFF800000> : vector<8xf32>
    %47 = vector.multi_reduction <maximumf>, %46, %cst_20 [1] : vector<8x8xf32> to vector<8xf32>
    %48 = vector.shape_cast %47 : vector<8xf32> to vector<8x1xf32>
    %49 = vector.broadcast %48 : vector<8x1xf32> to vector<8x8xf32>
    %50 = arith.subf %46, %49 : vector<8x8xf32>
    %51 = math.exp %50 : vector<8x8xf32>
    %cst_21 = arith.constant dense<0.000000e+00> : vector<8xf32>
    %52 = vector.multi_reduction <add>, %51, %cst_21 [1] : vector<8x8xf32> to vector<8xf32>
    %53 = vector.shape_cast %52 : vector<8xf32> to vector<8x1xf32>
    %54 = tpu.reciprocal %53 {approx = true} : vector<8x1xf32> -> vector<8x1xf32>
    %55 = vector.broadcast %54 : vector<8x1xf32> to vector<8x8xf32>
    %56 = arith.mulf %51, %55 : vector<8x8xf32>
    %cst_22 = arith.constant dense<0.000000e+00> : vector<8x64xf32>
    %57 = tpu.matmul %56, %43, %cst_22 {dimension_numbers = #tpu.dot_dimension_numbers<[1], [0], [0], [1], [0, 0, 1, 1], [], []>} : vector<8x8xf32>, vector<8x64xf32>, vector<8x64xf32> -> vector<8x64xf32>
    %58 = vector.extract_strided_slice %37 {offsets = [0, 64], sizes = [8, 64], strides = [1, 1]} : vector<16x128xf32> to vector<8x64xf32>
    %59 = vector.extract_strided_slice %38 {offsets = [0, 64], sizes = [8, 64], strides = [1, 1]} : vector<16x128xf32> to vector<8x64xf32>
    %60 = vector.extract_strided_slice %39 {offsets = [0, 64], sizes = [8, 64], strides = [1, 1]} : vector<16x128xf32> to vector<8x64xf32>
    %cst_23 = arith.constant dense<0.000000e+00> : vector<8x8xf32>
    %61 = tpu.matmul %58, %59, %cst_23 {dimension_numbers = #tpu.dot_dimension_numbers<[1], [1], [0], [0], [0, 0, 1, 0], [], []>} : vector<8x64xf32>, vector<8x64xf32>, vector<8x8xf32> -> vector<8x8xf32>
    %62 = vector.broadcast %40 : vector<1x8xf32> to vector<8x8xf32>
    %63 = arith.addf %61, %62 : vector<8x8xf32>
    %cst_24 = arith.constant dense<0xFF800000> : vector<8xf32>
    %64 = vector.multi_reduction <maximumf>, %63, %cst_24 [1] : vector<8x8xf32> to vector<8xf32>
    %65 = vector.shape_cast %64 : vector<8xf32> to vector<8x1xf32>
    %66 = vector.broadcast %65 : vector<8x1xf32> to vector<8x8xf32>
    %67 = arith.subf %63, %66 : vector<8x8xf32>
    %68 = math.exp %67 : vector<8x8xf32>
    %cst_25 = arith.constant dense<0.000000e+00> : vector<8xf32>
    %69 = vector.multi_reduction <add>, %68, %cst_25 [1] : vector<8x8xf32> to vector<8xf32>
    %70 = vector.shape_cast %69 : vector<8xf32> to vector<8x1xf32>
    %71 = tpu.reciprocal %70 {approx = true} : vector<8x1xf32> -> vector<8x1xf32>
    %72 = vector.broadcast %71 : vector<8x1xf32> to vector<8x8xf32>
    %73 = arith.mulf %68, %72 : vector<8x8xf32>
    %cst_26 = arith.constant dense<0.000000e+00> : vector<8x64xf32>
    %74 = tpu.matmul %73, %60, %cst_26 {dimension_numbers = #tpu.dot_dimension_numbers<[1], [0], [0], [1], [0, 0, 1, 1], [], []>} : vector<8x8xf32>, vector<8x64xf32>, vector<8x64xf32> -> vector<8x64xf32>
    %75 = tpu.concatenate %57, %74 in 1 : vector<8x64xf32>, vector<8x64xf32> -> vector<8x128xf32>
    %76 = vector.extract_strided_slice %27 {offsets = [1, 0], sizes = [1, 8], strides = [1, 1]} : vector<2x8xf32> to vector<1x8xf32>
    %77 = vector.extract_strided_slice %37 {offsets = [8, 0], sizes = [8, 64], strides = [1, 1]} : vector<16x128xf32> to vector<8x64xf32>
    %78 = vector.extract_strided_slice %38 {offsets = [8, 0], sizes = [8, 64], strides = [1, 1]} : vector<16x128xf32> to vector<8x64xf32>
    %79 = vector.extract_strided_slice %39 {offsets = [8, 0], sizes = [8, 64], strides = [1, 1]} : vector<16x128xf32> to vector<8x64xf32>
    %cst_27 = arith.constant dense<0.000000e+00> : vector<8x8xf32>
    %80 = tpu.matmul %77, %78, %cst_27 {dimension_numbers = #tpu.dot_dimension_numbers<[1], [1], [0], [0], [0, 0, 1, 0], [], []>} : vector<8x64xf32>, vector<8x64xf32>, vector<8x8xf32> -> vector<8x8xf32>
    %81 = vector.broadcast %76 : vector<1x8xf32> to vector<8x8xf32>
    %82 = arith.addf %80, %81 : vector<8x8xf32>
    %cst_28 = arith.constant dense<0xFF800000> : vector<8xf32>
    %83 = vector.multi_reduction <maximumf>, %82, %cst_28 [1] : vector<8x8xf32> to vector<8xf32>
    %84 = vector.shape_cast %83 : vector<8xf32> to vector<8x1xf32>
    %85 = vector.broadcast %84 : vector<8x1xf32> to vector<8x8xf32>
    %86 = arith.subf %82, %85 : vector<8x8xf32>
    %87 = math.exp %86 : vector<8x8xf32>
    %cst_29 = arith.constant dense<0.000000e+00> : vector<8xf32>
    %88 = vector.multi_reduction <add>, %87, %cst_29 [1] : vector<8x8xf32> to vector<8xf32>
    %89 = vector.shape_cast %88 : vector<8xf32> to vector<8x1xf32>
    %90 = tpu.reciprocal %89 {approx = true} : vector<8x1xf32> -> vector<8x1xf32>
    %91 = vector.broadcast %90 : vector<8x1xf32> to vector<8x8xf32>
    %92 = arith.mulf %87, %91 : vector<8x8xf32>
    %cst_30 = arith.constant dense<0.000000e+00> : vector<8x64xf32>
    %93 = tpu.matmul %92, %79, %cst_30 {dimension_numbers = #tpu.dot_dimension_numbers<[1], [0], [0], [1], [0, 0, 1, 1], [], []>} : vector<8x8xf32>, vector<8x64xf32>, vector<8x64xf32> -> vector<8x64xf32>
    %94 = vector.extract_strided_slice %37 {offsets = [8, 64], sizes = [8, 64], strides = [1, 1]} : vector<16x128xf32> to vector<8x64xf32>
    %95 = vector.extract_strided_slice %38 {offsets = [8, 64], sizes = [8, 64], strides = [1, 1]} : vector<16x128xf32> to vector<8x64xf32>
    %96 = vector.extract_strided_slice %39 {offsets = [8, 64], sizes = [8, 64], strides = [1, 1]} : vector<16x128xf32> to vector<8x64xf32>
    %cst_31 = arith.constant dense<0.000000e+00> : vector<8x8xf32>
    %97 = tpu.matmul %94, %95, %cst_31 {dimension_numbers = #tpu.dot_dimension_numbers<[1], [1], [0], [0], [0, 0, 1, 0], [], []>} : vector<8x64xf32>, vector<8x64xf32>, vector<8x8xf32> -> vector<8x8xf32>
    %98 = vector.broadcast %76 : vector<1x8xf32> to vector<8x8xf32>
    %99 = arith.addf %97, %98 : vector<8x8xf32>
    %cst_32 = arith.constant dense<0xFF800000> : vector<8xf32>
    %100 = vector.multi_reduction <maximumf>, %99, %cst_32 [1] : vector<8x8xf32> to vector<8xf32>
    %101 = vector.shape_cast %100 : vector<8xf32> to vector<8x1xf32>
    %102 = vector.broadcast %101 : vector<8x1xf32> to vector<8x8xf32>
    %103 = arith.subf %99, %102 : vector<8x8xf32>
    %104 = math.exp %103 : vector<8x8xf32>
    %cst_33 = arith.constant dense<0.000000e+00> : vector<8xf32>
    %105 = vector.multi_reduction <add>, %104, %cst_33 [1] : vector<8x8xf32> to vector<8xf32>
    %106 = vector.shape_cast %105 : vector<8xf32> to vector<8x1xf32>
    %107 = tpu.reciprocal %106 {approx = true} : vector<8x1xf32> -> vector<8x1xf32>
    %108 = vector.broadcast %107 : vector<8x1xf32> to vector<8x8xf32>
    %109 = arith.mulf %104, %108 : vector<8x8xf32>
    %cst_34 = arith.constant dense<0.000000e+00> : vector<8x64xf32>
    %110 = tpu.matmul %109, %96, %cst_34 {dimension_numbers = #tpu.dot_dimension_numbers<[1], [0], [0], [1], [0, 0, 1, 1], [], []>} : vector<8x8xf32>, vector<8x64xf32>, vector<8x64xf32> -> vector<8x64xf32>
    %111 = tpu.concatenate %93, %110 in 1 : vector<8x64xf32>, vector<8x64xf32> -> vector<8x128xf32>
    %112 = tpu.concatenate %75, %111 in 0 : vector<8x128xf32>, vector<8x128xf32> -> vector<16x128xf32>
    %c0_35 = arith.constant 0 : index
    %c0_36 = arith.constant 0 : index
    %c0_37 = arith.constant 0 : index
    %113 = vector.load %arg6[%c0_35, %c0_36, %c0_37] : memref<2x128x128xf32, #tpu.memory_space<vmem>>, vector<1x128x128xf32>
    %114 = vector.shape_cast %113 : vector<1x128x128xf32> to vector<128x128xf32>
    %cst_38 = arith.constant dense<0.000000e+00> : vector<16x128xf32>
    %115 = tpu.matmul %112, %114, %cst_38 {dimension_numbers = #tpu.dot_dimension_numbers<[1], [0], [0], [1], [0, 0, 1, 1], [], []>} : vector<16x128xf32>, vector<128x128xf32>, vector<16x128xf32> -> vector<16x128xf32>
    %c0_39 = arith.constant 0 : index
    %c0_40 = arith.constant 0 : index
    %c0_41 = arith.constant 0 : index
    %116 = vector.load %arg7[%c0_39, %c0_40, %c0_41] : memref<2x1x128xf32, #tpu.memory_space<vmem>>, vector<1x1x128xf32>
    %117 = vector.shape_cast %116 : vector<1x1x128xf32> to vector<1x128xf32>
    %118 = vector.broadcast %117 : vector<1x128xf32> to vector<16x128xf32>
    %119 = arith.addf %115, %118 : vector<16x128xf32>
    %120 = arith.addf %119, %26 : vector<16x128xf32>
    %c0_42 = arith.constant 0 : index
    %c0_43 = arith.constant 0 : index
    %c0_44 = arith.constant 0 : index
    %121 = vector.load %arg8[%c0_42, %c0_43, %c0_44] : memref<2x1x128xf32, #tpu.memory_space<vmem>>, vector<1x1x128xf32>
    %122 = vector.shape_cast %121 : vector<1x1x128xf32> to vector<1x128xf32>
    %c0_45 = arith.constant 0 : index
    %c0_46 = arith.constant 0 : index
    %c0_47 = arith.constant 0 : index
    %123 = vector.load %arg9[%c0_45, %c0_46, %c0_47] : memref<2x1x128xf32, #tpu.memory_space<vmem>>, vector<1x1x128xf32>
    %124 = vector.shape_cast %123 : vector<1x1x128xf32> to vector<1x128xf32>
    %cst_48 = arith.constant dense<0.000000e+00> : vector<16xf32>
    %125 = vector.multi_reduction <add>, %120, %cst_48 [1] : vector<16x128xf32> to vector<16xf32>
    %126 = vector.shape_cast %125 : vector<16xf32> to vector<16x1xf32>
    %cst_49 = arith.constant 1.280000e+02 : f32
    %127 = vector.broadcast %cst_49 : f32 to vector<16x1xf32>
    %128 = arith.divf %126, %127 : vector<16x1xf32>
    %129 = vector.broadcast %128 : vector<16x1xf32> to vector<16x128xf32>
    %130 = arith.subf %120, %129 : vector<16x128xf32>
    %131 = vector.broadcast %128 : vector<16x1xf32> to vector<16x128xf32>
    %132 = arith.subf %120, %131 : vector<16x128xf32>
    %133 = arith.mulf %130, %132 : vector<16x128xf32>
    %cst_50 = arith.constant dense<0.000000e+00> : vector<16xf32>
    %134 = vector.multi_reduction <add>, %133, %cst_50 [1] : vector<16x128xf32> to vector<16xf32>
    %135 = vector.shape_cast %134 : vector<16xf32> to vector<16x1xf32>
    %cst_51 = arith.constant 1.280000e+02 : f32
    %136 = vector.broadcast %cst_51 : f32 to vector<16x1xf32>
    %137 = arith.divf %135, %136 : vector<16x1xf32>
    %138 = vector.broadcast %128 : vector<16x1xf32> to vector<16x128xf32>
    %139 = arith.subf %120, %138 : vector<16x128xf32>
    %cst_52 = arith.constant 9.99999974E-6 : f32
    %140 = vector.broadcast %cst_52 : f32 to vector<16x1xf32>
    %141 = arith.addf %137, %140 : vector<16x1xf32>
    %142 = math.rsqrt %141 : vector<16x1xf32>
    %143 = vector.broadcast %142 : vector<16x1xf32> to vector<16x128xf32>
    %144 = arith.mulf %139, %143 : vector<16x128xf32>
    %145 = vector.broadcast %122 : vector<1x128xf32> to vector<16x128xf32>
    %146 = arith.mulf %144, %145 : vector<16x128xf32>
    %147 = vector.broadcast %124 : vector<1x128xf32> to vector<16x128xf32>
    %148 = arith.addf %146, %147 : vector<16x128xf32>
    %c0_53 = arith.constant 0 : index
    %c0_54 = arith.constant 0 : index
    %c0_55 = arith.constant 0 : index
    %149 = vector.load %arg10[%c0_53, %c0_54, %c0_55] : memref<2x128x256xf32, #tpu.memory_space<vmem>>, vector<1x128x256xf32>
    %150 = vector.shape_cast %149 : vector<1x128x256xf32> to vector<128x256xf32>
    %cst_56 = arith.constant dense<0.000000e+00> : vector<16x256xf32>
    %151 = tpu.matmul %148, %150, %cst_56 {dimension_numbers = #tpu.dot_dimension_numbers<[1], [0], [0], [1], [0, 0, 1, 1], [], []>} : vector<16x128xf32>, vector<128x256xf32>, vector<16x256xf32> -> vector<16x256xf32>
    %c0_57 = arith.constant 0 : index
    %c0_58 = arith.constant 0 : index
    %c0_59 = arith.constant 0 : index
    %152 = vector.load %arg11[%c0_57, %c0_58, %c0_59] : memref<2x1x256xf32, #tpu.memory_space<vmem>>, vector<1x1x256xf32>
    %153 = vector.shape_cast %152 : vector<1x1x256xf32> to vector<1x256xf32>
    %154 = vector.broadcast %153 : vector<1x256xf32> to vector<16x256xf32>
    %155 = arith.addf %151, %154 : vector<16x256xf32>
    %cst_60 = arith.constant 5.000000e-01 : f32
    %156 = vector.broadcast %cst_60 : f32 to vector<16x256xf32>
    %157 = arith.mulf %156, %155 : vector<16x256xf32>
    %cst_61 = arith.constant 4.471500e-02 : f32
    %158 = vector.broadcast %cst_61 : f32 to vector<16x256xf32>
    %159 = arith.mulf %158, %155 : vector<16x256xf32>
    %160 = arith.mulf %159, %155 : vector<16x256xf32>
    %161 = arith.mulf %160, %155 : vector<16x256xf32>
    %162 = arith.addf %155, %161 : vector<16x256xf32>
    %cst_62 = arith.constant 0.797884583 : f32
    %163 = vector.broadcast %cst_62 : f32 to vector<16x256xf32>
    %164 = arith.mulf %163, %162 : vector<16x256xf32>
    %165 = math.tanh %164 : vector<16x256xf32>
    %cst_63 = arith.constant 1.000000e+00 : f32
    %166 = vector.broadcast %cst_63 : f32 to vector<16x256xf32>
    %167 = arith.addf %166, %165 : vector<16x256xf32>
    %168 = arith.mulf %157, %167 : vector<16x256xf32>
    %c0_64 = arith.constant 0 : index
    %c0_65 = arith.constant 0 : index
    %c0_66 = arith.constant 0 : index
    %169 = vector.load %arg12[%c0_64, %c0_65, %c0_66] : memref<2x256x128xf32, #tpu.memory_space<vmem>>, vector<1x256x128xf32>
    %170 = vector.shape_cast %169 : vector<1x256x128xf32> to vector<256x128xf32>
    %cst_67 = arith.constant dense<0.000000e+00> : vector<16x128xf32>
    %171 = tpu.matmul %168, %170, %cst_67 {dimension_numbers = #tpu.dot_dimension_numbers<[1], [0], [0], [1], [0, 0, 1, 1], [], []>} : vector<16x256xf32>, vector<256x128xf32>, vector<16x128xf32> -> vector<16x128xf32>
    %c0_68 = arith.constant 0 : index
    %c0_69 = arith.constant 0 : index
    %c0_70 = arith.constant 0 : index
    %172 = vector.load %arg13[%c0_68, %c0_69, %c0_70] : memref<2x1x128xf32, #tpu.memory_space<vmem>>, vector<1x1x128xf32>
    %173 = vector.shape_cast %172 : vector<1x1x128xf32> to vector<1x128xf32>
    %174 = vector.broadcast %173 : vector<1x128xf32> to vector<16x128xf32>
    %175 = arith.addf %171, %174 : vector<16x128xf32>
    %176 = arith.addf %175, %148 : vector<16x128xf32>
    %c0_71 = arith.constant 0 : index
    %c0_72 = arith.constant 0 : index
    %c0_73 = arith.constant 0 : index
    %177 = vector.load %arg14[%c0_71, %c0_72, %c0_73] : memref<2x1x128xf32, #tpu.memory_space<vmem>>, vector<1x1x128xf32>
    %178 = vector.shape_cast %177 : vector<1x1x128xf32> to vector<1x128xf32>
    %c0_74 = arith.constant 0 : index
    %c0_75 = arith.constant 0 : index
    %c0_76 = arith.constant 0 : index
    %179 = vector.load %arg15[%c0_74, %c0_75, %c0_76] : memref<2x1x128xf32, #tpu.memory_space<vmem>>, vector<1x1x128xf32>
    %180 = vector.shape_cast %179 : vector<1x1x128xf32> to vector<1x128xf32>
    %cst_77 = arith.constant dense<0.000000e+00> : vector<16xf32>
    %181 = vector.multi_reduction <add>, %176, %cst_77 [1] : vector<16x128xf32> to vector<16xf32>
    %182 = vector.shape_cast %181 : vector<16xf32> to vector<16x1xf32>
    %cst_78 = arith.constant 1.280000e+02 : f32
    %183 = vector.broadcast %cst_78 : f32 to vector<16x1xf32>
    %184 = arith.divf %182, %183 : vector<16x1xf32>
    %185 = vector.broadcast %184 : vector<16x1xf32> to vector<16x128xf32>
    %186 = arith.subf %176, %185 : vector<16x128xf32>
    %187 = vector.broadcast %184 : vector<16x1xf32> to vector<16x128xf32>
    %188 = arith.subf %176, %187 : vector<16x128xf32>
    %189 = arith.mulf %186, %188 : vector<16x128xf32>
    %cst_79 = arith.constant dense<0.000000e+00> : vector<16xf32>
    %190 = vector.multi_reduction <add>, %189, %cst_79 [1] : vector<16x128xf32> to vector<16xf32>
    %191 = vector.shape_cast %190 : vector<16xf32> to vector<16x1xf32>
    %cst_80 = arith.constant 1.280000e+02 : f32
    %192 = vector.broadcast %cst_80 : f32 to vector<16x1xf32>
    %193 = arith.divf %191, %192 : vector<16x1xf32>
    %194 = vector.broadcast %184 : vector<16x1xf32> to vector<16x128xf32>
    %195 = arith.subf %176, %194 : vector<16x128xf32>
    %cst_81 = arith.constant 9.99999974E-6 : f32
    %196 = vector.broadcast %cst_81 : f32 to vector<16x1xf32>
    %197 = arith.addf %193, %196 : vector<16x1xf32>
    %198 = math.rsqrt %197 : vector<16x1xf32>
    %199 = vector.broadcast %198 : vector<16x1xf32> to vector<16x128xf32>
    %200 = arith.mulf %195, %199 : vector<16x128xf32>
    %201 = vector.broadcast %178 : vector<1x128xf32> to vector<16x128xf32>
    %202 = arith.mulf %200, %201 : vector<16x128xf32>
    %203 = vector.broadcast %180 : vector<1x128xf32> to vector<16x128xf32>
    %204 = arith.addf %202, %203 : vector<16x128xf32>
    %c1 = arith.constant 1 : index
    %c0_82 = arith.constant 0 : index
    %c0_83 = arith.constant 0 : index
    %205 = vector.load %arg4[%c1, %c0_82, %c0_83] : memref<2x128x384xf32, #tpu.memory_space<vmem>>, vector<1x128x384xf32>
    %206 = vector.shape_cast %205 : vector<1x128x384xf32> to vector<128x384xf32>
    %cst_84 = arith.constant dense<0.000000e+00> : vector<16x384xf32>
    %207 = tpu.matmul %204, %206, %cst_84 {dimension_numbers = #tpu.dot_dimension_numbers<[1], [0], [0], [1], [0, 0, 1, 1], [], []>} : vector<16x128xf32>, vector<128x384xf32>, vector<16x384xf32> -> vector<16x384xf32>
    %c1_85 = arith.constant 1 : index
    %c0_86 = arith.constant 0 : index
    %c0_87 = arith.constant 0 : index
    %208 = vector.load %arg5[%c1_85, %c0_86, %c0_87] : memref<2x1x384xf32, #tpu.memory_space<vmem>>, vector<1x1x384xf32>
    %209 = vector.shape_cast %208 : vector<1x1x384xf32> to vector<1x384xf32>
    %210 = vector.broadcast %209 : vector<1x384xf32> to vector<16x384xf32>
    %211 = arith.addf %207, %210 : vector<16x384xf32>
    %212 = vector.extract_strided_slice %211 {offsets = [0, 0], sizes = [16, 128], strides = [1, 1]} : vector<16x384xf32> to vector<16x128xf32>
    %cst_88 = arith.constant 1.250000e-01 : f32
    %213 = vector.broadcast %cst_88 : f32 to vector<16x128xf32>
    %214 = arith.mulf %212, %213 : vector<16x128xf32>
    %215 = vector.extract_strided_slice %211 {offsets = [0, 128], sizes = [16, 128], strides = [1, 1]} : vector<16x384xf32> to vector<16x128xf32>
    %216 = vector.extract_strided_slice %211 {offsets = [0, 256], sizes = [16, 128], strides = [1, 1]} : vector<16x384xf32> to vector<16x128xf32>
    %217 = vector.extract_strided_slice %27 {offsets = [0, 0], sizes = [1, 8], strides = [1, 1]} : vector<2x8xf32> to vector<1x8xf32>
    %218 = vector.extract_strided_slice %214 {offsets = [0, 0], sizes = [8, 64], strides = [1, 1]} : vector<16x128xf32> to vector<8x64xf32>
    %219 = vector.extract_strided_slice %215 {offsets = [0, 0], sizes = [8, 64], strides = [1, 1]} : vector<16x128xf32> to vector<8x64xf32>
    %220 = vector.extract_strided_slice %216 {offsets = [0, 0], sizes = [8, 64], strides = [1, 1]} : vector<16x128xf32> to vector<8x64xf32>
    %cst_89 = arith.constant dense<0.000000e+00> : vector<8x8xf32>
    %221 = tpu.matmul %218, %219, %cst_89 {dimension_numbers = #tpu.dot_dimension_numbers<[1], [1], [0], [0], [0, 0, 1, 0], [], []>} : vector<8x64xf32>, vector<8x64xf32>, vector<8x8xf32> -> vector<8x8xf32>
    %222 = vector.broadcast %217 : vector<1x8xf32> to vector<8x8xf32>
    %223 = arith.addf %221, %222 : vector<8x8xf32>
    %cst_90 = arith.constant dense<0xFF800000> : vector<8xf32>
    %224 = vector.multi_reduction <maximumf>, %223, %cst_90 [1] : vector<8x8xf32> to vector<8xf32>
    %225 = vector.shape_cast %224 : vector<8xf32> to vector<8x1xf32>
    %226 = vector.broadcast %225 : vector<8x1xf32> to vector<8x8xf32>
    %227 = arith.subf %223, %226 : vector<8x8xf32>
    %228 = math.exp %227 : vector<8x8xf32>
    %cst_91 = arith.constant dense<0.000000e+00> : vector<8xf32>
    %229 = vector.multi_reduction <add>, %228, %cst_91 [1] : vector<8x8xf32> to vector<8xf32>
    %230 = vector.shape_cast %229 : vector<8xf32> to vector<8x1xf32>
    %231 = tpu.reciprocal %230 {approx = true} : vector<8x1xf32> -> vector<8x1xf32>
    %232 = vector.broadcast %231 : vector<8x1xf32> to vector<8x8xf32>
    %233 = arith.mulf %228, %232 : vector<8x8xf32>
    %cst_92 = arith.constant dense<0.000000e+00> : vector<8x64xf32>
    %234 = tpu.matmul %233, %220, %cst_92 {dimension_numbers = #tpu.dot_dimension_numbers<[1], [0], [0], [1], [0, 0, 1, 1], [], []>} : vector<8x8xf32>, vector<8x64xf32>, vector<8x64xf32> -> vector<8x64xf32>
    %235 = vector.extract_strided_slice %214 {offsets = [0, 64], sizes = [8, 64], strides = [1, 1]} : vector<16x128xf32> to vector<8x64xf32>
    %236 = vector.extract_strided_slice %215 {offsets = [0, 64], sizes = [8, 64], strides = [1, 1]} : vector<16x128xf32> to vector<8x64xf32>
    %237 = vector.extract_strided_slice %216 {offsets = [0, 64], sizes = [8, 64], strides = [1, 1]} : vector<16x128xf32> to vector<8x64xf32>
    %cst_93 = arith.constant dense<0.000000e+00> : vector<8x8xf32>
    %238 = tpu.matmul %235, %236, %cst_93 {dimension_numbers = #tpu.dot_dimension_numbers<[1], [1], [0], [0], [0, 0, 1, 0], [], []>} : vector<8x64xf32>, vector<8x64xf32>, vector<8x8xf32> -> vector<8x8xf32>
    %239 = vector.broadcast %217 : vector<1x8xf32> to vector<8x8xf32>
    %240 = arith.addf %238, %239 : vector<8x8xf32>
    %cst_94 = arith.constant dense<0xFF800000> : vector<8xf32>
    %241 = vector.multi_reduction <maximumf>, %240, %cst_94 [1] : vector<8x8xf32> to vector<8xf32>
    %242 = vector.shape_cast %241 : vector<8xf32> to vector<8x1xf32>
    %243 = vector.broadcast %242 : vector<8x1xf32> to vector<8x8xf32>
    %244 = arith.subf %240, %243 : vector<8x8xf32>
    %245 = math.exp %244 : vector<8x8xf32>
    %cst_95 = arith.constant dense<0.000000e+00> : vector<8xf32>
    %246 = vector.multi_reduction <add>, %245, %cst_95 [1] : vector<8x8xf32> to vector<8xf32>
    %247 = vector.shape_cast %246 : vector<8xf32> to vector<8x1xf32>
    %248 = tpu.reciprocal %247 {approx = true} : vector<8x1xf32> -> vector<8x1xf32>
    %249 = vector.broadcast %248 : vector<8x1xf32> to vector<8x8xf32>
    %250 = arith.mulf %245, %249 : vector<8x8xf32>
    %cst_96 = arith.constant dense<0.000000e+00> : vector<8x64xf32>
    %251 = tpu.matmul %250, %237, %cst_96 {dimension_numbers = #tpu.dot_dimension_numbers<[1], [0], [0], [1], [0, 0, 1, 1], [], []>} : vector<8x8xf32>, vector<8x64xf32>, vector<8x64xf32> -> vector<8x64xf32>
    %252 = tpu.concatenate %234, %251 in 1 : vector<8x64xf32>, vector<8x64xf32> -> vector<8x128xf32>
    %253 = vector.extract_strided_slice %27 {offsets = [1, 0], sizes = [1, 8], strides = [1, 1]} : vector<2x8xf32> to vector<1x8xf32>
    %254 = vector.extract_strided_slice %214 {offsets = [8, 0], sizes = [8, 64], strides = [1, 1]} : vector<16x128xf32> to vector<8x64xf32>
    %255 = vector.extract_strided_slice %215 {offsets = [8, 0], sizes = [8, 64], strides = [1, 1]} : vector<16x128xf32> to vector<8x64xf32>
    %256 = vector.extract_strided_slice %216 {offsets = [8, 0], sizes = [8, 64], strides = [1, 1]} : vector<16x128xf32> to vector<8x64xf32>
    %cst_97 = arith.constant dense<0.000000e+00> : vector<8x8xf32>
    %257 = tpu.matmul %254, %255, %cst_97 {dimension_numbers = #tpu.dot_dimension_numbers<[1], [1], [0], [0], [0, 0, 1, 0], [], []>} : vector<8x64xf32>, vector<8x64xf32>, vector<8x8xf32> -> vector<8x8xf32>
    %258 = vector.broadcast %253 : vector<1x8xf32> to vector<8x8xf32>
    %259 = arith.addf %257, %258 : vector<8x8xf32>
    %cst_98 = arith.constant dense<0xFF800000> : vector<8xf32>
    %260 = vector.multi_reduction <maximumf>, %259, %cst_98 [1] : vector<8x8xf32> to vector<8xf32>
    %261 = vector.shape_cast %260 : vector<8xf32> to vector<8x1xf32>
    %262 = vector.broadcast %261 : vector<8x1xf32> to vector<8x8xf32>
    %263 = arith.subf %259, %262 : vector<8x8xf32>
    %264 = math.exp %263 : vector<8x8xf32>
    %cst_99 = arith.constant dense<0.000000e+00> : vector<8xf32>
    %265 = vector.multi_reduction <add>, %264, %cst_99 [1] : vector<8x8xf32> to vector<8xf32>
    %266 = vector.shape_cast %265 : vector<8xf32> to vector<8x1xf32>
    %267 = tpu.reciprocal %266 {approx = true} : vector<8x1xf32> -> vector<8x1xf32>
    %268 = vector.broadcast %267 : vector<8x1xf32> to vector<8x8xf32>
    %269 = arith.mulf %264, %268 : vector<8x8xf32>
    %cst_100 = arith.constant dense<0.000000e+00> : vector<8x64xf32>
    %270 = tpu.matmul %269, %256, %cst_100 {dimension_numbers = #tpu.dot_dimension_numbers<[1], [0], [0], [1], [0, 0, 1, 1], [], []>} : vector<8x8xf32>, vector<8x64xf32>, vector<8x64xf32> -> vector<8x64xf32>
    %271 = vector.extract_strided_slice %214 {offsets = [8, 64], sizes = [8, 64], strides = [1, 1]} : vector<16x128xf32> to vector<8x64xf32>
    %272 = vector.extract_strided_slice %215 {offsets = [8, 64], sizes = [8, 64], strides = [1, 1]} : vector<16x128xf32> to vector<8x64xf32>
    %273 = vector.extract_strided_slice %216 {offsets = [8, 64], sizes = [8, 64], strides = [1, 1]} : vector<16x128xf32> to vector<8x64xf32>
    %cst_101 = arith.constant dense<0.000000e+00> : vector<8x8xf32>
    %274 = tpu.matmul %271, %272, %cst_101 {dimension_numbers = #tpu.dot_dimension_numbers<[1], [1], [0], [0], [0, 0, 1, 0], [], []>} : vector<8x64xf32>, vector<8x64xf32>, vector<8x8xf32> -> vector<8x8xf32>
    %275 = vector.broadcast %253 : vector<1x8xf32> to vector<8x8xf32>
    %276 = arith.addf %274, %275 : vector<8x8xf32>
    %cst_102 = arith.constant dense<0xFF800000> : vector<8xf32>
    %277 = vector.multi_reduction <maximumf>, %276, %cst_102 [1] : vector<8x8xf32> to vector<8xf32>
    %278 = vector.shape_cast %277 : vector<8xf32> to vector<8x1xf32>
    %279 = vector.broadcast %278 : vector<8x1xf32> to vector<8x8xf32>
    %280 = arith.subf %276, %279 : vector<8x8xf32>
    %281 = math.exp %280 : vector<8x8xf32>
    %cst_103 = arith.constant dense<0.000000e+00> : vector<8xf32>
    %282 = vector.multi_reduction <add>, %281, %cst_103 [1] : vector<8x8xf32> to vector<8xf32>
    %283 = vector.shape_cast %282 : vector<8xf32> to vector<8x1xf32>
    %284 = tpu.reciprocal %283 {approx = true} : vector<8x1xf32> -> vector<8x1xf32>
    %285 = vector.broadcast %284 : vector<8x1xf32> to vector<8x8xf32>
    %286 = arith.mulf %281, %285 : vector<8x8xf32>
    %cst_104 = arith.constant dense<0.000000e+00> : vector<8x64xf32>
    %287 = tpu.matmul %286, %273, %cst_104 {dimension_numbers = #tpu.dot_dimension_numbers<[1], [0], [0], [1], [0, 0, 1, 1], [], []>} : vector<8x8xf32>, vector<8x64xf32>, vector<8x64xf32> -> vector<8x64xf32>
    %288 = tpu.concatenate %270, %287 in 1 : vector<8x64xf32>, vector<8x64xf32> -> vector<8x128xf32>
    %289 = tpu.concatenate %252, %288 in 0 : vector<8x128xf32>, vector<8x128xf32> -> vector<16x128xf32>
    %c1_105 = arith.constant 1 : index
    %c0_106 = arith.constant 0 : index
    %c0_107 = arith.constant 0 : index
    %290 = vector.load %arg6[%c1_105, %c0_106, %c0_107] : memref<2x128x128xf32, #tpu.memory_space<vmem>>, vector<1x128x128xf32>
    %291 = vector.shape_cast %290 : vector<1x128x128xf32> to vector<128x128xf32>
    %cst_108 = arith.constant dense<0.000000e+00> : vector<16x128xf32>
    %292 = tpu.matmul %289, %291, %cst_108 {dimension_numbers = #tpu.dot_dimension_numbers<[1], [0], [0], [1], [0, 0, 1, 1], [], []>} : vector<16x128xf32>, vector<128x128xf32>, vector<16x128xf32> -> vector<16x128xf32>
    %c1_109 = arith.constant 1 : index
    %c0_110 = arith.constant 0 : index
    %c0_111 = arith.constant 0 : index
    %293 = vector.load %arg7[%c1_109, %c0_110, %c0_111] : memref<2x1x128xf32, #tpu.memory_space<vmem>>, vector<1x1x128xf32>
    %294 = vector.shape_cast %293 : vector<1x1x128xf32> to vector<1x128xf32>
    %295 = vector.broadcast %294 : vector<1x128xf32> to vector<16x128xf32>
    %296 = arith.addf %292, %295 : vector<16x128xf32>
    %297 = arith.addf %296, %204 : vector<16x128xf32>
    %c1_112 = arith.constant 1 : index
    %c0_113 = arith.constant 0 : index
    %c0_114 = arith.constant 0 : index
    %298 = vector.load %arg8[%c1_112, %c0_113, %c0_114] : memref<2x1x128xf32, #tpu.memory_space<vmem>>, vector<1x1x128xf32>
    %299 = vector.shape_cast %298 : vector<1x1x128xf32> to vector<1x128xf32>
    %c1_115 = arith.constant 1 : index
    %c0_116 = arith.constant 0 : index
    %c0_117 = arith.constant 0 : index
    %300 = vector.load %arg9[%c1_115, %c0_116, %c0_117] : memref<2x1x128xf32, #tpu.memory_space<vmem>>, vector<1x1x128xf32>
    %301 = vector.shape_cast %300 : vector<1x1x128xf32> to vector<1x128xf32>
    %cst_118 = arith.constant dense<0.000000e+00> : vector<16xf32>
    %302 = vector.multi_reduction <add>, %297, %cst_118 [1] : vector<16x128xf32> to vector<16xf32>
    %303 = vector.shape_cast %302 : vector<16xf32> to vector<16x1xf32>
    %cst_119 = arith.constant 1.280000e+02 : f32
    %304 = vector.broadcast %cst_119 : f32 to vector<16x1xf32>
    %305 = arith.divf %303, %304 : vector<16x1xf32>
    %306 = vector.broadcast %305 : vector<16x1xf32> to vector<16x128xf32>
    %307 = arith.subf %297, %306 : vector<16x128xf32>
    %308 = vector.broadcast %305 : vector<16x1xf32> to vector<16x128xf32>
    %309 = arith.subf %297, %308 : vector<16x128xf32>
    %310 = arith.mulf %307, %309 : vector<16x128xf32>
    %cst_120 = arith.constant dense<0.000000e+00> : vector<16xf32>
    %311 = vector.multi_reduction <add>, %310, %cst_120 [1] : vector<16x128xf32> to vector<16xf32>
    %312 = vector.shape_cast %311 : vector<16xf32> to vector<16x1xf32>
    %cst_121 = arith.constant 1.280000e+02 : f32
    %313 = vector.broadcast %cst_121 : f32 to vector<16x1xf32>
    %314 = arith.divf %312, %313 : vector<16x1xf32>
    %315 = vector.broadcast %305 : vector<16x1xf32> to vector<16x128xf32>
    %316 = arith.subf %297, %315 : vector<16x128xf32>
    %cst_122 = arith.constant 9.99999974E-6 : f32
    %317 = vector.broadcast %cst_122 : f32 to vector<16x1xf32>
    %318 = arith.addf %314, %317 : vector<16x1xf32>
    %319 = math.rsqrt %318 : vector<16x1xf32>
    %320 = vector.broadcast %319 : vector<16x1xf32> to vector<16x128xf32>
    %321 = arith.mulf %316, %320 : vector<16x128xf32>
    %322 = vector.broadcast %299 : vector<1x128xf32> to vector<16x128xf32>
    %323 = arith.mulf %321, %322 : vector<16x128xf32>
    %324 = vector.broadcast %301 : vector<1x128xf32> to vector<16x128xf32>
    %325 = arith.addf %323, %324 : vector<16x128xf32>
    %c1_123 = arith.constant 1 : index
    %c0_124 = arith.constant 0 : index
    %c0_125 = arith.constant 0 : index
    %326 = vector.load %arg10[%c1_123, %c0_124, %c0_125] : memref<2x128x256xf32, #tpu.memory_space<vmem>>, vector<1x128x256xf32>
    %327 = vector.shape_cast %326 : vector<1x128x256xf32> to vector<128x256xf32>
    %cst_126 = arith.constant dense<0.000000e+00> : vector<16x256xf32>
    %328 = tpu.matmul %325, %327, %cst_126 {dimension_numbers = #tpu.dot_dimension_numbers<[1], [0], [0], [1], [0, 0, 1, 1], [], []>} : vector<16x128xf32>, vector<128x256xf32>, vector<16x256xf32> -> vector<16x256xf32>
    %c1_127 = arith.constant 1 : index
    %c0_128 = arith.constant 0 : index
    %c0_129 = arith.constant 0 : index
    %329 = vector.load %arg11[%c1_127, %c0_128, %c0_129] : memref<2x1x256xf32, #tpu.memory_space<vmem>>, vector<1x1x256xf32>
    %330 = vector.shape_cast %329 : vector<1x1x256xf32> to vector<1x256xf32>
    %331 = vector.broadcast %330 : vector<1x256xf32> to vector<16x256xf32>
    %332 = arith.addf %328, %331 : vector<16x256xf32>
    %cst_130 = arith.constant 5.000000e-01 : f32
    %333 = vector.broadcast %cst_130 : f32 to vector<16x256xf32>
    %334 = arith.mulf %333, %332 : vector<16x256xf32>
    %cst_131 = arith.constant 4.471500e-02 : f32
    %335 = vector.broadcast %cst_131 : f32 to vector<16x256xf32>
    %336 = arith.mulf %335, %332 : vector<16x256xf32>
    %337 = arith.mulf %336, %332 : vector<16x256xf32>
    %338 = arith.mulf %337, %332 : vector<16x256xf32>
    %339 = arith.addf %332, %338 : vector<16x256xf32>
    %cst_132 = arith.constant 0.797884583 : f32
    %340 = vector.broadcast %cst_132 : f32 to vector<16x256xf32>
    %341 = arith.mulf %340, %339 : vector<16x256xf32>
    %342 = math.tanh %341 : vector<16x256xf32>
    %cst_133 = arith.constant 1.000000e+00 : f32
    %343 = vector.broadcast %cst_133 : f32 to vector<16x256xf32>
    %344 = arith.addf %343, %342 : vector<16x256xf32>
    %345 = arith.mulf %334, %344 : vector<16x256xf32>
    %c1_134 = arith.constant 1 : index
    %c0_135 = arith.constant 0 : index
    %c0_136 = arith.constant 0 : index
    %346 = vector.load %arg12[%c1_134, %c0_135, %c0_136] : memref<2x256x128xf32, #tpu.memory_space<vmem>>, vector<1x256x128xf32>
    %347 = vector.shape_cast %346 : vector<1x256x128xf32> to vector<256x128xf32>
    %cst_137 = arith.constant dense<0.000000e+00> : vector<16x128xf32>
    %348 = tpu.matmul %345, %347, %cst_137 {dimension_numbers = #tpu.dot_dimension_numbers<[1], [0], [0], [1], [0, 0, 1, 1], [], []>} : vector<16x256xf32>, vector<256x128xf32>, vector<16x128xf32> -> vector<16x128xf32>
    %c1_138 = arith.constant 1 : index
    %c0_139 = arith.constant 0 : index
    %c0_140 = arith.constant 0 : index
    %349 = vector.load %arg13[%c1_138, %c0_139, %c0_140] : memref<2x1x128xf32, #tpu.memory_space<vmem>>, vector<1x1x128xf32>
    %350 = vector.shape_cast %349 : vector<1x1x128xf32> to vector<1x128xf32>
    %351 = vector.broadcast %350 : vector<1x128xf32> to vector<16x128xf32>
    %352 = arith.addf %348, %351 : vector<16x128xf32>
    %353 = arith.addf %352, %325 : vector<16x128xf32>
    %c1_141 = arith.constant 1 : index
    %c0_142 = arith.constant 0 : index
    %c0_143 = arith.constant 0 : index
    %354 = vector.load %arg14[%c1_141, %c0_142, %c0_143] : memref<2x1x128xf32, #tpu.memory_space<vmem>>, vector<1x1x128xf32>
    %355 = vector.shape_cast %354 : vector<1x1x128xf32> to vector<1x128xf32>
    %c1_144 = arith.constant 1 : index
    %c0_145 = arith.constant 0 : index
    %c0_146 = arith.constant 0 : index
    %356 = vector.load %arg15[%c1_144, %c0_145, %c0_146] : memref<2x1x128xf32, #tpu.memory_space<vmem>>, vector<1x1x128xf32>
    %357 = vector.shape_cast %356 : vector<1x1x128xf32> to vector<1x128xf32>
    %cst_147 = arith.constant dense<0.000000e+00> : vector<16xf32>
    %358 = vector.multi_reduction <add>, %353, %cst_147 [1] : vector<16x128xf32> to vector<16xf32>
    %359 = vector.shape_cast %358 : vector<16xf32> to vector<16x1xf32>
    %cst_148 = arith.constant 1.280000e+02 : f32
    %360 = vector.broadcast %cst_148 : f32 to vector<16x1xf32>
    %361 = arith.divf %359, %360 : vector<16x1xf32>
    %362 = vector.broadcast %361 : vector<16x1xf32> to vector<16x128xf32>
    %363 = arith.subf %353, %362 : vector<16x128xf32>
    %364 = vector.broadcast %361 : vector<16x1xf32> to vector<16x128xf32>
    %365 = arith.subf %353, %364 : vector<16x128xf32>
    %366 = arith.mulf %363, %365 : vector<16x128xf32>
    %cst_149 = arith.constant dense<0.000000e+00> : vector<16xf32>
    %367 = vector.multi_reduction <add>, %366, %cst_149 [1] : vector<16x128xf32> to vector<16xf32>
    %368 = vector.shape_cast %367 : vector<16xf32> to vector<16x1xf32>
    %cst_150 = arith.constant 1.280000e+02 : f32
    %369 = vector.broadcast %cst_150 : f32 to vector<16x1xf32>
    %370 = arith.divf %368, %369 : vector<16x1xf32>
    %371 = vector.broadcast %361 : vector<16x1xf32> to vector<16x128xf32>
    %372 = arith.subf %353, %371 : vector<16x128xf32>
    %cst_151 = arith.constant 9.99999974E-6 : f32
    %373 = vector.broadcast %cst_151 : f32 to vector<16x1xf32>
    %374 = arith.addf %370, %373 : vector<16x1xf32>
    %375 = math.rsqrt %374 : vector<16x1xf32>
    %376 = vector.broadcast %375 : vector<16x1xf32> to vector<16x128xf32>
    %377 = arith.mulf %372, %376 : vector<16x128xf32>
    %378 = vector.broadcast %355 : vector<1x128xf32> to vector<16x128xf32>
    %379 = arith.mulf %377, %378 : vector<16x128xf32>
    %380 = vector.broadcast %357 : vector<1x128xf32> to vector<16x128xf32>
    %381 = arith.addf %379, %380 : vector<16x128xf32>
    %382 = vector.extract_strided_slice %381 {offsets = [0, 0], sizes = [1, 128], strides = [1, 1]} : vector<16x128xf32> to vector<1x128xf32>
    %383 = vector.extract_strided_slice %381 {offsets = [8, 0], sizes = [1, 128], strides = [1, 1]} : vector<16x128xf32> to vector<1x128xf32>
    %384 = tpu.concatenate %382, %383 in 0 : vector<1x128xf32>, vector<1x128xf32> -> vector<2x128xf32>
    %c0_152 = arith.constant 0 : index
    %c0_153 = arith.constant 0 : index
    %385 = vector.load %arg16[%c0_152, %c0_153] : memref<128x128xf32, #tpu.memory_space<vmem>>, vector<128x128xf32>
    %cst_154 = arith.constant dense<0.000000e+00> : vector<2x128xf32>
    %386 = tpu.matmul %384, %385, %cst_154 {dimension_numbers = #tpu.dot_dimension_numbers<[1], [0], [0], [1], [0, 0, 1, 1], [], []>} : vector<2x128xf32>, vector<128x128xf32>, vector<2x128xf32> -> vector<2x128xf32>
    %c0_155 = arith.constant 0 : index
    %c0_156 = arith.constant 0 : index
    %387 = vector.load %arg17[%c0_155, %c0_156] : memref<1x128xf32, #tpu.memory_space<vmem>>, vector<1x128xf32>
    %388 = vector.broadcast %387 : vector<1x128xf32> to vector<2x128xf32>
    %389 = arith.addf %386, %388 : vector<2x128xf32>
    %390 = math.tanh %389 : vector<2x128xf32>
    %c0_157 = arith.constant 0 : index
    %c0_158 = arith.constant 0 : index
    %391 = vector.load %arg18[%c0_157, %c0_158] : memref<128x128xf32, #tpu.memory_space<vmem>>, vector<128x128xf32>
    %cst_159 = arith.constant dense<0.000000e+00> : vector<2x128xf32>
    %392 = tpu.matmul %390, %391, %cst_159 {dimension_numbers = #tpu.dot_dimension_numbers<[1], [0], [0], [1], [0, 0, 1, 1], [], []>} : vector<2x128xf32>, vector<128x128xf32>, vector<2x128xf32> -> vector<2x128xf32>
    %c0_160 = arith.constant 0 : index
    %c0_161 = arith.constant 0 : index
    %393 = vector.load %arg19[%c0_160, %c0_161] : memref<1x128xf32, #tpu.memory_space<vmem>>, vector<1x128xf32>
    %394 = vector.broadcast %393 : vector<1x128xf32> to vector<2x128xf32>
    %395 = arith.addf %392, %394 : vector<2x128xf32>
    %cst_162 = arith.constant 0.000000e+00 : f32
    %396 = vector.broadcast %cst_162 : f32 to vector<2x128xf32>
    %397 = arith.maximumf %395, %396 : vector<2x128xf32>
    %c0_163 = arith.constant 0 : index
    %c0_164 = arith.constant 0 : index
    %398 = vector.load %arg20[%c0_163, %c0_164] : memref<128x128xf32, #tpu.memory_space<vmem>>, vector<128x128xf32>
    %cst_165 = arith.constant dense<0.000000e+00> : vector<2x128xf32>
    %399 = tpu.matmul %397, %398, %cst_165 {dimension_numbers = #tpu.dot_dimension_numbers<[1], [0], [0], [1], [0, 0, 1, 1], [], []>} : vector<2x128xf32>, vector<128x128xf32>, vector<2x128xf32> -> vector<2x128xf32>
    %c0_166 = arith.constant 0 : index
    %c0_167 = arith.constant 0 : index
    %400 = vector.load %arg21[%c0_166, %c0_167] : memref<1x128xf32, #tpu.memory_space<vmem>>, vector<1x128xf32>
    %401 = vector.broadcast %400 : vector<1x128xf32> to vector<2x128xf32>
    %402 = arith.addf %399, %401 : vector<2x128xf32>
    %403 = tpu.iota {dimensions = array<i32: 1>} : vector<2x128xi32>
    %c2_i32 = arith.constant 2 : i32
    %404 = vector.broadcast %c2_i32 : i32 to vector<2x128xi32>
    %405 = arith.cmpi slt, %403, %404 : vector<2x128xi32>
    %cst_168 = arith.constant -1.000000e+30 : f32
    %406 = vector.broadcast %cst_168 : f32 to vector<2x128xf32>
    %407 = arith.select %405, %402, %406 : vector<2x128xi1>, vector<2x128xf32>
    %cst_169 = arith.constant dense<0xFF800000> : vector<2xf32>
    %408 = vector.multi_reduction <maximumf>, %407, %cst_169 [1] : vector<2x128xf32> to vector<2xf32>
    %409 = vector.shape_cast %408 : vector<2xf32> to vector<2x1xf32>
    %410 = vector.broadcast %409 : vector<2x1xf32> to vector<2x128xf32>
    %411 = arith.subf %407, %410 : vector<2x128xf32>
    %412 = math.exp %411 : vector<2x128xf32>
    %cst_170 = arith.constant 0.000000e+00 : f32
    %413 = vector.broadcast %cst_170 : f32 to vector<2x128xf32>
    %414 = arith.select %405, %412, %413 : vector<2x128xi1>, vector<2x128xf32>
    %cst_171 = arith.constant dense<0.000000e+00> : vector<2xf32>
    %415 = vector.multi_reduction <add>, %414, %cst_171 [1] : vector<2x128xf32> to vector<2xf32>
    %416 = vector.shape_cast %415 : vector<2xf32> to vector<2x1xf32>
    %417 = math.log %416 : vector<2x1xf32>
    %418 = vector.broadcast %417 : vector<2x1xf32> to vector<2x128xf32>
    %419 = arith.subf %411, %418 : vector<2x128xf32>
    %c0_172 = arith.constant 0 : index
    %c0_173 = arith.constant 0 : index
    %420 = vector.load %arg22[%c0_172, %c0_173] : memref<2x128xf32, #tpu.memory_space<vmem>>, vector<2x128xf32>
    tpu.vector_store %arg22[%c0_172, %c0_173], %419 {strides = array<i32>} : memref<2x128xf32, #tpu.memory_space<vmem>>, vector<2x128xf32>,
    return
  }
}

</mosaic_0001>

<bundles_post_ra>
// kernel: roberta_fake_news_forward.1
= control target key start
LH: loop header
LB: loop body
LE: loop exit
PB: predicated region body
PF: predicated region fallthrough
CT: control target
= control target key end

     0   :  { %s5171_s0 = inlined_call_operand.vmem [shape: f32[16,128], index: 0, kind: input, shape index: {}]   ;;  %s5172_s1 = inlined_call_operand.vmem [shape: f32[2,8], index: 1, kind: input, shape index: {}]   ;;  %s5173_s2 = inlined_call_operand.vmem [shape: f32[1,128], index: 2, kind: input, shape index: {}]   ;;  %s5174_s3 = inlined_call_operand.vmem [shape: f32[1,128], index: 3, kind: input, shape index: {}]   ;;  %s5175_s4 = inlined_call_operand.hbm [shape: f32[2,128,384], index: 4, kind: input, shape index: {}]   ;;  %s5176_s5 = inlined_call_operand.vmem [shape: f32[2,1,384], index: 5, kind: input, shape index: {}]   ;;  %s5177_s6 = inlined_call_operand.vmem [shape: f32[2,128,128], index: 6, kind: input, shape index: {}]   ;;  %s5178_s7 = inlined_call_operand.vmem [shape: f32[2,1,128], index: 7, kind: input, shape index: {}]   ;;  %s5179_s8 = inlined_call_operand.vmem [shape: f32[2,1,128], index: 8, kind: input, shape index: {}]   ;;  %s5180_s9 = inlined_call_operand.vmem [shape: f32[2,1,128], index: 9, kind: input, shape index: {}]   ;;  %s5181_s10 = inlined_call_operand.hbm [shape: f32[2,128,256], index: 10, kind: input, shape index: {}]   ;;  %s5182_s11 = inlined_call_operand.vmem [shape: f32[2,1,256], index: 11, kind: input, shape index: {}]   ;;  %s5183_s12 = inlined_call_operand.hbm [shape: f32[2,256,128], index: 12, kind: input, shape index: {}]   ;;  %s5184_s13 = inlined_call_operand.vmem [shape: f32[2,1,128], index: 13, kind: input, shape index: {}]   ;;  %s5185_s14 = inlined_call_operand.vmem [shape: f32[2,1,128], index: 14, kind: input, shape index: {}]   ;;  %s5186_s15 = inlined_call_operand.vmem [shape: f32[2,1,128], index: 15, kind: input, shape index: {}]   ;;  %s5187_s16 = inlined_call_operand.vmem [shape: f32[128,128], index: 16, kind: input, shape index: {}]   ;;  %s5188_s17 = inlined_call_operand.vmem [shape: f32[1,128], index: 17, kind: input, shape index: {}]   ;;  %s5189_s18 = inlined_call_operand.hbm [shape: f32[128,128], index: 18, kind: input, shape index: {}]   ;;  %s5190_s19 = inlined_call_operand.vmem [shape: f32[1,128], index: 19, kind: input, shape index: {}]   ;;  %s5191_s20 = inlined_call_operand.hbm [shape: f32[128,128], index: 20, kind: input, shape index: {}]   ;;  %s5192_s21 = inlined_call_operand.vmem [shape: f32[1,128], index: 21, kind: input, shape index: {}]   ;;  %s5193_s22 = inlined_call_operand.hbm [shape: f32[2,128], index: 22, kind: output, shape index: {}]  }
   0x1   :  { %5201 = sst [smem:[#allocation16_spill]] %s5171_s0 }
   0x2   :  { %5202 = sst [smem:[#allocation17_spill]] %s5172_s1 }
   0x3   :  { %5203 = sst [smem:[#allocation18_spill]] %s5173_s2 }
   0x4   :  { %5204 = sst [smem:[#allocation19_spill]] %s5174_s3 }
   0x5   :  { %5205 = sst [smem:[#allocation20_spill]] %s5175_s4 }
   0x6   :  { %5206 = sst [smem:[#allocation21_spill]] %s5176_s5 }
   0x7   :  { %5207 = sst [smem:[#allocation22_spill]] %s5177_s6 }
   0x8   :  { %5208 = sst [smem:[#allocation23_spill]] %s5193_s22 }
   0x9   :  { %27 = vsyncpa [#allocation3], 0 }
   0xa   :  { %28 = vsyncpa [#allocation6], 0 }
   0xb   :  { %29 = vsyncpa [#allocation9], 0 }
   0xc   :  { %30 = vsyncpa [#allocation4], 0  ;;  %s4449_s3 = smov [#allocation5]   ;;  %s4309_s4 = scalar_lea.hbm %s5181_s10, 8192 }
   0xd   :  { %s66_s28 = sshll.u32 %s4449_s3, 4  ;;  %p4310_p0 = scmp.ne.s32.totalorder %s5181_s10, %s4309_s4  ;;  %s67_s28 = int_to_ptr.vmem [resolvable:$true] %s66_s28 }
   0xe   :  { %p4313_p1 = scmp.lt.u32.totalorder %s4309_s4, %s5181_s10 }
  0x10   :  { %p4315_p2 = pnand %p4313_p1, %p4310_p0 }
  0x12   :  { %4318 = shalt.err (!%p4315_p2)
}
  0x13   :  { %s4319_s24 = scalar_lea.vmem %s67_s28, 8192  ;;  %p4324_p4 = scmp.lt.s32.totalorder %s67_s28, %s67_s28 }
  0x14   :  { %p4320_p3 = scmp.ne.s32.totalorder %s67_s28, %s4319_s24  ;;  %p4325_p5 = scmp.lt.s32.totalorder %s4319_s24, %s4319_s24 }
  0x16   :  { %p4326_p6 = por %p4325_p5, %p4324_p4 }
  0x18   :  { %p4327_p7 = pnand %p4326_p6, %p4320_p3 }
  0x1a   :  { %4330 = shalt.err (!%p4327_p7)
}
  0x1b   :  { %s4450_s6 = smov 256   ;;  %s4451_s25 = smov 16  }
  0x1c   :  { %72 = dma.hbm_to_vmem [thread:$0]  %s5181_s10, 8192, %s67_s28, [#allocation6], %s4450_s6, %s4450_s6, %s4451_s25  }
  0x1d   :  { %s4452_s27 = smov [#allocation8]   ;;  %s4453_s29 = smov [#allocation2]  }
  0x1e   :  { %s102_s3 = sshll.u32 %s4452_s27, 4  ;;  %s44_s30 = sshll.u32 %s4453_s29, 4  ;;  %s103_s3 = int_to_ptr.vmem [resolvable:$true] %s102_s3  ;;  %s45_s30 = int_to_ptr.vmem [resolvable:$true] %s44_s30 }
  0x1f   :  { %s4331_s23 = scalar_lea.hbm %s5189_s18, 2048 }
  0x20   :  { %p4332_p8 = scmp.ne.s32.totalorder %s5189_s18, %s4331_s23  ;;  %p4335_p9 = scmp.lt.u32.totalorder %s4331_s23, %s5189_s18 }
  0x22   :  { %p4337_p10 = pnand %p4335_p9, %p4332_p8 }
  0x24   :  { %4340 = shalt.err (!%p4337_p10)
}
  0x25   :  { %s4341_s10 = scalar_lea.vmem %s103_s3, 2048  ;;  %p4346_p12 = scmp.lt.s32.totalorder %s103_s3, %s103_s3 }
  0x26   :  { %p4342_p11 = scmp.ne.s32.totalorder %s103_s3, %s4341_s10  ;;  %p4347_p13 = scmp.lt.s32.totalorder %s4341_s10, %s4341_s10 }
  0x28   :  { %p4348_p0 = por %p4347_p13, %p4346_p12 }
  0x2a   :  { %p4349_p1 = pnand %p4348_p0, %p4342_p11 }
  0x2c   :  { %4352 = shalt.err (!%p4349_p1)
}
  0x2d   :  { %s5199_s28 = smov 128   ;;  %s4455_s6 = smov 8  }
  0x2e   :  { %108 = dma.hbm_to_vmem [thread:$0]  %s5189_s18, 2048, %s103_s3, [#allocation9], %s5199_s28, %s5199_s28, %s4455_s6  }
  0x2f   :  { %s5209_s27 = sld [smem:[#allocation20_spill]] }
  0x35   :  { %s4353_s29 = scalar_lea.hbm %s5209_s27, 12288 }
  0x36   :  { %p4354_p2 = scmp.ne.s32.totalorder %s5209_s27, %s4353_s29  ;;  %p4357_p3 = scmp.lt.u32.totalorder %s4353_s29, %s5209_s27 }
  0x38   :  { %p4359_p4 = pnand %p4357_p3, %p4354_p2 }
  0x3a   :  { %4362 = shalt.err (!%p4359_p4)
}
  0x3b   :  { %s4363_s5 = scalar_lea.vmem %s45_s30, 12288  ;;  %p4368_p6 = scmp.lt.s32.totalorder %s45_s30, %s45_s30 }
  0x3c   :  { %p4364_p5 = scmp.ne.s32.totalorder %s45_s30, %s4363_s5  ;;  %p4369_p7 = scmp.lt.s32.totalorder %s4363_s5, %s4363_s5 }
  0x3e   :  { %p4370_p8 = por %p4369_p7, %p4368_p6 }
  0x40   :  { %p4371_p9 = pnand %p4370_p8, %p4364_p5 }
  0x42   :  { %4374 = shalt.err (!%p4371_p9)
}
  0x43   :  { %s4456_s18 = smov 384   ;;  %s4457_s3 = smov 24  }
  0x44   :  { %50 = dma.hbm_to_vmem [thread:$0]  %s5209_s27, 12288, %s45_s30, [#allocation3], %s4456_s18, %s4456_s18, %s4457_s3  }
  0x45   :  { %s4458_s25 = smov [#allocation7]   ;;  %s4459_s22 = smov [#allocation10]  }
  0x46   :  { %s80_s26 = sshll.u32 %s4458_s25, 4  ;;  %s116_s2 = sshll.u32 %s4459_s22, 4  ;;  %s81_s26 = int_to_ptr.vmem [resolvable:$true] %s80_s26  ;;  %s117_s2 = int_to_ptr.vmem [resolvable:$true] %s116_s2 }
  0x47   :  { %s4375_s0 = scalar_lea.hbm %s5183_s12, 8192 }
  0x48   :  { %p4376_p10 = scmp.ne.s32.totalorder %s5183_s12, %s4375_s0  ;;  %p4379_p11 = scmp.lt.u32.totalorder %s4375_s0, %s5183_s12 }
  0x4a   :  { %p4381_p12 = pnand %p4379_p11, %p4376_p10 }
  0x4c   :  { %4384 = shalt.err (!%p4381_p12)
}
  0x4d   :  { %s4385_s30 = scalar_lea.vmem %s81_s26, 8192  ;;  %p4390_p0 = scmp.lt.s32.totalorder %s81_s26, %s81_s26 }
  0x4e   :  { %p4386_p13 = scmp.ne.s32.totalorder %s81_s26, %s4385_s30  ;;  %p4391_p1 = scmp.lt.s32.totalorder %s4385_s30, %s4385_s30 }
  0x50   :  { %p4392_p2 = por %p4391_p1, %p4390_p0 }
  0x52   :  { %p4393_p3 = pnand %p4392_p2, %p4386_p13 }
  0x54   :  { %4396 = shalt.err (!%p4393_p3)
}
  0x55   :  { %s5210_s27 = smov 128   ;;  %s4397_s10 = scalar_lea.hbm %s5191_s20, 2048 }
  0x56   :  { %86 = dma.hbm_to_vmem [thread:$0]  %s5183_s12, 8192, %s81_s26, [#allocation6], %s5210_s27, %s5210_s27, %s4455_s6  }
  0x57   :  { %p4398_p4 = scmp.ne.s32.totalorder %s5191_s20, %s4397_s10  ;;  %p4401_p5 = scmp.lt.u32.totalorder %s4397_s10, %s5191_s20 }
  0x59   :  { %p4403_p6 = pnand %p4401_p5, %p4398_p4 }
  0x5b   :  { %4406 = shalt.err (!%p4403_p6)
}
  0x5c   :  { %s4407_s0 = scalar_lea.vmem %s117_s2, 2048  ;;  %p4412_p8 = scmp.lt.s32.totalorder %s117_s2, %s117_s2 }
  0x5d   :  { %p4408_p7 = scmp.ne.s32.totalorder %s117_s2, %s4407_s0  ;;  %p4413_p9 = scmp.lt.s32.totalorder %s4407_s0, %s4407_s0 }
  0x5f   :  { %p4414_p10 = por %p4413_p9, %p4412_p8 }
  0x61   :  { %p4415_p11 = pnand %p4414_p10, %p4408_p7 }
  0x63   :  { %4418 = shalt.err (!%p4415_p11)
}
  0x64   :  { %122 = dma.hbm_to_vmem [thread:$0]  %s5191_s20, 2048, %s117_s2, [#allocation9], %s5210_s27, %s5210_s27, %s4455_s6  }
  0x65   :  { %4441 = dma.done.wait [#allocation3], 12288  }
  0x66   :  { %4442 = vsyncadd [#allocation3], 4294955008 }
  0x67   :  { %4443 = dma.done.wait [#allocation6], 16384  }
  0x68   :  { %4444 = vsyncadd [#allocation6], 4294950912 }
  0x69   :  { %4445 = dma.done.wait [#allocation9], 4096  }
  0x6a   :  { %4446 = vsyncadd [#allocation9], 4294963200  ;;  %s5211_s5 = sld [smem:[#allocation16_spill]]  ;;  %v185_v2 = vld [vmem:[#allocation2 + $0x8] sm:$0xff]  ;;  %v188_v3 = vld [vmem:[#allocation2 + $0x20] sm:$0xff]  ;;  %s5212_s2 = sld [smem:[#allocation18_spill]] }
  0x6b   :  { %v184_v4 = vld [vmem:[#allocation2] sm:$0xff]  ;;  %v3817_v5 = vpack.c.bf16 %v188_v3, %v185_v2  ;;  %v187_v6 = vld [vmem:[#allocation2 + $0x18] sm:$0xff]  ;;  %v194_v8 = vld [vmem:[#allocation2 + $0x50] sm:$0xff]  ;;  %s5213_s24 = sld [smem:[#allocation19_spill]]  ;;  %vm4461_vm0 = vmmov 0   ;;  %s5214_s25 = sld [smem:[#allocation21_spill]] }
  0x6c   :  { %v191_v7 = vld [vmem:[#allocation2 + $0x38] sm:$0xff]  ;;  %v3819_v9 = vpack.c.bf16 %v187_v6, %v184_v4  ;;  %v186_v11 = vld [vmem:[#allocation2 + $0x10] sm:$0xff]  ;;  %v189_v12 = vld [vmem:[#allocation2 + $0x28] sm:$0xff]  ;;  %v4460_v4 = vmov 0.0   ;;  %vm407_vm1 = vcmask 523264   ;;  %s4462_s22 = smov 64  }
  0x6d   :  { %v3821_v10 = vpack.c.bf16 %v194_v8, %v191_v7  ;;  %v190_v13 = vld [vmem:[#allocation2 + $0x30] sm:$0xff]  ;;  %3818 = vmatprep.subr.bf16.mxu0 %v3817_v5  ;;  %v3849_v14 = vpack.c.bf16 %v189_v12, %v186_v11  ;;  %v193_v15 = vld [vmem:[#allocation2 + $0x48] sm:$0xff]  ;;  %v200_v17 = vld [vmem:[#allocation2 + $0x80] sm:$0xff]  ;;  %313 = vmatprep.mubr.f32.mxu0 %v4460_v4  ;;  %s5215_s0 = sld [smem:[#allocation17_spill]]  ;;  %vm484_vm2 = vcmask 64512   ;;  %s5216_s23 = sld [smem:[#allocation22_spill]] }
  0x6e   :  { %v197_v16 = vld [vmem:[#allocation2 + $0x68] sm:$0xff]  ;;  %3820 = vmatpush1.bf16.msra.mxu0 %v3819_v9  ;;  %v3823_v18 = vpack.c.bf16 %v193_v15, %v190_v13  ;;  %v192_v19 = vld [vmem:[#allocation2 + $0x40] sm:$0xff]  ;;  %v195_v20 = vld [vmem:[#allocation2 + $0x58] sm:$0xff]  ;;  %vm2877_vm3 = vcmask 1040384   ;;  %vm3164_vm5 = vcmask 1041408  }
  0x6f   :  { %3822 = vmatprep.subr.bf16.mxu0 %v3821_v10  ;;  %3850 = vmatprep.subr.bf16.mxu1 %v3849_v14  ;;  %v3825_v21 = vpack.c.bf16 %v200_v17, %v197_v16  ;;  %v3853_v22 = vpack.c.bf16 %v195_v20, %v192_v19  ;;  %v196_v23 = vld [vmem:[#allocation2 + $0x60] sm:$0xff]  ;;  %v199_v24 = vld [vmem:[#allocation2 + $0x78] sm:$0xff]  ;;  %v206_v35 = vld [vmem:[#allocation2 + $0xb0] sm:$0xff] }
  0x70   :  { %v140_v0 = vld [vmem:[%s5211_s5] sm:$0xff]  ;;  %v141_v1 = vld [vmem:[%s5211_s5 + $0x8] sm:$0xff]  ;;  %3852 = vmatpush3.bf16.msra.mxu1 %v3849_v14  ;;  %v3827_v25 = vpack.c.bf16 %v199_v24, %v196_v23  ;;  %v203_v34 = vld [vmem:[#allocation2 + $0x98] sm:$0xff] }
  0x71   :  { %144 = vadd.xlane.f32.xlu0 %v140_v0  ;;  %3854 = vmatprep.subr.bf16.mxu1 %v3853_v22  ;;  %v198_v36 = vld [vmem:[#allocation2 + $0x70] sm:$0xff]  ;;  %v3829_v37 = vpack.c.bf16 %v206_v35, %v203_v34  ;;  %v201_v38 = vld [vmem:[#allocation2 + $0x88] sm:$0xff]  ;;  %v212_v44 = vld [vmem:[#allocation2 + $0xe0] sm:$0xff] }
  0x72   :  { %3824 = vmatpush1.bf16.msra.mxu0 %v3823_v18  ;;  %v202_v39 = vld [vmem:[#allocation2 + $0x90] sm:$0xff]  ;;  %v205_v40 = vld [vmem:[#allocation2 + $0xa8] sm:$0xff]  ;;  %v3857_v41 = vpack.c.bf16 %v201_v38, %v198_v36  ;;  %v204_v45 = vld [vmem:[#allocation2 + $0xa0] sm:$0xff] }
  0x73   :  { %3826 = vmatprep.subr.bf16.mxu0 %v3825_v21  ;;  %v3831_v42 = vpack.c.bf16 %v205_v40, %v202_v39  ;;  %v209_v43 = vld [vmem:[#allocation2 + $0xc8] sm:$0xff]  ;;  %v207_v47 = vld [vmem:[#allocation2 + $0xb8] sm:$0xff]  ;;  %v208_v48 = vld [vmem:[#allocation2 + $0xc0] sm:$0xff] }
  0x74   :  { %3856 = vmatpush3.bf16.msra.mxu1 %v3853_v22  ;;  %v3833_v46 = vpack.c.bf16 %v212_v44, %v209_v43  ;;  %v211_v49 = vld [vmem:[#allocation2 + $0xd8] sm:$0xff]  ;;  %v3861_v50 = vpack.c.bf16 %v207_v47, %v204_v45  ;;  %v218_v53 = vld [vmem:[#allocation2 + $0x110] sm:$0xff]  ;;  %v213_v56 = vld [vmem:[#allocation2 + $0xe8] sm:$0xff] }
  0x75   :  { %146 = vadd.xlane.f32.xlu0 %v141_v1  ;;  %3858 = vmatprep.subr.bf16.mxu1 %v3857_v41  ;;  %v3835_v51 = vpack.c.bf16 %v211_v49, %v208_v48  ;;  %v215_v52 = vld [vmem:[#allocation2 + $0xf8] sm:$0xff]  ;;  %v210_v54 = vld [vmem:[#allocation2 + $0xd0] sm:$0xff]  ;;  %v217_v58 = vld [vmem:[#allocation2 + $0x108] sm:$0xff] }
  0x76   :  { %3828 = vmatpush1.bf16.msra.mxu0 %v3827_v25  ;;  %v3837_v55 = vpack.c.bf16 %v218_v53, %v215_v52  ;;  %v214_v57 = vld [vmem:[#allocation2 + $0xf0] sm:$0xff]  ;;  %v3865_v59 = vpack.c.bf16 %v213_v56, %v210_v54  ;;  %v221_v61 = vld [vmem:[#allocation2 + $0x128] sm:$0xff]  ;;  %v224_v62 = vld [vmem:[#allocation2 + $0x140] sm:$0xff] }
  0x77   :  { %3830 = vmatprep.subr.bf16.mxu0 %v3829_v37  ;;  %v3839_v60 = vpack.c.bf16 %v217_v58, %v214_v57  ;;  %v216_v63 = vld [vmem:[#allocation2 + $0x100] sm:$0xff]  ;;  %v223_v3 = vld [vmem:[#allocation2 + $0x138] sm:$0xff]  ;;  %v230_v8 = vld [vmem:[#allocation2 + $0x170] sm:$0xff] }
  0x78   :  { %3860 = vmatpush3.bf16.msra.mxu1 %v3857_v41  ;;  %v220_v2 = vld [vmem:[#allocation2 + $0x120] sm:$0xff]  ;;  %v227_v7 = vld [vmem:[#allocation2 + $0x158] sm:$0xff]  ;;  %v222_v9 = vld [vmem:[#allocation2 + $0x130] sm:$0xff] }
  0x79   :  { %3862 = vmatprep.subr.bf16.mxu1 %v3861_v50  ;;  %v3843_v6 = vpack.c.bf16 %v223_v3, %v220_v2  ;;  %v3845_v10 = vpack.c.bf16 %v230_v8, %v227_v7  ;;  %v225_v11 = vld [vmem:[#allocation2 + $0x148] sm:$0xff]  ;;  %v226_v12 = vld [vmem:[#allocation2 + $0x150] sm:$0xff]  ;;  %v228_v16 = vld [vmem:[#allocation2 + $0x160] sm:$0xff] }
  0x7a   :  { %3832 = vmatpush1.bf16.msra.mxu0 %v3831_v42  ;;  %v229_v13 = vld [vmem:[#allocation2 + $0x168] sm:$0xff]  ;;  %v3873_v14 = vpack.c.bf16 %v225_v11, %v222_v9  ;;  %v231_v17 = vld [vmem:[#allocation2 + $0x178] sm:$0xff]  ;;  %v232_v38 = vld [vmem:[%s5214_s25] sm:$0x7] }
  0x7b   :  { %3834 = vmatprep.subr.bf16.mxu0 %v3833_v46  ;;  %v3847_v15 = vpack.c.bf16 %v229_v13, %v226_v12  ;;  %v3877_v18 = vpack.c.bf16 %v231_v17, %v228_v16 }
  0x7c   :  { %3864 = vmatpush3.bf16.msra.mxu1 %v3861_v50 }
  0x7d   :  { %3866 = vmatprep.subr.bf16.mxu1 %v3865_v59 }
  0x7e   :  { %3836 = vmatpush1.bf16.msra.mxu0 %v3835_v51 }
  0x7f   :  { %3838 = vmatprep.subr.bf16.mxu0 %v3837_v55 }
  0x80   :  { %3868 = vmatpush3.bf16.msra.mxu1 %v3865_v59 }
  0x82   :  { %3840 = vmatpush1.bf16.msra.mxu0 %v3839_v60 }
  0xfe   :  { %v145_v26 = vpop.xlane.xlu0 %144 }
  0xff   :  { %v149_v27 = vmul.f32 0.0078125, %v145_v26  ;;  %v3196_v26 = vld [vmem:[%s5212_s2] ss:$0 sm:$0xff] }
 0x101   :  { %v4655_v28 = vsub.f32 %v140_v0, %v149_v27  ;;  %v3841_v0 = vpack.c.bf16 %v224_v62, %v221_v61  ;;  %v183_v62 = vld [vmem:[%s5215_s0] sm:$0x3] }
 0x102   :  { %v147_v29 = vpop.xlane.xlu0 %146 }
 0x103   :  { %v150_v30 = vmul.f32 0.0078125, %v147_v29  ;;  %v153_v31 = vmul.f32 %v4655_v28, %v4655_v28  ;;  %3842 = vmatprep.subr.bf16.mxu0 %v3841_v0  ;;  %v3197_v29 = vld [vmem:[%s5213_s24] ss:$0 sm:$0xff] }
 0x104   :  { %3844 = vmatpush1.bf16.msra.mxu0 %v3843_v6 }
 0x105   :  { %v4659_v32 = vsub.f32 %v141_v1, %v150_v30  ;;  %155 = vadd.xlane.f32.xlu1 %v153_v31  ;;  %v219_v1 = vld [vmem:[#allocation2 + $0x118] sm:$0xff]  ;;  %3846 = vmatprep.subr.bf16.mxu0 %v3845_v10 }
 0x106   :  { %v3869_v5 = vpack.c.bf16 %v219_v1, %v216_v63 }
 0x107   :  { %v154_v33 = vmul.f32 %v4659_v32, %v4659_v32 }
 0x108   :  { %3870 = vmatprep.subr.bf16.mxu1 %v3869_v5  ;;  %3848 = vmatpush1.bf16.msra.mxu0 %v3847_v15 }
 0x109   :  { %157 = vadd.xlane.f32.xlu1 %v154_v33  ;;  %3872 = vmatpush3.bf16.msra.mxu1 %v3869_v5 }
 0x10a   :  { %3874 = vmatprep.subr.bf16.mxu1 %v3873_v14  ;;  %3532 = vmatprep.subr.mxu0 %v4460_v4 }
 0x10d   :  { %3876 = vmatpush3.bf16.msra.mxu1 %v3873_v14 }
 0x10e   :  { %3878 = vmatprep.subr.bf16.mxu1 %v3877_v18 }
 0x111   :  { %3880 = vmatpush3.bf16.msra.mxu1 %v3877_v18 }
 0x112   :  { %3527 = vmatprep.subr.mxu1 %v4460_v4 }
 0x192   :  { %v156_v19 = vpop.xlane.xlu1 %155 }
 0x193   :  { %v159_v20 = vmul.f32 0.0078125, %v156_v19 }
 0x195   :  { %v161_v21 = vadd.f32 1e-05, %v159_v20 }
 0x196   :  { %v158_v22 = vpop.xlane.xlu1 %157 }
 0x197   :  { %4235 = vrsqrt.f32 %v161_v21  ;;  %v160_v23 = vmul.f32 0.0078125, %v158_v22 }
 0x199   :  { %v162_v24 = vadd.f32 1e-05, %v160_v23 }
 0x19b   :  { %4237 = vrsqrt.f32 %v162_v24 }
 0x1a1   :  { %v4236_v25 = vpop.eup %4235 }
 0x1a2   :  { %v165_v27 = vmul.f32 %v4236_v25, %v4655_v28  ;;  %v234_v28 = vlaneseq }
 0x1a4   :  { %v173_v30 = vmul.f32 %v3196_v26, %v165_v27 }
 0x1a5   :  { %v4238_v31 = vpop.eup %4237 }
 0x1a6   :  { %v4673_v33 = vadd.f32 %v3197_v29, %v173_v30  ;;  %v166_v34 = vmul.f32 %v4238_v31, %v4659_v32  ;;  %v4688_v32 = vshrl.u32 %v234_v28, 7 }
 0x1a8   :  { %314 = vmatmul.mubr.f32.vlgmr.msra.gmra.mrb[0].mxu0 %v4673_v33  ;;  %3524 = vmatprep.mubr.f32.mxu1 %v4673_v33  ;;  %v174_v35 = vmul.f32 %v3196_v26, %v166_v34  ;;  %v4691_v37 = vsub.s32 0, %v4688_v32  ;;  %v4697_v39 = vsub.s32 1, %v4688_v32  ;;  %v244_v41 = vsub.s32 2, %v4688_v32 }
 0x1a9   :  { %319 = vmatprep.mubr.f32.mxu0 %v4460_v4 }
 0x1aa   :  { %v4679_v36 = vadd.f32 %v3197_v29, %v174_v35  ;;  %v237_v40 = vrot.slane %v232_v38, %v4691_v37  ;;  %v241_v42 = vrot.slane %v232_v38, %v4697_v39  ;;  %v245_v46 = vrot.slane %v232_v38, %v244_v41 }
 0x1ab   :  { %v4735_v63 = vrot.slane %v183_v62, %v4691_v37  ;;  %v4741_v8 = vrot.slane %v183_v62, %v4697_v39 }
 0x1ac   :  { %320 = vmatmul.mubr.f32.gmra.mrb[2].mxu0 %v4679_v36  ;;  %3525 = vmatmul.mubr.f32.vlgmr.msra.gmra.mrb[0].mxu1 %v4679_v36 }
 0x1ad   :  { %3529 = vmatprep.mubr.msk.f32.mxu1 %vm4461_vm0, %v4460_v4  ;;  %3534 = vmatprep.mubr.msk.f32.mxu0 %vm4461_vm0, %v4460_v4 }
 0x27b   :  { %v315_v43 = vpop.f32.mrb[0].mxu0 }
 0x27c   :  { %v316_v44 = vadd.f32 %v315_v43, %v237_v40  ;;  %v317_v45 = vpop.f32.mrb[1].mxu0 }
 0x27d   :  { %v318_v47 = vadd.f32 %v317_v45, %v241_v42 }
 0x27e   :  { %v401_v48 = vmul.f32 0.125, %v316_v44 }
 0x27f   :  { %571 = vrot.lane.b32.xlu0 %v318_v47, %s4462_s22  ;;  %v321_v49 = vpop.f32.mrb[2].mxu0  ;;  %v3526_v50 = vpop.f32.mrb[0].mxu1  ;;  %3528 = vmatpush3.xpose.msk.msra.mxu1 %vm407_vm1, %v318_v47 }
 0x280   :  { %v4706_v51 = vadd.f32 %v3526_v50, %v245_v46  ;;  %569 = vrot.lane.b32.xlu1 %v401_v48, %s4462_s22  ;;  %v323_v52 = vpop.f32.mrb[3].mxu0  ;;  %v392_v53 = vpop.f32.mrb[1].mxu1  ;;  %3537 = vmatprep.subr.mxu1 %v4460_v4  ;;  %v322_v56 = vadd.f32 %v321_v49, %v237_v40 }
 0x281   :  { %v324_v54 = vadd.f32 %v323_v52, %v241_v42  ;;  %v4710_v55 = vadd.f32 %v392_v53, %v245_v46 }
 0x282   :  { %3530 = vmatmul.mubr.msk.f32.vlgmr.msra.gmra.mrb[2].mxu1 %vm407_vm1, %v401_v48  ;;  %v402_v57 = vmul.f32 0.125, %v322_v56 }
 0x283   :  { %3533 = vmatpush3.msra.mxu0 %v4710_v55  ;;  %3539 = vmatprep.mubr.msk.f32.mxu1 %vm4461_vm0, %v4460_v4 }
 0x284   :  { %906 = vrot.lane.b32.xlu1 %v324_v54, %s4462_s22  ;;  %3542 = vmatprep.subr.mxu0 %v4460_v4 }
 0x288   :  { %904 = vrot.lane.b32.xlu1 %v402_v57, %s4462_s22 }
 0x2f1   :  { %v572_v58 = vpop.permute.xlu0 %571 }
 0x2f2   :  { %v570_v59 = vpop.permute.xlu1 %569  ;;  %3538 = vmatpush3.xpose.msk.msra.mxu1 %vm407_vm1, %v572_v58 }
 0x2f3   :  { %3547 = vmatprep.subr.mxu1 %v4460_v4 }
 0x2f5   :  { %3540 = vmatmul.mubr.msk.f32.vlgmr.msra.gmra.mrb[4].mxu1 %vm407_vm1, %v570_v59 }
 0x2f6   :  { %v907_v60 = vpop.permute.xlu1 %906  ;;  %3548 = vmatpush3.xpose.msk.msra.mxu1 %vm407_vm1, %v324_v54  ;;  %3549 = vmatprep.mubr.msk.f32.mxu1 %vm4461_vm0, %v4460_v4 }
 0x2f7   :  { %3557 = vmatprep.subr.mxu1 %v4460_v4 }
 0x2f9   :  { %3550 = vmatmul.mubr.msk.f32.vlgmr.msra.gmra.mrb[6].mxu1 %vm407_vm1, %v402_v57 }
 0x2fa   :  { %3558 = vmatpush3.xpose.msk.msra.mxu1 %vm407_vm1, %v907_v60  ;;  %3559 = vmatprep.mubr.msk.f32.mxu1 %vm4461_vm0, %v4460_v4  ;;  %v905_v61 = vpop.permute.xlu1 %904  ;;  %v1076_v60 = vld [vmem:[%s5216_s23 + $0x8] sm:$0xff] }
 0x2fd   :  { %3560 = vmatmul.mubr.msk.f32.vlgmr.msra.gmra.mrb[8].mxu1 %vm407_vm1, %v905_v61  ;;  %v1077_v61 = vld [vmem:[%s5216_s23 + $0x10] sm:$0xff] }
 0x355   :  { %v480_v0 = vpop.f32.mrb[2].mxu1 }
 0x356   :  { %v481_v1 = vadd.f32 %v480_v0, %v4735_v63  ;;  %v3531_v2 = vpop.f32.mrb[3].mxu1  ;;  %v1078_v0 = vld [vmem:[%s5216_s23 + $0x18] sm:$0xff] }
 0x357   :  { %v3885_v2 = vpack.c.bf16 %v1078_v0, %v1077_v61  ;;  %v1226_v61 = vld [vmem:[#allocation5 + $0x58] sm:$0xff] }
 0x358   :  { %v485_v3 = vsel %vm484_vm2, %v481_v1, -inf }
 0x359   :  { %486 = vmax.xlane.f32.xlu0 %v485_v3  ;;  %v1079_v3 = vld [vmem:[%s5216_s23 + $0x20] sm:$0xff] }
 0x3c8   :  { %v643_v5 = vpop.f32.mrb[4].mxu1 }
 0x3c9   :  { %v644_v6 = vadd.f32 %v643_v5, %v4735_v63  ;;  %v3541_v7 = vpop.f32.mrb[5].mxu1  ;;  %v1080_v5 = vld [vmem:[%s5216_s23 + $0x28] sm:$0xff] }
 0x3ca   :  { %v3889_v7 = vpack.c.bf16 %v1080_v5, %v1079_v3 }
 0x3cb   :  { %v647_v9 = vsel %vm484_vm2, %v644_v6, -inf }
 0x3cc   :  { %648 = vmax.xlane.f32.xlu1 %v647_v9  ;;  %v816_v10 = vpop.f32.mrb[6].mxu1  ;;  %v1081_v9 = vld [vmem:[%s5216_s23 + $0x30] sm:$0xff] }
 0x3cd   :  { %v817_v11 = vadd.f32 %v816_v10, %v4741_v8  ;;  %v3551_v12 = vpop.f32.mrb[7].mxu1  ;;  %v1082_v10 = vld [vmem:[%s5216_s23 + $0x38] sm:$0xff] }
 0x3ce   :  { %v1083_v12 = vld [vmem:[%s5216_s23 + $0x40] sm:$0xff] }
 0x3cf   :  { %v820_v13 = vsel %vm484_vm2, %v817_v11, -inf }
 0x3d0   :  { %821 = vmax.xlane.f32.xlu0 %v820_v13  ;;  %v978_v14 = vpop.f32.mrb[8].mxu1  ;;  %v1084_v13 = vld [vmem:[%s5216_s23 + $0x48] sm:$0xff] }
 0x3d1   :  { %v979_v15 = vadd.f32 %v978_v14, %v4741_v8  ;;  %v3561_v16 = vpop.f32.mrb[9].mxu1  ;;  %v3897_v14 = vpack.c.bf16 %v1084_v13, %v1083_v12  ;;  %v1227_v13 = vld [vmem:[#allocation5 + $0x60] sm:$0xff] }
 0x3d2   :  { %v1086_v16 = vld [vmem:[%s5216_s23 + $0x58] sm:$0xff] }
 0x3d3   :  { %v982_v17 = vsel %vm484_vm2, %v979_v15, -inf }
 0x3d4   :  { %983 = vmax.xlane.f32.xlu0 %v982_v17 }
 0x3e6   :  { %v487_v18 = vpop.xlane.xlu0 %486 }
 0x3e7   :  { %v488_v19 = vsub.f32 %v481_v1, %v487_v18  ;;  %v1087_v18 = vld [vmem:[%s5216_s23 + $0x60] sm:$0xff] }
 0x3e9   :  { %v489_v20 = vmul.f32 1.442695, %v488_v19  ;;  %v1088_v19 = vld [vmem:[%s5216_s23 + $0x68] sm:$0xff] }
 0x3eb   :  { %4239 = vpow2.f32 %v489_v20  ;;  %v3905_v20 = vpack.c.bf16 %v1088_v19, %v1087_v18  ;;  %v1231_v19 = vld [vmem:[#allocation5 + $0x80] sm:$0xff] }
 0x3f5   :  { %v4240_v21 = vpop.eup %4239 }
 0x3f6   :  { %v491_v22 = vsel %vm484_vm2, %v4240_v21, 0.0 }
 0x3f7   :  { %492 = vadd.xlane.f32.xlu0 %v491_v22  ;;  %v1090_v22 = vld [vmem:[%s5216_s23 + $0x78] sm:$0xff] }
 0x459   :  { %v649_v23 = vpop.xlane.xlu1 %648 }
 0x45a   :  { %v650_v24 = vsub.f32 %v644_v6, %v649_v23 }
 0x45c   :  { %v651_v25 = vmul.f32 1.442695, %v650_v24 }
 0x45d   :  { %v822_v26 = vpop.xlane.xlu0 %821 }
 0x45e   :  { %4241 = vpow2.f32 %v651_v25  ;;  %v823_v27 = vsub.f32 %v817_v11, %v822_v26  ;;  %v3893_v11 = vpack.c.bf16 %v1082_v10, %v1081_v9  ;;  %v1228_v10 = vld [vmem:[#allocation5 + $0x68] sm:$0xff] }
 0x460   :  { %v824_v29 = vmul.f32 1.442695, %v823_v27 }
 0x461   :  { %v984_v30 = vpop.xlane.xlu0 %983 }
 0x462   :  { %4243 = vpow2.f32 %v824_v29  ;;  %v985_v31 = vsub.f32 %v979_v15, %v984_v30  ;;  %v1085_v15 = vld [vmem:[%s5216_s23 + $0x50] sm:$0xff] }
 0x463   :  { %v3901_v17 = vpack.c.bf16 %v1086_v16, %v1085_v15  ;;  %v1232_v16 = vld [vmem:[#allocation5 + $0x88] sm:$0xff] }
 0x464   :  { %v986_v34 = vmul.f32 1.442695, %v985_v31 }
 0x466   :  { %4245 = vpow2.f32 %v986_v34 }
 0x468   :  { %v4242_v35 = vpop.eup %4241 }
 0x469   :  { %v653_v38 = vsel %vm484_vm2, %v4242_v35, 0.0 }
 0x46a   :  { %654 = vadd.xlane.f32.xlu1 %v653_v38 }
 0x46c   :  { %v4244_v40 = vpop.eup %4243 }
 0x46d   :  { %v826_v42 = vsel %vm484_vm2, %v4244_v40, 0.0 }
 0x46e   :  { %827 = vadd.xlane.f32.xlu0 %v826_v42 }
 0x470   :  { %v4246_v43 = vpop.eup %4245 }
 0x471   :  { %v988_v44 = vsel %vm484_vm2, %v4246_v43, 0.0 }
 0x472   :  { %989 = vadd.xlane.f32.xlu1 %v988_v44 }
 0x483   :  { %994 = vrot.lane.b32.xlu1 %v4706_v51, %s4462_s22 }
 0x484   :  { %659 = vrot.lane.b32.xlu0 %v4710_v55, %s4462_s22  ;;  %v493_v45 = vpop.xlane.xlu0 %492 }
 0x485   :  { %4247 = vrcp.f32 %v493_v45 }
 0x48f   :  { %v4248_v46 = vpop.eup %4247 }
 0x490   :  { %v495_v47 = vmul.f32 %v4248_v46, %v4240_v21  ;;  %v1089_v21 = vld [vmem:[%s5216_s23 + $0x70] sm:$0xff] }
 0x491   :  { %v3909_v23 = vpack.c.bf16 %v1090_v22, %v1089_v21  ;;  %v1236_v22 = vld [vmem:[#allocation5 + $0xa8] sm:$0xff] }
 0x492   :  { %3535 = vmatmul.mubr.msk.f32.vlgmr.msra.gmra.mrb[4].mxu0 %vm484_vm2, %v495_v47 }
 0x493   :  { %3544 = vmatprep.mubr.msk.f32.mxu0 %vm4461_vm0, %v4460_v4 }
 0x4f7   :  { %v655_v48 = vpop.xlane.xlu1 %654 }
 0x4f8   :  { %4249 = vrcp.f32 %v655_v48 }
 0x4fb   :  { %v828_v49 = vpop.xlane.xlu0 %827 }
 0x4fc   :  { %4251 = vrcp.f32 %v828_v49  ;;  %v1216_v49 = vld [vmem:[#allocation5 + $0x8] sm:$0xff] }
 0x4ff   :  { %v990_v50 = vpop.xlane.xlu1 %989  ;;  %v660_v52 = vpop.permute.xlu0 %659 }
 0x500   :  { %4253 = vrcp.f32 %v990_v50  ;;  %3543 = vmatpush3.msra.mxu0 %v660_v52  ;;  %v1218_v50 = vld [vmem:[#allocation5 + $0x18] sm:$0xff]  ;;  %v1215_v52 = vld [vmem:[#allocation5] sm:$0xff] }
 0x501   :  { %3552 = vmatprep.subr.mxu0 %v4460_v4 }
 0x502   :  { %v4250_v53 = vpop.eup %4249 }
 0x503   :  { %v657_v54 = vmul.f32 %v4250_v53, %v4242_v35  ;;  %v995_v57 = vpop.permute.xlu1 %994  ;;  %v3913_v53 = vpack.c.bf16 %v1218_v50, %v1216_v49 }
 0x505   :  { %3545 = vmatmul.mubr.msk.f32.vlgmr.msra.gmra.mrb[6].mxu0 %vm484_vm2, %v657_v54  ;;  %v1217_v54 = vld [vmem:[#allocation5 + $0x10] sm:$0xff] }
 0x506   :  { %v4252_v55 = vpop.eup %4251  ;;  %3553 = vmatpush3.msra.mxu0 %v4706_v51  ;;  %3554 = vmatprep.mubr.msk.f32.mxu0 %vm4461_vm0, %v4460_v4  ;;  %v1075_v51 = vld [vmem:[%s5216_s23] sm:$0xff] }
 0x507   :  { %v830_v56 = vmul.f32 %v4252_v55, %v4244_v40  ;;  %3562 = vmatprep.subr.mxu0 %v4460_v4  ;;  %v3881_v62 = vpack.c.bf16 %v1076_v60, %v1075_v51  ;;  %v1220_v55 = vld [vmem:[#allocation5 + $0x28] sm:$0xff]  ;;  %v1221_v51 = vld [vmem:[#allocation5 + $0x30] sm:$0xff] }
 0x508   :  { %v1224_v60 = vld [vmem:[#allocation5 + $0x48] sm:$0xff] }
 0x509   :  { %3555 = vmatmul.mubr.msk.f32.vlgmr.msra.gmra.mrb[8].mxu0 %vm484_vm2, %v830_v56  ;;  %3882 = vmatprep.subr.bf16.mxu1 %v3881_v62  ;;  %v1222_v56 = vld [vmem:[#allocation5 + $0x38] sm:$0xff]  ;;  %v3921_v0 = vpack.c.bf16 %v1226_v61, %v1224_v60  ;;  %v1389_v60 = vld [vmem:[#allocation7 + $0x88] sm:$0xff]  ;;  %v1372_v61 = vld [vmem:[#allocation7] sm:$0xff] }
 0x50a   :  { %v4254_v58 = vpop.eup %4253  ;;  %3563 = vmatpush3.msra.mxu0 %v995_v57  ;;  %3564 = vmatprep.mubr.msk.f32.mxu0 %vm4461_vm0, %v4460_v4  ;;  %v3915_v57 = vpack.c.bf16 %v1217_v54, %v1215_v52 }
 0x50b   :  { %v992_v59 = vmul.f32 %v4254_v58, %v4246_v43  ;;  %3884 = vmatpush3.bf16.msra.mxu1 %v3881_v62  ;;  %v3210_v43 = vld [vmem:[%s5178_s7] ss:$0 sm:$0xff]  ;;  %v3917_v58 = vpack.c.bf16 %v1222_v56, %v1220_v55  ;;  %3914 = vmatprep.subr.bf16.mxu0 %v3913_v53 }
 0x50c   :  { %3886 = vmatprep.subr.bf16.mxu1 %v3885_v2  ;;  %v4833_v55 = vld [vmem:[%s5179_s8] ss:$0 sm:$0xff] }
 0x50d   :  { %3565 = vmatmul.mubr.msk.f32.vlgmr.msra.gmra.mrb[10].mxu0 %vm484_vm2, %v992_v59  ;;  %v1219_v59 = vld [vmem:[#allocation5 + $0x20] sm:$0xff] }
 0x50e   :  { %1323 = vmatprep.mubr.f32.mxu0 %v4460_v4  ;;  %3916 = vmatpush1.bf16.msra.mxu0 %v3915_v57  ;;  %v3919_v62 = vpack.c.bf16 %v1221_v51, %v1219_v59  ;;  %v4838_v57 = vld [vmem:[%s5180_s9] ss:$0 sm:$0xff] }
 0x50f   :  { %3888 = vmatpush3.bf16.msra.mxu1 %v3885_v2  ;;  %3918 = vmatprep.subr.bf16.mxu0 %v3917_v58  ;;  %v1388_v51 = vld [vmem:[#allocation7 + $0x80] sm:$0xff] }
 0x510   :  { %3890 = vmatprep.subr.bf16.mxu1 %v3889_v7 }
 0x512   :  { %3920 = vmatpush1.bf16.msra.mxu0 %v3919_v62  ;;  %v3945_v62 = vpack.c.bf16 %v1389_v60, %v1388_v51 }
 0x513   :  { %3892 = vmatpush3.bf16.msra.mxu1 %v3889_v7  ;;  %3922 = vmatprep.subr.bf16.mxu0 %v3921_v0  ;;  %v1373_v0 = vld [vmem:[#allocation7 + $0x8] sm:$0xff] }
 0x514   :  { %3894 = vmatprep.subr.bf16.mxu1 %v3893_v11 }
 0x517   :  { %3896 = vmatpush3.bf16.msra.mxu1 %v3893_v11  ;;  %v1230_v11 = vld [vmem:[#allocation5 + $0x78] sm:$0xff] }
 0x518   :  { %3898 = vmatprep.subr.bf16.mxu1 %v3897_v14  ;;  %v3925_v12 = vpack.c.bf16 %v1230_v11, %v1228_v10  ;;  %v1393_v10 = vld [vmem:[#allocation7 + $0xa8] sm:$0xff] }
 0x51b   :  { %3900 = vmatpush3.bf16.msra.mxu1 %v3897_v14  ;;  %v1229_v14 = vld [vmem:[#allocation5 + $0x70] sm:$0xff] }
 0x51c   :  { %3902 = vmatprep.subr.bf16.mxu1 %v3901_v17  ;;  %v3927_v15 = vpack.c.bf16 %v1229_v14, %v1227_v13  ;;  %v1377_v13 = vld [vmem:[#allocation7 + $0x28] sm:$0xff] }
 0x51f   :  { %3904 = vmatpush3.bf16.msra.mxu1 %v3901_v17  ;;  %v1234_v17 = vld [vmem:[#allocation5 + $0x98] sm:$0xff] }
 0x520   :  { %3906 = vmatprep.subr.bf16.mxu1 %v3905_v20  ;;  %v3929_v18 = vpack.c.bf16 %v1234_v17, %v1232_v16  ;;  %v1395_v16 = vld [vmem:[#allocation7 + $0xb8] sm:$0xff] }
 0x523   :  { %3908 = vmatpush3.bf16.msra.mxu1 %v3905_v20  ;;  %v1233_v20 = vld [vmem:[#allocation5 + $0x90] sm:$0xff] }
 0x524   :  { %3910 = vmatprep.subr.bf16.mxu1 %v3909_v23  ;;  %v3931_v21 = vpack.c.bf16 %v1233_v20, %v1231_v19  ;;  %v1379_v19 = vld [vmem:[#allocation7 + $0x38] sm:$0xff]  ;;  %v1396_v20 = vld [vmem:[#allocation7 + $0xc0] sm:$0xff] }
 0x527   :  { %3912 = vmatpush3.bf16.msra.mxu1 %v3909_v23  ;;  %v1238_v23 = vld [vmem:[#allocation5 + $0xb8] sm:$0xff] }
 0x528   :  { %3946 = vmatprep.subr.bf16.mxu1 %v3945_v62  ;;  %v1247_v62 = vld [vmem:[%s5182_s11] sm:$0x3] }
 0x565   :  { %v565_v1 = vpop.f32.mrb[4].mxu0 }
 0x566   :  { %v3536_v6 = vpop.f32.mrb[5].mxu0 }
 0x5d8   :  { %v731_v24 = vpop.f32.mrb[6].mxu0 }
 0x5d9   :  { %v3546_v25 = vpop.f32.mrb[7].mxu0 }
 0x5da   :  { %v1237_v25 = vld [vmem:[#allocation5 + $0xb0] sm:$0xff] }
 0x5dc   :  { %v900_v26 = vpop.f32.mrb[8].mxu0 }
 0x5dd   :  { %v3556_v27 = vpop.f32.mrb[9].mxu0 }
 0x5de   :  { %v1240_v27 = vld [vmem:[#allocation5 + $0xc8] sm:$0xff] }
 0x5e0   :  { %v1066_v29 = vpop.f32.mrb[10].mxu0 }
 0x5e1   :  { %v4225_v30 = vpack.i.bf16 %v1066_v29, %v731_v24  ;;  %v3566_v31 = vpop.f32.mrb[11].mxu0  ;;  %v1235_v24 = vld [vmem:[#allocation5 + $0xa0] sm:$0xff]  ;;  %v1242_v29 = vld [vmem:[#allocation5 + $0xd8] sm:$0xff] }
 0x5e2   :  { %v3937_v31 = vpack.c.bf16 %v1242_v29, %v1240_v27 }
 0x5e3   :  { %4226 = vrot.lane.b32.xlu1 %v4225_v30, %s4462_s22  ;;  %v1239_v30 = vld [vmem:[#allocation5 + $0xc0] sm:$0xff] }
 0x655   :  { %v4227_v34 = vpop.permute.xlu1 %4226 }
 0x656   :  { %v4229_v35 = vunpack.i.h.bf16 %v4227_v34  ;;  %v4228_v38 = vunpack.i.l.bf16 %v4227_v34  ;;  %v1241_v34 = vld [vmem:[#allocation5 + $0xd0] sm:$0xff] }
 0x658   :  { %v739_v40 = vsel %vm407_vm1, %v565_v1, %v4228_v38  ;;  %v1074_v42 = vsel %vm407_vm1, %v900_v26, %v4229_v35  ;;  %v1225_v1 = vld [vmem:[#allocation5 + $0x50] sm:$0xff]  ;;  %v3935_v26 = vpack.c.bf16 %v1237_v25, %v1235_v24  ;;  %v1244_v35 = vld [vmem:[#allocation5 + $0xe8] sm:$0xff]  ;;  %v1246_v38 = vld [vmem:[#allocation5 + $0xf8] sm:$0xff] }
 0x659   :  { %3599 = vmatprep.mubr.f32.mxu1 %v739_v40  ;;  %v3939_v40 = vpack.c.bf16 %v1241_v34, %v1239_v30  ;;  %v1381_v24 = vld [vmem:[#allocation7 + $0x48] sm:$0xff]  ;;  %v1398_v25 = vld [vmem:[#allocation7 + $0xd0] sm:$0xff]  ;;  %v1400_v34 = vld [vmem:[#allocation7 + $0xe0] sm:$0xff] }
 0x65a   :  { %3600 = vmatmul.mubr.f32.vlgmr.msra.gmra.mrb[10].mxu1 %v1074_v42  ;;  %v3941_v42 = vpack.c.bf16 %v1246_v38, %v1244_v35  ;;  %v1382_v30 = vld [vmem:[#allocation7 + $0x50] sm:$0xff]  ;;  %v1401_v35 = vld [vmem:[#allocation7 + $0xe8] sm:$0xff] }
 0x72d   :  { %v3601_v44 = vpop.f32.mrb[10].mxu1 }
 0x72e   :  { %v1170_v45 = vadd.f32 %v3601_v44, %v3210_v43  ;;  %v1164_v46 = vpop.f32.mrb[11].mxu1  ;;  %v1245_v44 = vld [vmem:[#allocation5 + $0xf0] sm:$0xff] }
 0x72f   :  { %v1165_v47 = vadd.f32 %v3210_v43, %v1164_v46  ;;  %v1243_v43 = vld [vmem:[#allocation5 + $0xe0] sm:$0xff] }
 0x730   :  { %v1174_v9 = vadd.f32 %v1170_v45, %v4679_v36  ;;  %v3933_v36 = vpack.c.bf16 %v1238_v23, %v1236_v22  ;;  %v3943_v45 = vpack.c.bf16 %v1245_v44, %v1243_v43  ;;  %v1397_v22 = vld [vmem:[#allocation7 + $0xc8] sm:$0xff]  ;;  %v1380_v23 = vld [vmem:[#allocation7 + $0x40] sm:$0xff]  ;;  %v1402_v44 = vld [vmem:[#allocation7 + $0xf0] sm:$0xff] }
 0x731   :  { %v1173_v48 = vadd.f32 %v1165_v47, %v4673_v33  ;;  %v1223_v33 = vld [vmem:[#allocation5 + $0x40] sm:$0xff]  ;;  %v3963_v27 = vpack.c.bf16 %v1381_v24, %v1380_v23  ;;  %v1385_v43 = vld [vmem:[#allocation7 + $0x68] sm:$0xff] }
 0x732   :  { %v3923_v2 = vpack.c.bf16 %v1225_v1, %v1223_v33  ;;  %v3947_v33 = vpack.c.bf16 %v1373_v0, %v1372_v61  ;;  %v1390_v1 = vld [vmem:[#allocation7 + $0x90] sm:$0xff]  ;;  %v1252_v0 = vrot.slane %v1247_v62, %v4691_v37 }
 0x733   :  { %1177 = vadd.xlane.f32.xlu1 %v1173_v48 }
 0x734   :  { %3924 = vmatpush1.bf16.msra.mxu0 %v3923_v2  ;;  %3948 = vmatpush3.bf16.msra.mxu1 %v3947_v33  ;;  %v1391_v2 = vld [vmem:[#allocation7 + $0x98] sm:$0xff]  ;;  %v1256_v33 = vrot.slane %v1247_v62, %v4697_v39  ;;  %v1533_v62 = vld [vmem:[#allocation2 + $0x1a0] sm:$0xff] }
 0x735   :  { %3926 = vmatprep.subr.bf16.mxu0 %v3925_v12  ;;  %v1376_v12 = vld [vmem:[#allocation7 + $0x20] sm:$0xff] }
 0x736   :  { %v3955_v14 = vpack.c.bf16 %v1377_v13, %v1376_v12 }
 0x738   :  { %3928 = vmatpush1.bf16.msra.mxu0 %v3927_v15  ;;  %v1394_v15 = vld [vmem:[#allocation7 + $0xb0] sm:$0xff] }
 0x739   :  { %3930 = vmatprep.subr.bf16.mxu0 %v3929_v18  ;;  %v3957_v17 = vpack.c.bf16 %v1395_v16, %v1394_v15  ;;  %v1378_v18 = vld [vmem:[#allocation7 + $0x30] sm:$0xff] }
 0x73c   :  { %3932 = vmatpush1.bf16.msra.mxu0 %v3931_v21  ;;  %v3959_v21 = vpack.c.bf16 %v1379_v19, %v1378_v18 }
 0x73d   :  { %3934 = vmatprep.subr.bf16.mxu0 %v3933_v36  ;;  %v3961_v36 = vpack.c.bf16 %v1397_v22, %v1396_v20 }
 0x740   :  { %3936 = vmatpush1.bf16.msra.mxu0 %v3935_v26  ;;  %v1399_v26 = vld [vmem:[#allocation7 + $0xd8] sm:$0xff] }
 0x741   :  { %3938 = vmatprep.subr.bf16.mxu0 %v3937_v31  ;;  %v3965_v29 = vpack.c.bf16 %v1399_v26, %v1398_v25  ;;  %v1383_v31 = vld [vmem:[#allocation7 + $0x58] sm:$0xff] }
 0x742   :  { %v3967_v38 = vpack.c.bf16 %v1383_v31, %v1382_v30 }
 0x744   :  { %3940 = vmatpush1.bf16.msra.mxu0 %v3939_v40  ;;  %v3969_v40 = vpack.c.bf16 %v1401_v35, %v1400_v34 }
 0x745   :  { %3942 = vmatprep.subr.bf16.mxu0 %v3941_v42  ;;  %v1384_v42 = vld [vmem:[#allocation7 + $0x60] sm:$0xff] }
 0x748   :  { %3944 = vmatpush1.bf16.msra.mxu0 %v3943_v45  ;;  %v1403_v45 = vld [vmem:[#allocation7 + $0xf8] sm:$0xff] }
 0x7c0   :  { %v1178_v3 = vpop.xlane.xlu1 %1177 }
 0x7c1   :  { %v1181_v5 = vmul.f32 0.0078125, %v1178_v3  ;;  %v3949_v3 = vpack.c.bf16 %v1391_v2, %v1390_v1 }
 0x7c3   :  { %v1183_v6 = vsub.f32 %v1173_v48, %v1181_v5  ;;  %v1374_v5 = vld [vmem:[#allocation7 + $0x10] sm:$0xff]  ;;  %3950 = vmatprep.subr.bf16.mxu1 %v3949_v3 }
 0x7c5   :  { %v1185_v7 = vmul.f32 %v1183_v6, %v1183_v6 }
 0x7c7   :  { %1187 = vadd.xlane.f32.xlu0 %v1185_v7 }
 0x7cb   :  { %1179 = vadd.xlane.f32.xlu0 %v1174_v9 }
 0x854   :  { %v1188_v46 = vpop.xlane.xlu0 %1187 }
 0x855   :  { %v1191_v47 = vmul.f32 0.0078125, %v1188_v46  ;;  %v3971_v46 = vpack.c.bf16 %v1385_v43, %v1384_v42 }
 0x857   :  { %v1193_v48 = vadd.f32 1e-05, %v1191_v47  ;;  %v3973_v47 = vpack.c.bf16 %v1403_v45, %v1402_v44 }
 0x858   :  { %v1180_v49 = vpop.xlane.xlu0 %1179 }
 0x859   :  { %4255 = vrsqrt.f32 %v1193_v48  ;;  %v1182_v50 = vmul.f32 0.0078125, %v1180_v49  ;;  %v1386_v48 = vld [vmem:[#allocation7 + $0x70] sm:$0xff]  ;;  %v1387_v49 = vld [vmem:[#allocation7 + $0x78] sm:$0xff] }
 0x85b   :  { %v4826_v52 = vsub.f32 %v1174_v9, %v1182_v50  ;;  %v1392_v9 = vld [vmem:[#allocation7 + $0xa0] sm:$0xff]  ;;  %v3975_v50 = vpack.c.bf16 %v1387_v49, %v1386_v48 }
 0x85c   :  { %v3953_v11 = vpack.c.bf16 %v1393_v10, %v1392_v9 }
 0x85d   :  { %v1186_v53 = vmul.f32 %v4826_v52, %v4826_v52 }
 0x85f   :  { %1189 = vadd.xlane.f32.xlu0 %v1186_v53 }
 0x863   :  { %v4256_v54 = vpop.eup %4255 }
 0x864   :  { %v1197_v56 = vmul.f32 %v4256_v54, %v1183_v6  ;;  %v1375_v6 = vld [vmem:[#allocation7 + $0x18] sm:$0xff] }
 0x865   :  { %v3951_v7 = vpack.c.bf16 %v1375_v6, %v1374_v5 }
 0x866   :  { %v1205_v58 = vmul.f32 %v4833_v55, %v1197_v56 }
 0x867   :  { %3952 = vmatpush3.bf16.msra.mxu1 %v3951_v7 }
 0x868   :  { %v4842_v59 = vadd.f32 %v4838_v57, %v1205_v58  ;;  %3954 = vmatprep.subr.bf16.mxu1 %v3953_v11 }
 0x86a   :  { %1324 = vmatmul.mubr.f32.vlgmr.msra.gmra.mrb[12].mxu0 %v4842_v59 }
 0x86b   :  { %1329 = vmatprep.mubr.f32.mxu0 %v4460_v4  ;;  %3956 = vmatpush3.bf16.msra.mxu1 %v3955_v14 }
 0x86c   :  { %3958 = vmatprep.subr.bf16.mxu1 %v3957_v17 }
 0x86f   :  { %3960 = vmatpush3.bf16.msra.mxu1 %v3959_v21 }
 0x870   :  { %3962 = vmatprep.subr.bf16.mxu1 %v3961_v36 }
 0x873   :  { %3964 = vmatpush3.bf16.msra.mxu1 %v3963_v27 }
 0x874   :  { %3966 = vmatprep.subr.bf16.mxu1 %v3965_v29 }
 0x877   :  { %3968 = vmatpush3.bf16.msra.mxu1 %v3967_v38 }
 0x878   :  { %3970 = vmatprep.subr.bf16.mxu1 %v3969_v40 }
 0x87b   :  { %3972 = vmatpush3.bf16.msra.mxu1 %v3971_v46 }
 0x87c   :  { %3974 = vmatprep.subr.bf16.mxu1 %v3973_v47 }
 0x87f   :  { %3976 = vmatpush3.bf16.msra.mxu1 %v3975_v50 }
 0x8ec   :  { %v1190_v53 = vpop.xlane.xlu0 %1189 }
 0x8ed   :  { %v1192_v54 = vmul.f32 0.0078125, %v1190_v53  ;;  %v3213_v53 = vld [vmem:[%s5184_s13] ss:$0 sm:$0xff] }
 0x8ef   :  { %v1194_v56 = vadd.f32 1e-05, %v1192_v54 }
 0x8f1   :  { %4257 = vrsqrt.f32 %v1194_v56 }
 0x8fb   :  { %v4258_v58 = vpop.eup %4257 }
 0x8fc   :  { %v1198_v51 = vmul.f32 %v4258_v58, %v4826_v52 }
 0x8fe   :  { %v1206_v60 = vmul.f32 %v4833_v55, %v1198_v51 }
 0x900   :  { %v4849_v61 = vadd.f32 %v4838_v57, %v1206_v60  ;;  %v1530_v60 = vld [vmem:[#allocation2 + $0x188] sm:$0xff] }
 0x902   :  { %1330 = vmatmul.mubr.f32.gmra.mrb[14].mxu0 %v4849_v61 }
 0x903   :  { %1659 = vmatprep.mubr.f32.mxu0 %v4460_v4 }
 0x93d   :  { %v1325_v1 = vpop.f32.mrb[12].mxu0 }
 0x93e   :  { %v1326_v2 = vadd.f32 %v1325_v1, %v1252_v0  ;;  %v1327_v52 = vpop.f32.mrb[13].mxu0  ;;  %v1532_v1 = vld [vmem:[#allocation2 + $0x198] sm:$0xff] }
 0x93f   :  { %v1328_v3 = vadd.f32 %v1327_v52, %v1256_v33  ;;  %v1539_v52 = vld [vmem:[#allocation2 + $0x1d0] sm:$0xff] }
 0x940   :  { %v1340_v55 = vmul.f32 0.044715, %v1326_v2  ;;  %v1336_v19 = vmul.f32 0.5, %v1326_v2 }
 0x941   :  { %v1341_v5 = vmul.f32 0.044715, %v1328_v3  ;;  %v1337_v17 = vmul.f32 0.5, %v1328_v3 }
 0x942   :  { %v1344_v57 = vmul.f32 %v1340_v55, %v1326_v2 }
 0x943   :  { %v1345_v6 = vmul.f32 %v1341_v5, %v1328_v3  ;;  %v1535_v5 = vld [vmem:[#allocation2 + $0x1b0] sm:$0xff] }
 0x944   :  { %v1348_v7 = vmul.f32 %v1344_v57, %v1326_v2  ;;  %v1538_v57 = vld [vmem:[#allocation2 + $0x1c8] sm:$0xff] }
 0x945   :  { %v1349_v9 = vmul.f32 %v1345_v6, %v1328_v3  ;;  %v1542_v6 = vld [vmem:[#allocation2 + $0x1e8] sm:$0xff] }
 0x946   :  { %v1352_v10 = vadd.f32 %v1348_v7, %v1326_v2  ;;  %v1536_v2 = vld [vmem:[#allocation2 + $0x1b8] sm:$0xff]  ;;  %v1545_v7 = vld [vmem:[#allocation2 + $0x200] sm:$0xff] }
 0x947   :  { %v1353_v11 = vadd.f32 %v1349_v9, %v1328_v3  ;;  %v3981_v55 = vpack.c.bf16 %v1539_v52, %v1536_v2  ;;  %v3983_v9 = vpack.c.bf16 %v1538_v57, %v1535_v5  ;;  %v1540_v2 = vld [vmem:[#allocation2 + $0x1d8] sm:$0xff] }
 0x948   :  { %v1356_v12 = vmul.f32 0.7978846, %v1352_v10  ;;  %v3985_v10 = vpack.c.bf16 %v1545_v7, %v1542_v6 }
 0x949   :  { %v1357_v13 = vmul.f32 0.7978846, %v1353_v11  ;;  %v1544_v11 = vld [vmem:[#allocation2 + $0x1f8] sm:$0xff] }
 0x94a   :  { %4259 = vtanh.f32 %v1356_v12 }
 0x94b   :  { %4261 = vtanh.f32 %v1357_v13 }
 0x954   :  { %v4260_v14 = vpop.eup %4259 }
 0x955   :  { %v4262_v15 = vpop.eup %4261  ;;  %v1364_v16 = vadd.f32 1.0, %v4260_v14 }
 0x956   :  { %v1365_v18 = vadd.f32 1.0, %v4262_v15 }
 0x957   :  { %v1368_v21 = vmul.f32 %v1364_v16, %v1336_v19 }
 0x958   :  { %v1369_v20 = vmul.f32 %v1365_v18, %v1337_v17 }
 0x95a   :  { %1475 = vmatprep.mubr.f32.mxu1 %v1369_v20 }
 0x95b   :  { %1476 = vmatmul.mubr.f32.vlgmr.msra.gmra.mrb[12].mxu1 %v1368_v21 }
 0x9d5   :  { %v1331_v22 = vpop.f32.mrb[14].mxu0 }
 0x9d6   :  { %v1332_v23 = vadd.f32 %v1331_v22, %v1252_v0  ;;  %v1333_v24 = vpop.f32.mrb[15].mxu0  ;;  %v1529_v0 = vld [vmem:[#allocation2 + $0x180] sm:$0xff]  ;;  %v1548_v22 = vld [vmem:[#allocation2 + $0x218] sm:$0xff] }
 0x9d7   :  { %v1334_v36 = vadd.f32 %v1333_v24, %v1256_v33  ;;  %v3977_v33 = vpack.c.bf16 %v1533_v62, %v1530_v60  ;;  %v3979_v3 = vpack.c.bf16 %v1532_v1, %v1529_v0  ;;  %v1531_v62 = vld [vmem:[#allocation2 + $0x190] sm:$0xff]  ;;  %v1534_v0 = vld [vmem:[#allocation2 + $0x1a8] sm:$0xff] }
 0x9d8   :  { %v1342_v25 = vmul.f32 0.044715, %v1332_v23  ;;  %v1338_v47 = vmul.f32 0.5, %v1332_v23  ;;  %v4009_v1 = vpack.c.bf16 %v1534_v0, %v1531_v62 }
 0x9d9   :  { %v1343_v26 = vmul.f32 0.044715, %v1334_v36  ;;  %v1339_v45 = vmul.f32 0.5, %v1334_v36  ;;  %3978 = vmatprep.subr.bf16.mxu0 %v3977_v33  ;;  %v1537_v33 = vld [vmem:[#allocation2 + $0x1c0] sm:$0xff] }
 0x9da   :  { %v1346_v27 = vmul.f32 %v1342_v25, %v1332_v23  ;;  %3980 = vmatpush1.bf16.msra.mxu0 %v3979_v3  ;;  %v1550_v25 = vld [vmem:[#allocation2 + $0x228] sm:$0xff]  ;;  %v4013_v52 = vpack.c.bf16 %v1540_v2, %v1537_v33  ;;  %v1543_v3 = vld [vmem:[#allocation2 + $0x1f0] sm:$0xff]  ;;  %4010 = vmatprep.subr.bf16.mxu1 %v4009_v1 }
 0x9db   :  { %v1347_v29 = vmul.f32 %v1343_v26, %v1334_v36  ;;  %3982 = vmatprep.subr.bf16.mxu0 %v3981_v55  ;;  %v1546_v55 = vld [vmem:[#allocation2 + $0x208] sm:$0xff]  ;;  %4012 = vmatpush3.bf16.msra.mxu1 %v4009_v1 }
 0x9dc   :  { %v1350_v30 = vmul.f32 %v1346_v27, %v1332_v23  ;;  %v1554_v27 = vld [vmem:[#allocation2 + $0x248] sm:$0xff]  ;;  %4014 = vmatprep.subr.bf16.mxu1 %v4013_v52  ;;  %v4017_v5 = vpack.c.bf16 %v1546_v55, %v1543_v3 }
 0x9dd   :  { %v1351_v31 = vmul.f32 %v1347_v29, %v1334_v36  ;;  %v1557_v29 = vld [vmem:[#allocation2 + $0x260] sm:$0xff] }
 0x9de   :  { %v1354_v34 = vadd.f32 %v1350_v30, %v1332_v23  ;;  %3984 = vmatpush1.bf16.msra.mxu0 %v3983_v9  ;;  %v1551_v23 = vld [vmem:[#allocation2 + $0x230] sm:$0xff]  ;;  %v3993_v30 = vpack.c.bf16 %v1557_v29, %v1554_v27  ;;  %v1570_v27 = vld [vmem:[#allocation2 + $0x2c8] sm:$0xff] }
 0x9df   :  { %v1355_v35 = vadd.f32 %v1351_v31, %v1334_v36  ;;  %3986 = vmatprep.subr.bf16.mxu0 %v3985_v10  ;;  %v3989_v24 = vpack.c.bf16 %v1551_v23, %v1548_v22  ;;  %v1547_v36 = vld [vmem:[#allocation2 + $0x210] sm:$0xff]  ;;  %v1553_v31 = vld [vmem:[#allocation2 + $0x240] sm:$0xff]  ;;  %4016 = vmatpush3.bf16.msra.mxu1 %v4013_v52 }
 0x9e0   :  { %v1358_v38 = vmul.f32 0.7978846, %v1354_v34  ;;  %v3991_v26 = vpack.c.bf16 %v1550_v25, %v1547_v36  ;;  %v1556_v34 = vld [vmem:[#allocation2 + $0x258] sm:$0xff]  ;;  %4018 = vmatprep.subr.bf16.mxu1 %v4017_v5  ;;  %v1555_v22 = vld [vmem:[#allocation2 + $0x250] sm:$0xff] }
 0x9e1   :  { %v1359_v40 = vmul.f32 0.7978846, %v1355_v35  ;;  %v3995_v35 = vpack.c.bf16 %v1556_v34, %v1553_v31  ;;  %v1564_v36 = vld [vmem:[#allocation2 + $0x298] sm:$0xff] }
 0x9e2   :  { %4263 = vtanh.f32 %v1358_v38  ;;  %v1563_v38 = vld [vmem:[#allocation2 + $0x290] sm:$0xff]  ;;  %v1576_v31 = vld [vmem:[#allocation2 + $0x2f8] sm:$0xff] }
 0x9e3   :  { %4265 = vtanh.f32 %v1359_v40  ;;  %4020 = vmatpush3.bf16.msra.mxu1 %v4017_v5 }
 0x9ec   :  { %v4264_v42 = vpop.eup %4263 }
 0x9ed   :  { %v4266_v43 = vpop.eup %4265  ;;  %v1366_v44 = vadd.f32 1.0, %v4264_v42  ;;  %v1559_v42 = vld [vmem:[#allocation2 + $0x270] sm:$0xff] }
 0x9ee   :  { %v1367_v46 = vadd.f32 1.0, %v4266_v43  ;;  %v1562_v43 = vld [vmem:[#allocation2 + $0x288] sm:$0xff] }
 0x9ef   :  { %v1370_v49 = vmul.f32 %v1366_v44, %v1338_v47  ;;  %v3999_v44 = vpack.c.bf16 %v1562_v43, %v1559_v42 }
 0x9f0   :  { %v1371_v48 = vmul.f32 %v1367_v46, %v1339_v45  ;;  %v1566_v45 = vld [vmem:[#allocation2 + $0x2a8] sm:$0xff]  ;;  %v1569_v46 = vld [vmem:[#allocation2 + $0x2c0] sm:$0xff] }
 0x9f1   :  { %v4001_v47 = vpack.c.bf16 %v1569_v46, %v1566_v45  ;;  %v3216_v45 = vld [vmem:[%s5214_s25 + $0x3] sm:$0x7] }
 0x9f2   :  { %1480 = vmatprep.mubr.f32.mxu1 %v1371_v48  ;;  %v1565_v48 = vld [vmem:[#allocation2 + $0x2a0] sm:$0xff]  ;;  %v1583_v46 = vrot.slane %v3216_v45, %v4691_v37 }
 0x9f3   :  { %1481 = vmatmul.mubr.f32.gmra.mrb[14].mxu1 %v1370_v49  ;;  %v1568_v49 = vld [vmem:[#allocation2 + $0x2b8] sm:$0xff] }
 0xa2e   :  { %v3345_v50 = vpop.f32.mrb[12].mxu1 }
 0xa2f   :  { %v3346_v54 = vpop.f32.mrb[13].mxu1 }
 0xa30   :  { %v3347_v56 = vadd.f32 %v3346_v54, %v3345_v50  ;;  %v4003_v50 = vpack.c.bf16 %v1568_v49, %v1565_v48  ;;  %v1575_v54 = vld [vmem:[#allocation2 + $0x2f0] sm:$0xff] }
 0xa32   :  { %v1478_v58 = vadd.f32 %v3347_v56, %v3213_v53  ;;  %v1571_v56 = vld [vmem:[#allocation2 + $0x2d0] sm:$0xff] }
 0xa34   :  { %v1486_v51 = vadd.f32 %v1478_v58, %v4842_v59  ;;  %v1541_v59 = vld [vmem:[#allocation2 + $0x1e0] sm:$0xff] }
 0xa35   :  { %v3987_v12 = vpack.c.bf16 %v1544_v11, %v1541_v59 }
 0xa36   :  { %1490 = vadd.xlane.f32.xlu1 %v1486_v51 }
 0xa37   :  { %3988 = vmatpush1.bf16.msra.mxu0 %v3987_v12 }
 0xa38   :  { %3990 = vmatprep.subr.bf16.mxu0 %v3989_v24  ;;  %v1561_v24 = vld [vmem:[#allocation2 + $0x280] sm:$0xff] }
 0xa39   :  { %v4029_v25 = vpack.c.bf16 %v1564_v36, %v1561_v24 }
 0xa3b   :  { %3992 = vmatpush1.bf16.msra.mxu0 %v3991_v26  ;;  %v1567_v26 = vld [vmem:[#allocation2 + $0x2b0] sm:$0xff] }
 0xa3c   :  { %3994 = vmatprep.subr.bf16.mxu0 %v3993_v30  ;;  %v4033_v29 = vpack.c.bf16 %v1570_v27, %v1567_v26  ;;  %v1573_v30 = vld [vmem:[#allocation2 + $0x2e0] sm:$0xff] }
 0xa3d   :  { %v4037_v34 = vpack.c.bf16 %v1576_v31, %v1573_v30 }
 0xa3f   :  { %3996 = vmatpush1.bf16.msra.mxu0 %v3995_v35 }
 0xac3   :  { %v1491_v13 = vpop.xlane.xlu1 %1490 }
 0xac4   :  { %v1494_v14 = vmul.f32 0.0078125, %v1491_v13  ;;  %v3214_v13 = vld [vmem:[%s5185_s14] ss:$0 sm:$0xff] }
 0xac6   :  { %v4862_v15 = vsub.f32 %v1486_v51, %v1494_v14  ;;  %v3348_v16 = vpop.f32.mrb[14].mxu1  ;;  %v1574_v51 = vld [vmem:[#allocation2 + $0x2e8] sm:$0xff] }
 0xac7   :  { %v3349_v17 = vpop.f32.mrb[15].mxu1  ;;  %v4007_v60 = vpack.c.bf16 %v1574_v51, %v1571_v56  ;;  %v1591_v56 = vrot.slane %v3216_v45, %v244_v41 }
 0xac8   :  { %v3350_v18 = vadd.f32 %v3349_v17, %v3348_v16  ;;  %v1498_v19 = vmul.f32 %v4862_v15, %v4862_v15  ;;  %v3215_v16 = vld [vmem:[%s5186_s15] ss:$0 sm:$0xff] }
 0xaca   :  { %v1483_v20 = vadd.f32 %v3350_v18, %v3213_v53  ;;  %1500 = vadd.xlane.f32.xlu0 %v1498_v19  ;;  %v1572_v53 = vld [vmem:[#allocation2 + $0x2d8] sm:$0xff]  ;;  %v1549_v19 = vld [vmem:[#allocation2 + $0x220] sm:$0xff] }
 0xacb   :  { %v4005_v58 = vpack.c.bf16 %v1575_v54, %v1572_v53 }
 0xacc   :  { %v4867_v21 = vadd.f32 %v1483_v20, %v4849_v61  ;;  %v1560_v61 = vld [vmem:[#allocation2 + $0x278] sm:$0xff] }
 0xacd   :  { %v3997_v40 = vpack.c.bf16 %v1563_v38, %v1560_v61  ;;  %v1552_v20 = vld [vmem:[#allocation2 + $0x238] sm:$0xff] }
 0xace   :  { %1492 = vadd.xlane.f32.xlu1 %v4867_v21 }
 0xacf   :  { %3998 = vmatprep.subr.bf16.mxu0 %v3997_v40 }
 0xad0   :  { %4000 = vmatpush1.bf16.msra.mxu0 %v3999_v44 }
 0xad1   :  { %4002 = vmatprep.subr.bf16.mxu0 %v4001_v47  ;;  %v4898_v47 = vrot.slane %v3216_v45, %v4697_v39 }
 0xad4   :  { %4004 = vmatpush1.bf16.msra.mxu0 %v4003_v50 }
 0xad5   :  { %4006 = vmatprep.subr.bf16.mxu0 %v4005_v58 }
 0xad8   :  { %4008 = vmatpush1.bf16.msra.mxu0 %v4007_v60 }
 0xad9   :  { %3637 = vmatprep.subr.mxu0 %v4460_v4 }
 0xb57   :  { %v1501_v57 = vpop.xlane.xlu0 %1500 }
 0xb58   :  { %v1504_v6 = vmul.f32 0.0078125, %v1501_v57 }
 0xb5a   :  { %v1506_v7 = vadd.f32 1e-05, %v1504_v6 }
 0xb5b   :  { %v1493_v9 = vpop.xlane.xlu1 %1492 }
 0xb5c   :  { %4267 = vrsqrt.f32 %v1506_v7  ;;  %v1495_v10 = vmul.f32 0.0078125, %v1493_v9 }
 0xb5e   :  { %v1497_v59 = vsub.f32 %v4867_v21, %v1495_v10  ;;  %v4021_v21 = vpack.c.bf16 %v1552_v20, %v1549_v19 }
 0xb60   :  { %v1499_v11 = vmul.f32 %v1497_v59, %v1497_v59  ;;  %4022 = vmatprep.subr.bf16.mxu1 %v4021_v21 }
 0xb61   :  { %4024 = vmatpush3.bf16.msra.mxu1 %v4021_v21 }
 0xb62   :  { %1502 = vadd.xlane.f32.xlu0 %v1499_v11 }
 0xb66   :  { %v4268_v12 = vpop.eup %4267 }
 0xb67   :  { %v1510_v14 = vmul.f32 %v4268_v12, %v4862_v15  ;;  %v1558_v15 = vld [vmem:[#allocation2 + $0x268] sm:$0xff] }
 0xb68   :  { %v4025_v23 = vpack.c.bf16 %v1558_v15, %v1555_v22 }
 0xb69   :  { %v1518_v17 = vmul.f32 %v3214_v13, %v1510_v14 }
 0xb6a   :  { %4026 = vmatprep.subr.bf16.mxu1 %v4025_v23 }
 0xb6b   :  { %v4879_v18 = vadd.f32 %v3215_v16, %v1518_v17  ;;  %4028 = vmatpush3.bf16.msra.mxu1 %v4025_v23 }
 0xb6c   :  { %4030 = vmatprep.subr.bf16.mxu1 %v4029_v25 }
 0xb6d   :  { %1660 = vmatmul.mubr.f32.vlgmr.msra.gmra.mrb[16].mxu0 %v4879_v18  ;;  %3634 = vmatprep.mubr.f32.mxu1 %v4879_v18 }
 0xb6e   :  { %1665 = vmatprep.mubr.f32.mxu0 %v4460_v4 }
 0xb6f   :  { %4032 = vmatpush3.bf16.msra.mxu1 %v4029_v25 }
 0xb70   :  { %4034 = vmatprep.subr.bf16.mxu1 %v4033_v29 }
 0xb73   :  { %4036 = vmatpush3.bf16.msra.mxu1 %v4033_v29 }
 0xb74   :  { %4038 = vmatprep.subr.bf16.mxu1 %v4037_v34 }
 0xb77   :  { %4040 = vmatpush3.bf16.msra.mxu1 %v4037_v34 }
 0xb78   :  { %3672 = vmatprep.subr.mxu1 %v4460_v4 }
 0xbef   :  { %v1503_v35 = vpop.xlane.xlu0 %1502 }
 0xbf0   :  { %v1505_v61 = vmul.f32 0.0078125, %v1503_v35 }
 0xbf2   :  { %v1507_v38 = vadd.f32 1e-05, %v1505_v61 }
 0xbf4   :  { %4269 = vrsqrt.f32 %v1507_v38 }
 0xbfe   :  { %v4270_v40 = vpop.eup %4269 }
 0xbff   :  { %v1511_v42 = vmul.f32 %v4270_v40, %v1497_v59 }
 0xc01   :  { %v1519_v43 = vmul.f32 %v3214_v13, %v1511_v42 }
 0xc03   :  { %v4885_v44 = vadd.f32 %v3215_v16, %v1519_v43 }
 0xc05   :  { %1666 = vmatmul.mubr.f32.gmra.mrb[18].mxu0 %v4885_v44  ;;  %3635 = vmatmul.mubr.f32.vlgmr.msra.gmra.mrb[16].mxu1 %v4885_v44 }
 0xc06   :  { %3639 = vmatprep.mubr.msk.f32.mxu0 %vm4461_vm0, %v4460_v4  ;;  %3674 = vmatprep.mubr.msk.f32.mxu1 %vm4461_vm0, %v4460_v4 }
 0xc40   :  { %v1661_v48 = vpop.f32.mrb[16].mxu0 }
 0xc41   :  { %v1662_v49 = vadd.f32 %v1661_v48, %v1583_v46  ;;  %v1663_v50 = vpop.f32.mrb[17].mxu0 }
 0xc42   :  { %v1664_v53 = vadd.f32 %v1663_v50, %v4898_v47 }
 0xc43   :  { %v1747_v54 = vmul.f32 0.125, %v1662_v49 }
 0xc44   :  { %3638 = vmatpush3.xpose.msk.msra.mxu0 %vm407_vm1, %v1664_v53 }
 0xc45   :  { %3642 = vmatprep.subr.mxu0 %v4460_v4 }
 0xc47   :  { %3640 = vmatmul.mubr.msk.f32.vlgmr.msra.gmra.mrb[20].mxu0 %vm407_vm1, %v1747_v54 }
 0xc48   :  { %3644 = vmatprep.mubr.msk.f32.mxu0 %vm4461_vm0, %v4460_v4 }
 0xcd8   :  { %v1667_v58 = vpop.f32.mrb[18].mxu0  ;;  %v3636_v51 = vpop.f32.mrb[16].mxu1 }
 0xcd9   :  { %v4908_v60 = vadd.f32 %v3636_v51, %v1591_v56  ;;  %v1669_v62 = vpop.f32.mrb[19].mxu0  ;;  %v1738_v0 = vpop.f32.mrb[17].mxu1  ;;  %v1668_v19 = vadd.f32 %v1667_v58, %v1583_v46 }
 0xcda   :  { %v1739_v33 = vadd.f32 %v1738_v0, %v1591_v56  ;;  %v1670_v27 = vadd.f32 %v1669_v62, %v4898_v47 }
 0xcdb   :  { %v1748_v20 = vmul.f32 0.125, %v1668_v19 }
 0xcdc   :  { %3643 = vmatpush3.msra.mxu0 %v1739_v33 }
 0xcdd   :  { %3647 = vmatprep.subr.mxu0 %v4460_v4 }
 0xd1a   :  { %v1821_v1 = vpop.f32.mrb[20].mxu0 }
 0xd1b   :  { %v1822_v2 = vadd.f32 %v1821_v1, %v4735_v63  ;;  %v3641_v52 = vpop.f32.mrb[21].mxu0 }
 0xd1d   :  { %v1825_v3 = vsel %vm484_vm2, %v1822_v2, -inf }
 0xd1e   :  { %1826 = vmax.xlane.f32.xlu1 %v1825_v3 }
 0xd2f   :  { %1911 = vrot.lane.b32.xlu1 %v1664_v53, %s4462_s22 }
 0xdab   :  { %v1827_v32 = vpop.xlane.xlu1 %1826 }
 0xdac   :  { %v1828_v41 = vsub.f32 %v1822_v2, %v1827_v32 }
 0xdae   :  { %v1829_v55 = vmul.f32 1.442695, %v1828_v41 }
 0xdaf   :  { %v1912_v10 = vpop.permute.xlu1 %1911 }
 0xdb0   :  { %4271 = vpow2.f32 %v1829_v55  ;;  %v3230_v55 = vld [vmem:[%s5216_s23 + $0x88] sm:$0xff] }
 0xdba   :  { %v4272_v5 = vpop.eup %4271 }
 0xdbb   :  { %v1831_v57 = vsel %vm484_vm2, %v4272_v5, 0.0 }
 0xdbc   :  { %1832 = vadd.xlane.f32.xlu0 %v1831_v57 }
 0xdd2   :  { %1909 = vrot.lane.b32.xlu0 %v1747_v54, %s4462_s22 }
 0xe49   :  { %v1833_v6 = vpop.xlane.xlu0 %1832 }
 0xe4a   :  { %4273 = vrcp.f32 %v1833_v6  ;;  %v3232_v6 = vld [vmem:[%s5216_s23 + $0x98] sm:$0xff] }
 0xe4d   :  { %v1910_v59 = vpop.permute.xlu0 %1909 }
 0xe54   :  { %v4274_v7 = vpop.eup %4273 }
 0xe55   :  { %v1835_v9 = vmul.f32 %v4274_v7, %v4272_v5  ;;  %v3231_v5 = vld [vmem:[%s5216_s23 + $0x90] sm:$0xff] }
 0xe56   :  { %v4045_v7 = vpack.c.bf16 %v3232_v6, %v3231_v5 }
 0xe57   :  { %3645 = vmatmul.mubr.msk.f32.vlgmr.msra.gmra.mrb[22].mxu0 %vm484_vm2, %v1835_v9  ;;  %v3233_v9 = vld [vmem:[%s5216_s23 + $0xa0] sm:$0xff] }
 0xe58   :  { %3648 = vmatpush3.xpose.msk.msra.mxu0 %vm407_vm1, %v1912_v10  ;;  %3649 = vmatprep.mubr.msk.f32.mxu0 %vm4461_vm0, %v4460_v4  ;;  %v3234_v10 = vld [vmem:[%s5216_s23 + $0xa8] sm:$0xff] }
 0xe59   :  { %3652 = vmatprep.subr.mxu0 %v4460_v4 }
 0xe5b   :  { %3650 = vmatmul.mubr.msk.f32.vlgmr.msra.gmra.mrb[24].mxu0 %vm407_vm1, %v1910_v59  ;;  %v4049_v59 = vpack.c.bf16 %v3234_v10, %v3233_v9  ;;  %v2571_v9 = vld [vmem:[#allocation5 + $0x178] sm:$0xff] }
 0xe5c   :  { %3654 = vmatprep.mubr.msk.f32.mxu0 %vm4461_vm0, %v4460_v4 }
 0xf2a   :  { %v4924_v11 = vpop.f32.mrb[22].mxu0 }
 0xf2b   :  { %v3646_v12 = vpop.f32.mrb[23].mxu0 }
 0xf2c   :  { %v3235_v12 = vld [vmem:[%s5216_s23 + $0xb0] sm:$0xff] }
 0xf2e   :  { %v1983_v13 = vpop.f32.mrb[24].mxu0 }
 0xf2f   :  { %v1984_v14 = vadd.f32 %v1983_v13, %v4735_v63  ;;  %v3651_v16 = vpop.f32.mrb[25].mxu0  ;;  %v3236_v13 = vld [vmem:[%s5216_s23 + $0xb8] sm:$0xff] }
 0xf30   :  { %v3237_v16 = vld [vmem:[%s5216_s23 + $0xc0] sm:$0xff] }
 0xf31   :  { %v1987_v17 = vsel %vm484_vm2, %v1984_v14, -inf }
 0xf32   :  { %1988 = vmax.xlane.f32.xlu1 %v1987_v17  ;;  %v3238_v17 = vld [vmem:[%s5216_s23 + $0xc8] sm:$0xff] }
 0xf33   :  { %v4057_v19 = vpack.c.bf16 %v3238_v17, %v3237_v16  ;;  %v2575_v16 = vld [vmem:[#allocation5 + $0x198] sm:$0xff] }
 0xf43   :  { %1999 = vrot.lane.b32.xlu1 %v1739_v33, %s4462_s22 }
 0xf47   :  { %2240 = vrot.lane.b32.xlu1 %v1748_v20, %s4462_s22 }
 0xfbf   :  { %v1989_v21 = vpop.xlane.xlu1 %1988 }
 0xfc0   :  { %v1990_v22 = vsub.f32 %v1984_v14, %v1989_v21  ;;  %v4053_v14 = vpack.c.bf16 %v3236_v13, %v3235_v12  ;;  %v3240_v21 = vld [vmem:[%s5216_s23 + $0xd8] sm:$0xff]  ;;  %v2570_v12 = vld [vmem:[#allocation5 + $0x170] sm:$0xff] }
 0xfc2   :  { %v1991_v15 = vmul.f32 1.442695, %v1990_v22 }
 0xfc3   :  { %v2000_v23 = vpop.permute.xlu1 %1999 }
 0xfc4   :  { %4275 = vpow2.f32 %v1991_v15  ;;  %3653 = vmatpush3.msra.mxu0 %v2000_v23  ;;  %v3241_v15 = vld [vmem:[%s5216_s23 + $0xe0] sm:$0xff]  ;;  %v3242_v23 = vld [vmem:[%s5216_s23 + $0xe8] sm:$0xff] }
 0xfc5   :  { %3657 = vmatprep.subr.mxu0 %v4460_v4 }
 0xfc7   :  { %v2241_v50 = vpop.permute.xlu1 %2240 }
 0xfce   :  { %v4276_v24 = vpop.eup %4275 }
 0xfcf   :  { %v1993_v63 = vsel %vm484_vm2, %v4276_v24, 0.0 }
 0xfd0   :  { %1994 = vadd.xlane.f32.xlu0 %v1993_v63  ;;  %v3243_v63 = vld [vmem:[%s5216_s23 + $0xf0] sm:$0xff] }
0x105d   :  { %v1995_v36 = vpop.xlane.xlu0 %1994 }
0x105e   :  { %4277 = vrcp.f32 %v1995_v36  ;;  %v3244_v36 = vld [vmem:[%s5216_s23 + $0xf8] sm:$0xff] }
0x1068   :  { %v4278_v25 = vpop.eup %4277 }
0x1069   :  { %v1997_v26 = vmul.f32 %v4278_v25, %v4276_v24  ;;  %v4065_v24 = vpack.c.bf16 %v3242_v23, %v3241_v15  ;;  %v4069_v25 = vpack.c.bf16 %v3244_v36, %v3243_v63  ;;  %v2579_v15 = vld [vmem:[#allocation5 + $0x1b8] sm:$0xff]  ;;  %v2578_v63 = vld [vmem:[#allocation5 + $0x1b0] sm:$0xff]  ;;  %v2581_v36 = vld [vmem:[#allocation5 + $0x1c8] sm:$0xff] }
0x106b   :  { %3655 = vmatmul.mubr.msk.f32.vlgmr.msra.gmra.mrb[26].mxu0 %vm484_vm2, %v1997_v26 }
0x106c   :  { %3658 = vmatpush3.xpose.msk.msra.mxu0 %vm407_vm1, %v1670_v27  ;;  %3659 = vmatprep.mubr.msk.f32.mxu0 %vm4461_vm0, %v4460_v4 }
0x106d   :  { %3662 = vmatprep.subr.mxu0 %v4460_v4 }
0x106f   :  { %3660 = vmatmul.mubr.msk.f32.vlgmr.msra.gmra.mrb[28].mxu0 %vm407_vm1, %v1748_v20  ;;  %v3239_v20 = vld [vmem:[%s5216_s23 + $0xd0] sm:$0xff] }
0x1070   :  { %3663 = vmatpush3.msra.mxu0 %v4908_v60  ;;  %3664 = vmatprep.mubr.msk.f32.mxu0 %vm4461_vm0, %v4460_v4  ;;  %v4061_v22 = vpack.c.bf16 %v3240_v21, %v3239_v20  ;;  %v2574_v20 = vld [vmem:[#allocation5 + $0x190] sm:$0xff] }
0x1071   :  { %3667 = vmatprep.subr.mxu0 %v4460_v4 }
0x113e   :  { %v4943_v29 = vpop.f32.mrb[26].mxu0 }
0x113f   :  { %v3656_v30 = vpop.f32.mrb[27].mxu0 }
0x1142   :  { %v2152_v31 = vpop.f32.mrb[28].mxu0 }
0x1143   :  { %v2153_v34 = vadd.f32 %v2152_v31, %v4741_v8  ;;  %v3661_v35 = vpop.f32.mrb[29].mxu0 }
0x1145   :  { %v2156_v61 = vsel %vm484_vm2, %v2153_v34, -inf }
0x1146   :  { %2157 = vmax.xlane.f32.xlu0 %v2156_v61 }
0x11d3   :  { %v2158_v38 = vpop.xlane.xlu0 %2157 }
0x11d4   :  { %v2159_v40 = vsub.f32 %v2153_v34, %v2158_v38 }
0x11d6   :  { %v2160_v42 = vmul.f32 1.442695, %v2159_v40  ;;  %v3246_v40 = vld [vmem:[%s5178_s7 + $0x1] ss:$0 sm:$0xff] }
0x11d8   :  { %4279 = vpow2.f32 %v2160_v42 }
0x11e2   :  { %v4280_v43 = vpop.eup %4279 }
0x11e3   :  { %v2162_v45 = vsel %vm484_vm2, %v4280_v43, 0.0 }
0x11e4   :  { %2163 = vadd.xlane.f32.xlu0 %v2162_v45 }
0x11fa   :  { %2242 = vrot.lane.b32.xlu0 %v1670_v27, %s4462_s22 }
0x1271   :  { %v2164_v46 = vpop.xlane.xlu0 %2163 }
0x1272   :  { %4281 = vrcp.f32 %v2164_v46 }
0x1275   :  { %v2243_v49 = vpop.permute.xlu0 %2242 }
0x127c   :  { %v4282_v47 = vpop.eup %4281 }
0x127d   :  { %v2166_v48 = vmul.f32 %v4282_v47, %v4280_v43 }
0x127f   :  { %3665 = vmatmul.mubr.msk.f32.vlgmr.msra.gmra.mrb[30].mxu0 %vm484_vm2, %v2166_v48  ;;  %v2559_v48 = vld [vmem:[#allocation5 + $0x118] sm:$0xff] }
0x1280   :  { %3668 = vmatpush3.xpose.msk.msra.mxu0 %vm407_vm1, %v2243_v49  ;;  %3669 = vmatprep.mubr.msk.f32.mxu0 %vm4461_vm0, %v4460_v4  ;;  %v2556_v49 = vld [vmem:[#allocation5 + $0x100] sm:$0xff] }
0x1283   :  { %3670 = vmatmul.mubr.msk.f32.vlgmr.msra.gmra.mrb[32].mxu0 %vm407_vm1, %v2241_v50 }
0x1352   :  { %v4954_v53 = vpop.f32.mrb[30].mxu0 }
0x1353   :  { %v3666_v54 = vpop.f32.mrb[31].mxu0 }
0x1354   :  { %v2561_v54 = vld [vmem:[#allocation5 + $0x128] sm:$0xff] }
0x1356   :  { %v2314_v56 = vpop.f32.mrb[32].mxu0 }
0x1357   :  { %v2315_v58 = vadd.f32 %v2314_v56, %v4741_v8  ;;  %v3671_v51 = vpop.f32.mrb[33].mxu0  ;;  %v2563_v56 = vld [vmem:[#allocation5 + $0x138] sm:$0xff] }
0x1358   :  { %v4077_v51 = vpack.c.bf16 %v2563_v56, %v2561_v54 }
0x1359   :  { %v2318_v62 = vsel %vm484_vm2, %v2315_v58, -inf }
0x135a   :  { %2319 = vmax.xlane.f32.xlu1 %v2318_v62  ;;  %v2560_v62 = vld [vmem:[#allocation5 + $0x120] sm:$0xff] }
0x136b   :  { %2330 = vrot.lane.b32.xlu1 %v4908_v60, %s4462_s22  ;;  %v3229_v60 = vld [vmem:[%s5216_s23 + $0x80] sm:$0xff] }
0x136c   :  { %v4041_v57 = vpack.c.bf16 %v3230_v55, %v3229_v60 }
0x136e   :  { %4042 = vmatprep.subr.bf16.mxu0 %v4041_v57 }
0x136f   :  { %4044 = vmatpush3.bf16.msra.mxu0 %v4041_v57 }
0x1370   :  { %4046 = vmatprep.subr.bf16.mxu0 %v4045_v7 }
0x1373   :  { %4048 = vmatpush3.bf16.msra.mxu0 %v4045_v7  ;;  %v2569_v7 = vld [vmem:[#allocation5 + $0x168] sm:$0xff] }
0x1374   :  { %4050 = vmatprep.subr.bf16.mxu0 %v4049_v59  ;;  %v4085_v10 = vpack.c.bf16 %v2571_v9, %v2569_v7  ;;  %v2719_v9 = vld [vmem:[#allocation7 + $0x120] sm:$0xff] }
0x1377   :  { %4052 = vmatpush3.bf16.msra.mxu0 %v4049_v59  ;;  %v2568_v59 = vld [vmem:[#allocation5 + $0x160] sm:$0xff] }
0x1378   :  { %4054 = vmatprep.subr.bf16.mxu0 %v4053_v14  ;;  %v4087_v13 = vpack.c.bf16 %v2570_v12, %v2568_v59  ;;  %v2737_v12 = vld [vmem:[#allocation7 + $0x1b0] sm:$0xff] }
0x137b   :  { %4056 = vmatpush3.bf16.msra.mxu0 %v4053_v14  ;;  %v2573_v14 = vld [vmem:[#allocation5 + $0x188] sm:$0xff] }
0x137c   :  { %4058 = vmatprep.subr.bf16.mxu0 %v4057_v19  ;;  %v4089_v17 = vpack.c.bf16 %v2575_v16, %v2573_v14  ;;  %v2721_v16 = vld [vmem:[#allocation7 + $0x130] sm:$0xff] }
0x137f   :  { %4060 = vmatpush3.bf16.msra.mxu0 %v4057_v19  ;;  %v2572_v19 = vld [vmem:[#allocation5 + $0x180] sm:$0xff] }
0x1380   :  { %4062 = vmatprep.subr.bf16.mxu0 %v4061_v22  ;;  %v4091_v21 = vpack.c.bf16 %v2574_v20, %v2572_v19  ;;  %v2739_v20 = vld [vmem:[#allocation7 + $0x1c0] sm:$0xff] }
0x1383   :  { %4064 = vmatpush3.bf16.msra.mxu0 %v4061_v22  ;;  %v2577_v22 = vld [vmem:[#allocation5 + $0x1a8] sm:$0xff] }
0x1384   :  { %4066 = vmatprep.subr.bf16.mxu0 %v4065_v24  ;;  %v4093_v23 = vpack.c.bf16 %v2579_v15, %v2577_v22  ;;  %v2723_v22 = vld [vmem:[#allocation7 + $0x140] sm:$0xff] }
0x1387   :  { %4068 = vmatpush3.bf16.msra.mxu0 %v4065_v24  ;;  %v2576_v24 = vld [vmem:[#allocation5 + $0x1a0] sm:$0xff] }
0x1388   :  { %4070 = vmatprep.subr.bf16.mxu0 %v4069_v25 }
0x138b   :  { %4072 = vmatpush3.bf16.msra.mxu0 %v4069_v25  ;;  %v4095_v25 = vpack.c.bf16 %v2578_v63, %v2576_v24  ;;  %v2741_v24 = vld [vmem:[#allocation7 + $0x1d0] sm:$0xff]  ;;  %v2742_v63 = vld [vmem:[#allocation7 + $0x1d8] sm:$0xff] }
0x13e7   :  { %v2320_v0 = vpop.xlane.xlu1 %2319 }
0x13e8   :  { %v2321_v33 = vsub.f32 %v2315_v58, %v2320_v0  ;;  %v2562_v0 = vld [vmem:[#allocation5 + $0x130] sm:$0xff] }
0x13ea   :  { %v2322_v1 = vmul.f32 1.442695, %v2321_v33  ;;  %v2565_v33 = vld [vmem:[#allocation5 + $0x148] sm:$0xff] }
0x13eb   :  { %v2331_v2 = vpop.permute.xlu1 %2330 }
0x13ec   :  { %4283 = vpow2.f32 %v2322_v1  ;;  %3673 = vmatpush3.msra.mxu1 %v2331_v2  ;;  %v2567_v1 = vld [vmem:[#allocation5 + $0x158] sm:$0xff]  ;;  %v2564_v2 = vld [vmem:[#allocation5 + $0x140] sm:$0xff] }
0x13f6   :  { %v4284_v52 = vpop.eup %4283 }
0x13f7   :  { %v2324_v3 = vsel %vm484_vm2, %v4284_v52, 0.0 }
0x13f8   :  { %2325 = vadd.xlane.f32.xlu0 %v2324_v3 }
0x1485   :  { %v2326_v32 = vpop.xlane.xlu0 %2325 }
0x1486   :  { %4285 = vrcp.f32 %v2326_v32 }
0x1490   :  { %v4286_v8 = vpop.eup %4285 }
0x1491   :  { %v2328_v41 = vmul.f32 %v4286_v8, %v4284_v52  ;;  %v2566_v52 = vld [vmem:[#allocation5 + $0x150] sm:$0xff] }
0x1492   :  { %v4083_v3 = vpack.c.bf16 %v2566_v52, %v2564_v2 }
0x1493   :  { %3675 = vmatmul.mubr.msk.f32.vlgmr.msra.gmra.mrb[18].mxu1 %vm484_vm2, %v2328_v41 }
0x1494   :  { %2665 = vmatprep.mubr.f32.mxu1 %v4460_v4 }
0x1566   :  { %v2402_v26 = vpop.f32.mrb[18].mxu1 }
0x1567   :  { %v4230_v27 = vpack.i.bf16 %v2402_v26, %v4943_v29  ;;  %v3676_v30 = vpop.f32.mrb[19].mxu1  ;;  %v2583_v26 = vld [vmem:[#allocation5 + $0x1d8] sm:$0xff] }
0x1568   :  { %v2582_v30 = vld [vmem:[#allocation5 + $0x1d0] sm:$0xff] }
0x1569   :  { %4231 = vrot.lane.b32.xlu0 %v4230_v27, %s4462_s22  ;;  %v2580_v27 = vld [vmem:[#allocation5 + $0x1c0] sm:$0xff] }
0x15db   :  { %v4232_v31 = vpop.permute.xlu0 %4231 }
0x15dc   :  { %v4234_v34 = vunpack.i.h.bf16 %v4232_v31  ;;  %v4233_v35 = vunpack.i.l.bf16 %v4232_v31  ;;  %v4097_v31 = vpack.c.bf16 %v2583_v26, %v2581_v36  ;;  %v2725_v26 = vld [vmem:[#allocation7 + $0x150] sm:$0xff] }
0x15de   :  { %v2079_v61 = vsel %vm407_vm1, %v4924_v11, %v4233_v35  ;;  %v2410_v38 = vsel %vm407_vm1, %v4954_v53, %v4234_v34  ;;  %v2557_v11 = vld [vmem:[#allocation5 + $0x108] sm:$0xff]  ;;  %v2558_v53 = vld [vmem:[#allocation5 + $0x110] sm:$0xff]  ;;  %v2587_v35 = vld [vmem:[#allocation5 + $0x1f8] sm:$0xff] }
0x15df   :  { %3709 = vmatprep.mubr.f32.mxu0 %v2079_v61  ;;  %v4073_v50 = vpack.c.bf16 %v2559_v48, %v2557_v11  ;;  %v4075_v58 = vpack.c.bf16 %v2558_v53, %v2556_v49  ;;  %v2585_v34 = vld [vmem:[#allocation5 + $0x1e8] sm:$0xff]  ;;  %v4099_v61 = vpack.c.bf16 %v2582_v30, %v2580_v27  ;;  %v2726_v27 = vld [vmem:[#allocation7 + $0x158] sm:$0xff]  ;;  %v2743_v30 = vld [vmem:[#allocation7 + $0x1e0] sm:$0xff] }
0x15e0   :  { %3710 = vmatmul.mubr.f32.vlgmr.msra.gmra.mrb[34].mxu0 %v2410_v38  ;;  %v4101_v38 = vpack.c.bf16 %v2587_v35, %v2585_v34  ;;  %v2716_v11 = vld [vmem:[#allocation7 + $0x108] sm:$0xff]  ;;  %v4127_v34 = vpack.c.bf16 %v2726_v27, %v2725_v26 }
0x15e1   :  { %4074 = vmatprep.subr.bf16.mxu1 %v4073_v50 }
0x15e2   :  { %4076 = vmatpush1.bf16.msra.mxu1 %v4075_v58 }
0x15e3   :  { %4078 = vmatprep.subr.bf16.mxu1 %v4077_v51 }
0x16b3   :  { %v3711_v42 = vpop.f32.mrb[34].mxu0 }
0x16b4   :  { %v2508_v29 = vadd.f32 %v3711_v42, %v3246_v40  ;;  %v2502_v43 = vpop.f32.mrb[35].mxu0  ;;  %v2586_v42 = vld [vmem:[#allocation5 + $0x1f0] sm:$0xff] }
0x16b5   :  { %v2503_v45 = vadd.f32 %v3246_v40, %v2502_v43  ;;  %v2584_v40 = vld [vmem:[#allocation5 + $0x1e0] sm:$0xff] }
0x16b6   :  { %v2512_v46 = vadd.f32 %v2508_v29, %v4885_v44  ;;  %v4079_v44 = vpack.c.bf16 %v2562_v0, %v2560_v62  ;;  %v4103_v29 = vpack.c.bf16 %v2586_v42, %v2584_v40  ;;  %v2731_v43 = vld [vmem:[#allocation7 + $0x180] sm:$0xff]  ;;  %v2745_v40 = vld [vmem:[#allocation7 + $0x1f0] sm:$0xff]  ;;  %v2746_v42 = vld [vmem:[#allocation7 + $0x1f8] sm:$0xff] }
0x16b7   :  { %v2511_v47 = vadd.f32 %v2503_v45, %v4879_v18  ;;  %v4081_v18 = vpack.c.bf16 %v2567_v1, %v2565_v33  ;;  %v2732_v45 = vld [vmem:[#allocation7 + $0x188] sm:$0xff]  ;;  %v3249_v62 = vld [vmem:[%s5179_s8 + $0x1] ss:$0 sm:$0xff] }
0x16b8   :  { %2519 = vadd.xlane.f32.xlu0 %v2512_v46  ;;  %4080 = vmatpush1.bf16.msra.mxu1 %v4079_v44  ;;  %v3250_v33 = vld [vmem:[%s5180_s9 + $0x1] ss:$0 sm:$0xff] }
0x16b9   :  { %2517 = vadd.xlane.f32.xlu1 %v2511_v47  ;;  %4082 = vmatprep.subr.bf16.mxu1 %v4081_v18 }
0x16bc   :  { %4084 = vmatpush1.bf16.msra.mxu1 %v4083_v3 }
0x16bd   :  { %4086 = vmatprep.subr.bf16.mxu1 %v4085_v10  ;;  %v2720_v10 = vld [vmem:[#allocation7 + $0x128] sm:$0xff] }
0x16be   :  { %v4115_v59 = vpack.c.bf16 %v2720_v10, %v2719_v9 }
0x16c0   :  { %4088 = vmatpush1.bf16.msra.mxu1 %v4087_v13  ;;  %v2738_v13 = vld [vmem:[#allocation7 + $0x1b8] sm:$0xff] }
0x16c1   :  { %4090 = vmatprep.subr.bf16.mxu1 %v4089_v17  ;;  %v4117_v14 = vpack.c.bf16 %v2738_v13, %v2737_v12  ;;  %v2722_v17 = vld [vmem:[#allocation7 + $0x138] sm:$0xff] }
0x16c2   :  { %v4119_v19 = vpack.c.bf16 %v2722_v17, %v2721_v16 }
0x16c4   :  { %4092 = vmatpush1.bf16.msra.mxu1 %v4091_v21  ;;  %v2740_v21 = vld [vmem:[#allocation7 + $0x1c8] sm:$0xff] }
0x16c5   :  { %4094 = vmatprep.subr.bf16.mxu1 %v4093_v23  ;;  %v4121_v15 = vpack.c.bf16 %v2740_v21, %v2739_v20  ;;  %v2724_v23 = vld [vmem:[#allocation7 + $0x148] sm:$0xff] }
0x16c6   :  { %v4123_v36 = vpack.c.bf16 %v2724_v23, %v2723_v22 }
0x16c8   :  { %4096 = vmatpush1.bf16.msra.mxu1 %v4095_v25  ;;  %v4125_v25 = vpack.c.bf16 %v2742_v63, %v2741_v24 }
0x16c9   :  { %4098 = vmatprep.subr.bf16.mxu1 %v4097_v31  ;;  %v2744_v31 = vld [vmem:[#allocation7 + $0x1e8] sm:$0xff] }
0x16ca   :  { %v4129_v35 = vpack.c.bf16 %v2744_v31, %v2743_v30  ;;  %v3253_v31 = vld [vmem:[%s5184_s13 + $0x1] ss:$0 sm:$0xff] }
0x16cc   :  { %4100 = vmatpush1.bf16.msra.mxu1 %v4099_v61  ;;  %v2727_v61 = vld [vmem:[#allocation7 + $0x160] sm:$0xff] }
0x16cd   :  { %4102 = vmatprep.subr.bf16.mxu1 %v4101_v38  ;;  %v2728_v38 = vld [vmem:[#allocation7 + $0x168] sm:$0xff] }
0x16d0   :  { %4104 = vmatpush1.bf16.msra.mxu1 %v4103_v29  ;;  %v4131_v29 = vpack.c.bf16 %v2728_v38, %v2727_v61 }
0x1745   :  { %v2520_v32 = vpop.xlane.xlu0 %2519 }
0x1746   :  { %v2518_v8 = vpop.xlane.xlu1 %2517  ;;  %v2522_v41 = vmul.f32 0.0078125, %v2520_v32  ;;  %v2733_v32 = vld [vmem:[#allocation7 + $0x190] sm:$0xff] }
0x1747   :  { %v2521_v60 = vmul.f32 0.0078125, %v2518_v8  ;;  %v2734_v8 = vld [vmem:[#allocation7 + $0x198] sm:$0xff] }
0x1748   :  { %v5024_v5 = vsub.f32 %v2512_v46, %v2522_v41  ;;  %v2715_v46 = vld [vmem:[#allocation7 + $0x100] sm:$0xff]  ;;  %v4109_v41 = vpack.c.bf16 %v2734_v8, %v2733_v32 }
0x1749   :  { %v5022_v55 = vsub.f32 %v2511_v47, %v2521_v60  ;;  %v4105_v47 = vpack.c.bf16 %v2732_v45, %v2731_v43  ;;  %v4107_v48 = vpack.c.bf16 %v2716_v11, %v2715_v46  ;;  %v2717_v60 = vld [vmem:[#allocation7 + $0x110] sm:$0xff]  ;;  %v4133_v43 = vpack.c.bf16 %v2746_v42, %v2745_v40  ;;  %v2730_v46 = vld [vmem:[#allocation7 + $0x178] sm:$0xff]  ;;  %v3251_v11 = vld [vmem:[%s5182_s11 + $0x2] sm:$0x3] }
0x174a   :  { %v2526_v6 = vmul.f32 %v5024_v5, %v5024_v5  ;;  %v2729_v45 = vld [vmem:[#allocation7 + $0x170] sm:$0xff] }
0x174b   :  { %v2525_v57 = vmul.f32 %v5022_v55, %v5022_v55  ;;  %4106 = vmatprep.subr.bf16.mxu0 %v4105_v47  ;;  %v4135_v47 = vpack.c.bf16 %v2730_v46, %v2729_v45  ;;  %v2879_v46 = vld [vmem:[%s5187_s16] sm:$0xff] }
0x174c   :  { %4108 = vmatpush3.bf16.msra.mxu0 %v4107_v48  ;;  %v2594_v48 = vrot.slane %v3251_v11, %v4691_v37 }
0x174d   :  { %2527 = vadd.xlane.f32.xlu1 %v2525_v57  ;;  %4110 = vmatprep.subr.bf16.mxu0 %v4109_v41 }
0x1751   :  { %2529 = vadd.xlane.f32.xlu1 %v2526_v6  ;;  %v2736_v6 = vld [vmem:[#allocation7 + $0x1a8] sm:$0xff] }
0x17da   :  { %v2528_v49 = vpop.xlane.xlu1 %2527 }
0x17db   :  { %v2531_v50 = vmul.f32 0.0078125, %v2528_v49  ;;  %v2598_v49 = vrot.slane %v3251_v11, %v4697_v39  ;;  %v4463_v11 = vmov 0.0|0.0  }
0x17dc   :  { %4137 = vmatprep.subr.bf16.mxu1 %v4463_v11 }
0x17dd   :  { %v2533_v53 = vadd.f32 1e-05, %v2531_v50 }
0x17de   :  { %v2530_v54 = vpop.xlane.xlu1 %2529 }
0x17df   :  { %4287 = vrsqrt.f32 %v2533_v53  ;;  %v2532_v56 = vmul.f32 0.0078125, %v2530_v54 }
0x17e1   :  { %v2534_v58 = vadd.f32 1e-05, %v2532_v56 }
0x17e3   :  { %4289 = vrsqrt.f32 %v2534_v58 }
0x17e9   :  { %v4288_v51 = vpop.eup %4287 }
0x17ea   :  { %v2537_v0 = vmul.f32 %v4288_v51, %v5022_v55  ;;  %v2718_v55 = vld [vmem:[#allocation7 + $0x118] sm:$0xff] }
0x17eb   :  { %v4111_v57 = vpack.c.bf16 %v2718_v55, %v2717_v60 }
0x17ec   :  { %v2545_v1 = vmul.f32 %v3249_v62, %v2537_v0 }
0x17ed   :  { %v4290_v44 = vpop.eup %4289  ;;  %4112 = vmatpush3.bf16.msra.mxu0 %v4111_v57 }
0x17ee   :  { %v5037_v18 = vadd.f32 %v3250_v33, %v2545_v1  ;;  %v2538_v2 = vmul.f32 %v4290_v44, %v5024_v5  ;;  %v2735_v5 = vld [vmem:[#allocation7 + $0x1a0] sm:$0xff] }
0x17ef   :  { %v4113_v7 = vpack.c.bf16 %v2736_v6, %v2735_v5 }
0x17f0   :  { %2666 = vmatmul.mubr.f32.vlgmr.msra.gmra.mrb[20].mxu1 %v5037_v18  ;;  %v2546_v52 = vmul.f32 %v3249_v62, %v2538_v2 }
0x17f1   :  { %2671 = vmatprep.mubr.f32.mxu1 %v4460_v4  ;;  %4114 = vmatprep.subr.bf16.mxu0 %v4113_v7 }
0x17f2   :  { %v5042_v3 = vadd.f32 %v3250_v33, %v2546_v52  ;;  %4116 = vmatpush3.bf16.msra.mxu0 %v4115_v59 }
0x17f3   :  { %4118 = vmatprep.subr.bf16.mxu0 %v4117_v14 }
0x17f4   :  { %2672 = vmatmul.mubr.f32.gmra.mrb[22].mxu1 %v5042_v3 }
0x17f5   :  { %3744 = vmatprep.mubr.msk.f32.mxu1 %vm4461_vm0, %v4460_v4 }
0x17f6   :  { %4120 = vmatpush3.bf16.msra.mxu0 %v4119_v19 }
0x17f7   :  { %4122 = vmatprep.subr.bf16.mxu0 %v4121_v15 }
0x17fa   :  { %4124 = vmatpush3.bf16.msra.mxu0 %v4123_v36 }
0x17fb   :  { %4126 = vmatprep.subr.bf16.mxu0 %v4125_v25 }
0x17fe   :  { %4128 = vmatpush3.bf16.msra.mxu0 %v4127_v34 }
0x17ff   :  { %4130 = vmatprep.subr.bf16.mxu0 %v4129_v35 }
0x1802   :  { %4132 = vmatpush3.bf16.msra.mxu0 %v4131_v29 }
0x1803   :  { %4134 = vmatprep.subr.bf16.mxu0 %v4133_v43 }
0x1806   :  { %4136 = vmatpush3.bf16.msra.mxu0 %v4135_v47  ;;  %v2880_v47 = vld [vmem:[%s5187_s16 + $0x8] sm:$0xff] }
0x1807   :  { %4161 = vmatprep.subr.bf16.mxu0 %v4463_v11 }
0x18c3   :  { %v2667_v50 = vpop.f32.mrb[20].mxu1 }
0x18c4   :  { %v2668_v53 = vadd.f32 %v2667_v50, %v2594_v48  ;;  %v2669_v54 = vpop.f32.mrb[21].mxu1 }
0x18c5   :  { %v2670_v56 = vadd.f32 %v2669_v54, %v2598_v49 }
0x18c6   :  { %v2682_v58 = vmul.f32 0.044715, %v2668_v53  ;;  %v2678_v20 = vmul.f32 0.5, %v2668_v53 }
0x18c7   :  { %v2683_v51 = vmul.f32 0.044715, %v2670_v56  ;;  %v2673_v62 = vpop.f32.mrb[22].mxu1  ;;  %v2679_v17 = vmul.f32 0.5, %v2670_v56 }
0x18c8   :  { %v2686_v0 = vmul.f32 %v2682_v58, %v2668_v53  ;;  %v2674_v33 = vadd.f32 %v2673_v62, %v2594_v48  ;;  %v2675_v1 = vpop.f32.mrb[23].mxu1  ;;  %v4138_v48 = vpack.c.bf16 %v2880_v47, %v2879_v46  ;;  %v2882_v62 = vld [vmem:[%s5187_s16 + $0x18] sm:$0xff] }
0x18c9   :  { %v2687_v44 = vmul.f32 %v2683_v51, %v2670_v56  ;;  %v2676_v2 = vadd.f32 %v2675_v1, %v2598_v49  ;;  %v2881_v51 = vld [vmem:[%s5187_s16 + $0x10] sm:$0xff]  ;;  %v2884_v1 = vld [vmem:[%s5187_s16 + $0x28] sm:$0xff] }
0x18ca   :  { %v2690_v52 = vmul.f32 %v2686_v0, %v2668_v53  ;;  %v2684_v32 = vmul.f32 0.044715, %v2674_v33  ;;  %v2680_v25 = vmul.f32 0.5, %v2674_v33  ;;  %4139 = vmatpush3.bf16.msra.mxu1 %v4138_v48  ;;  %v4141_v0 = vpack.c.bf16 %v2882_v62, %v2881_v51  ;;  %v2988_v51 = vld [vmem:[#allocation8 + $0x78] sm:$0xff] }
0x18cb   :  { %v2685_v8 = vmul.f32 0.044715, %v2676_v2  ;;  %v2691_v41 = vmul.f32 %v2687_v44, %v2670_v56  ;;  %v2681_v63 = vmul.f32 0.5, %v2676_v2  ;;  %4140 = vmatprep.subr.bf16.mxu1 %v4463_v11 }
0x18cc   :  { %v2694_v60 = vadd.f32 %v2690_v52, %v2668_v53  ;;  %v2688_v37 = vmul.f32 %v2684_v32, %v2674_v33  ;;  %v2886_v52 = vld [vmem:[%s5187_s16 + $0x38] sm:$0xff] }
0x18cd   :  { %v2689_v55 = vmul.f32 %v2685_v8, %v2676_v2  ;;  %v2695_v39 = vadd.f32 %v2691_v41, %v2670_v56  ;;  %v2887_v8 = vld [vmem:[%s5187_s16 + $0x40] sm:$0xff]  ;;  %v2888_v41 = vld [vmem:[%s5187_s16 + $0x48] sm:$0xff] }
0x18ce   :  { %v2698_v57 = vmul.f32 0.7978846, %v2694_v60  ;;  %v2692_v5 = vmul.f32 %v2688_v37, %v2674_v33  ;;  %4142 = vmatpush3.bf16.msra.mxu1 %v4141_v0  ;;  %v4150_v60 = vpack.c.bf16 %v2888_v41, %v2887_v8  ;;  %v2889_v37 = vld [vmem:[%s5187_s16 + $0x50] sm:$0xff]  ;;  %v3067_v0 = vld [vmem:[#allocation10] sm:$0xff] }
0x18cf   :  { %v2699_v6 = vmul.f32 0.7978846, %v2695_v39  ;;  %v2693_v7 = vmul.f32 %v2689_v55, %v2676_v2  ;;  %4143 = vmatprep.subr.bf16.mxu1 %v4463_v11  ;;  %v2890_v55 = vld [vmem:[%s5187_s16 + $0x58] sm:$0xff]  ;;  %v3073_v41 = vld [vmem:[#allocation10 + $0x30] sm:$0xff] }
0x18d0   :  { %4291 = vtanh.f32 %v2698_v57  ;;  %v2696_v9 = vadd.f32 %v2692_v5, %v2674_v33  ;;  %v2883_v33 = vld [vmem:[%s5187_s16 + $0x20] sm:$0xff]  ;;  %v4153_v39 = vpack.c.bf16 %v2890_v55, %v2889_v37  ;;  %v2892_v5 = vld [vmem:[%s5187_s16 + $0x68] sm:$0xff] }
0x18d1   :  { %4293 = vtanh.f32 %v2699_v6  ;;  %v2697_v10 = vadd.f32 %v2693_v7, %v2676_v2  ;;  %v4144_v44 = vpack.c.bf16 %v2884_v1, %v2883_v33  ;;  %v2885_v2 = vld [vmem:[%s5187_s16 + $0x30] sm:$0xff]  ;;  %v2891_v57 = vld [vmem:[%s5187_s16 + $0x60] sm:$0xff]  ;;  %v3068_v33 = vld [vmem:[#allocation10 + $0x8] sm:$0xff] }
0x18d2   :  { %v2700_v59 = vmul.f32 0.7978846, %v2696_v9  ;;  %v4147_v32 = vpack.c.bf16 %v2886_v52, %v2885_v2  ;;  %v2893_v6 = vld [vmem:[%s5187_s16 + $0x70] sm:$0xff]  ;;  %v4156_v7 = vpack.c.bf16 %v2892_v5, %v2891_v57  ;;  %v2894_v9 = vld [vmem:[%s5187_s16 + $0x78] sm:$0xff]  ;;  %v3071_v52 = vld [vmem:[#allocation10 + $0x20] sm:$0xff] }
0x18d3   :  { %v2701_v12 = vmul.f32 0.7978846, %v2697_v10  ;;  %4145 = vmatpush3.bf16.msra.mxu1 %v4144_v44  ;;  %v4159_v10 = vpack.c.bf16 %v2894_v9, %v2893_v6  ;;  %v3069_v1 = vld [vmem:[#allocation10 + $0x10] sm:$0xff]  ;;  %v3070_v44 = vld [vmem:[#allocation10 + $0x18] sm:$0xff]  ;;  %v3075_v55 = vld [vmem:[#allocation10 + $0x40] sm:$0xff] }
0x18d4   :  { %4295 = vtanh.f32 %v2700_v59  ;;  %4146 = vmatprep.subr.bf16.mxu1 %v4463_v11  ;;  %v2973_v59 = vld [vmem:[#allocation8] sm:$0xff]  ;;  %v4189_v2 = vpack.c.bf16 %v3070_v44, %v3069_v1  ;;  %v3077_v5 = vld [vmem:[#allocation10 + $0x50] sm:$0xff]  ;;  %v3078_v6 = vld [vmem:[#allocation10 + $0x58] sm:$0xff] }
0x18d5   :  { %4297 = vtanh.f32 %v2701_v12  ;;  %v2974_v12 = vld [vmem:[#allocation8 + $0x8] sm:$0xff]  ;;  %v3079_v9 = vld [vmem:[#allocation10 + $0x60] sm:$0xff] }
0x18d7   :  { %4148 = vmatpush3.bf16.msra.mxu1 %v4147_v32  ;;  %v3072_v32 = vld [vmem:[#allocation10 + $0x28] sm:$0xff] }
0x18d8   :  { %4149 = vmatprep.subr.bf16.mxu1 %v4463_v11  ;;  %v4192_v8 = vpack.c.bf16 %v3072_v32, %v3071_v52 }
0x18da   :  { %v4292_v13 = vpop.eup %4291 }
0x18db   :  { %v4294_v14 = vpop.eup %4293  ;;  %v2706_v16 = vadd.f32 1.0, %v4292_v13  ;;  %4151 = vmatpush3.bf16.msra.mxu1 %v4150_v60  ;;  %v2975_v13 = vld [vmem:[#allocation8 + $0x10] sm:$0xff]  ;;  %v3074_v60 = vld [vmem:[#allocation10 + $0x38] sm:$0xff] }
0x18dc   :  { %v2707_v19 = vadd.f32 1.0, %v4294_v14  ;;  %4152 = vmatprep.subr.bf16.mxu1 %v4463_v11  ;;  %v4162_v14 = vpack.c.bf16 %v2974_v12, %v2973_v59  ;;  %v4195_v37 = vpack.c.bf16 %v3074_v60, %v3073_v41  ;;  %v3258_v12 = vld [vmem:[%s5188_s17] ss:$0 sm:$0xff] }
0x18dd   :  { %v2710_v23 = vmul.f32 %v2706_v16, %v2678_v20  ;;  %v2976_v16 = vld [vmem:[#allocation8 + $0x18] sm:$0xff]  ;;  %v2978_v20 = vld [vmem:[#allocation8 + $0x28] sm:$0xff] }
0x18de   :  { %v4296_v21 = vpop.eup %4295  ;;  %v2711_v22 = vmul.f32 %v2707_v19, %v2679_v17  ;;  %v4165_v17 = vpack.c.bf16 %v2976_v16, %v2975_v13  ;;  %v2977_v19 = vld [vmem:[#allocation8 + $0x20] sm:$0xff] }
0x18df   :  { %v4298_v15 = vpop.eup %4297  ;;  %v2708_v24 = vadd.f32 1.0, %v4296_v21  ;;  %4154 = vmatpush3.bf16.msra.mxu1 %v4153_v39  ;;  %v4168_v21 = vpack.c.bf16 %v2978_v20, %v2977_v19  ;;  %v3076_v39 = vld [vmem:[#allocation10 + $0x48] sm:$0xff]  ;;  %v3081_v19 = vld [vmem:[#allocation10 + $0x70] sm:$0xff]  ;;  %v3082_v20 = vld [vmem:[#allocation10 + $0x78] sm:$0xff] }
0x18e0   :  { %2819 = vmatprep.mubr.f32.mxu0 %v2711_v22  ;;  %v2709_v36 = vadd.f32 1.0, %v4298_v15  ;;  %4155 = vmatprep.subr.bf16.mxu1 %v4463_v11  ;;  %v2979_v22 = vld [vmem:[#allocation8 + $0x30] sm:$0xff]  ;;  %v2980_v15 = vld [vmem:[#allocation8 + $0x38] sm:$0xff]  ;;  %v4198_v57 = vpack.c.bf16 %v3076_v39, %v3075_v55 }
0x18e1   :  { %2820 = vmatmul.mubr.f32.vlgmr.msra.gmra.mrb[36].mxu0 %v2710_v23  ;;  %v2712_v27 = vmul.f32 %v2708_v24, %v2680_v25  ;;  %v4171_v23 = vpack.c.bf16 %v2980_v15, %v2979_v22  ;;  %v2981_v24 = vld [vmem:[#allocation8 + $0x40] sm:$0xff] }
0x18e2   :  { %v2713_v26 = vmul.f32 %v2709_v36, %v2681_v63  ;;  %4163 = vmatpush3.bf16.msra.mxu0 %v4162_v14  ;;  %v2982_v63 = vld [vmem:[#allocation8 + $0x48] sm:$0xff]  ;;  %v3259_v22 = vld [vmem:[%s5190_s19] ss:$0 sm:$0xff]  ;;  %s4464_s19 = smov [#allocation11]  }
0x18e3   :  { %4157 = vmatpush3.bf16.msra.mxu1 %v4156_v7  ;;  %4164 = vmatprep.subr.bf16.mxu0 %v4463_v11  ;;  %v4174_v36 = vpack.c.bf16 %v2982_v63, %v2981_v24  ;;  %v4201_v7 = vpack.c.bf16 %v3078_v6, %v3077_v5  ;;  %v3161_v63 = vand.u32 127, %v234_v28 }
0x18e4   :  { %2824 = vmatprep.mubr.f32.mxu0 %v2713_v26  ;;  %4158 = vmatprep.subr.bf16.mxu1 %v4463_v11 }
0x18e5   :  { %2825 = vmatmul.mubr.f32.gmra.mrb[38].mxu0 %v2712_v27  ;;  %vm3162_vm4 = vcmp.lt.s32.totalorder %v3161_v63, 2 }
0x18e6   :  { %3779 = vmatprep.mubr.msk.f32.mxu0 %vm4461_vm0, %v4460_v4  ;;  %4166 = vmatpush3.bf16.msra.mxu0 %v4165_v17 }
0x18e7   :  { %4160 = vmatpush3.bf16.msra.mxu1 %v4159_v10  ;;  %4167 = vmatprep.subr.bf16.mxu0 %v4463_v11  ;;  %v3080_v10 = vld [vmem:[#allocation10 + $0x68] sm:$0xff] }
0x18e8   :  { %4185 = vmatprep.subr.bf16.mxu1 %v4463_v11  ;;  %v4204_v59 = vpack.c.bf16 %v3080_v10, %v3079_v9 }
0x18ea   :  { %4169 = vmatpush3.bf16.msra.mxu0 %v4168_v21  ;;  %v4207_v21 = vpack.c.bf16 %v3082_v20, %v3081_v19 }
0x18eb   :  { %4170 = vmatprep.subr.bf16.mxu0 %v4463_v11 }
0x18ee   :  { %4172 = vmatpush3.bf16.msra.mxu0 %v4171_v23 }
0x18ef   :  { %4173 = vmatprep.subr.bf16.mxu0 %v4463_v11 }
0x18f2   :  { %4175 = vmatpush3.bf16.msra.mxu0 %v4174_v36  ;;  %v3260_v36 = vld [vmem:[%s5192_s21] ss:$0 sm:$0xff]  ;;  %s3185_s21 = sshll.u32 %s4464_s19, 4  ;;  %s3186_s21 = int_to_ptr.vmem [resolvable:$true] %s3185_s21 }
0x18f3   :  { %4176 = vmatprep.subr.bf16.mxu0 %v4463_v11  ;;  %s4419_s2 = scalar_lea.vmem %s3186_s21, 32  ;;  %p4424_p13 = scmp.lt.s32.totalorder %s3186_s21, %s3186_s21 }
0x18f4   :  { %p4420_p12 = scmp.ne.s32.totalorder %s3186_s21, %s4419_s2  ;;  %p4425_p0 = scmp.lt.s32.totalorder %s4419_s2, %s4419_s2 }
0x18f6   :  { %p4426_p1 = por %p4425_p0, %p4424_p13 }
0x18f8   :  { %p4427_p2 = pnand %p4426_p1, %p4420_p12 }
0x19b4   :  { %v3435_v30 = vpop.f32.mrb[36].mxu0 }
0x19b5   :  { %v3436_v34 = vpop.f32.mrb[37].mxu0 }
0x19b6   :  { %v3437_v35 = vadd.f32 %v3436_v34, %v3435_v30 }
0x19b8   :  { %v2822_v61 = vadd.f32 %v3437_v35, %v3253_v31  ;;  %v3438_v38 = vpop.f32.mrb[38].mxu0 }
0x19b9   :  { %v3439_v40 = vpop.f32.mrb[39].mxu0 }
0x19ba   :  { %v3440_v42 = vadd.f32 %v3439_v40, %v3438_v38  ;;  %v2830_v29 = vadd.f32 %v2822_v61, %v5037_v18  ;;  %v3256_v40 = vld [vmem:[%s5185_s14 + $0x1] ss:$0 sm:$0xff] }
0x19bc   :  { %v2827_v43 = vadd.f32 %v3440_v42, %v3253_v31  ;;  %2836 = vadd.xlane.f32.xlu1 %v2830_v29 }
0x19be   :  { %v2831_v45 = vadd.f32 %v2827_v43, %v5042_v3 }
0x19c0   :  { %2838 = vadd.xlane.f32.xlu0 %v2831_v45 }
0x1a49   :  { %v2837_v18 = vpop.xlane.xlu1 %2836 }
0x1a4a   :  { %v2840_v3 = vmul.f32 0.0078125, %v2837_v18 }
0x1a4c   :  { %v5068_v49 = vsub.f32 %v2830_v29, %v2840_v3  ;;  %v2983_v3 = vld [vmem:[#allocation8 + $0x50] sm:$0xff] }
0x1a4d   :  { %v2839_v50 = vpop.xlane.xlu0 %2838 }
0x1a4e   :  { %v2841_v53 = vmul.f32 0.0078125, %v2839_v50  ;;  %v2844_v54 = vmul.f32 %v5068_v49, %v5068_v49 }
0x1a50   :  { %v5072_v56 = vsub.f32 %v2831_v45, %v2841_v53  ;;  %2846 = vadd.xlane.f32.xlu1 %v2844_v54  ;;  %v3257_v45 = vld [vmem:[%s5186_s15 + $0x1] ss:$0 sm:$0xff]  ;;  %v2986_v54 = vld [vmem:[#allocation8 + $0x68] sm:$0xff] }
0x1a51   :  { %v2985_v53 = vld [vmem:[#allocation8 + $0x60] sm:$0xff] }
0x1a52   :  { %v2845_v58 = vmul.f32 %v5072_v56, %v5072_v56 }
0x1a54   :  { %2848 = vadd.xlane.f32.xlu0 %v2845_v58  ;;  %v2987_v58 = vld [vmem:[#allocation8 + $0x70] sm:$0xff] }
0x1a55   :  { %v4183_v62 = vpack.c.bf16 %v2988_v51, %v2987_v58 }
0x1add   :  { %v2847_v25 = vpop.xlane.xlu1 %2846 }
0x1ade   :  { %v2850_v26 = vmul.f32 0.0078125, %v2847_v25 }
0x1ae0   :  { %v2852_v27 = vadd.f32 1e-05, %v2850_v26 }
0x1ae1   :  { %v2849_v30 = vpop.xlane.xlu0 %2848 }
0x1ae2   :  { %4299 = vrsqrt.f32 %v2852_v27  ;;  %v2851_v31 = vmul.f32 0.0078125, %v2849_v30 }
0x1ae4   :  { %v2853_v34 = vadd.f32 1e-05, %v2851_v31 }
0x1ae6   :  { %4301 = vrsqrt.f32 %v2853_v34 }
0x1aec   :  { %v4300_v35 = vpop.eup %4299 }
0x1aed   :  { %v2856_v61 = vmul.f32 %v4300_v35, %v5068_v49  ;;  %v2984_v49 = vld [vmem:[#allocation8 + $0x58] sm:$0xff] }
0x1aee   :  { %v4177_v50 = vpack.c.bf16 %v2984_v49, %v2983_v3 }
0x1aef   :  { %v2864_v29 = vmul.f32 %v3256_v40, %v2856_v61 }
0x1af0   :  { %v4302_v38 = vpop.eup %4301  ;;  %4178 = vmatpush3.bf16.msra.mxu0 %v4177_v50 }
0x1af1   :  { %v2857_v42 = vmul.f32 %v4302_v38, %v5072_v56  ;;  %v2872_v47 = vadd.f32 %v3257_v45, %v2864_v29  ;;  %v4180_v56 = vpack.c.bf16 %v2986_v54, %v2985_v53  ;;  %4179 = vmatprep.subr.bf16.mxu0 %v4463_v11 }
0x1af3   :  { %v2865_v43 = vmul.f32 %v3256_v40, %v2857_v42 }
0x1af4   :  { %4181 = vmatpush3.bf16.msra.mxu0 %v4180_v56 }
0x1af5   :  { %v2873_v46 = vadd.f32 %v3257_v45, %v2865_v43  ;;  %4182 = vmatprep.subr.bf16.mxu0 %v4463_v11 }
0x1af7   :  { %v2875_v48 = vrot.slane %v2873_v46, 7 }
0x1af8   :  { %4184 = vmatpush3.bf16.msra.mxu0 %v4183_v62 }
0x1af9   :  { %v2878_v18 = vsel %vm2877_vm3, %v2872_v47, %v2875_v48 }
0x1afa   :  { %3745 = vmatmul.mubr.f32.vlgmr.msra.gmra.mrb[24].mxu1 %v2878_v18 }
0x1afb   :  { %3814 = vmatprep.mubr.msk.f32.mxu1 %vm4461_vm0, %v4460_v4  ;;  %v4186_v4 = vpack.c.bf16 %v3068_v33, %v3067_v0 }
0x1afd   :  { %4187 = vmatpush3.bf16.msra.mxu1 %v4186_v4 }
0x1afe   :  { %4188 = vmatprep.subr.bf16.mxu1 %v4463_v11 }
0x1b01   :  { %4190 = vmatpush3.bf16.msra.mxu1 %v4189_v2 }
0x1b02   :  { %4191 = vmatprep.subr.bf16.mxu1 %v4463_v11 }
0x1b05   :  { %4193 = vmatpush3.bf16.msra.mxu1 %v4192_v8 }
0x1b06   :  { %4194 = vmatprep.subr.bf16.mxu1 %v4463_v11 }
0x1b09   :  { %4196 = vmatpush3.bf16.msra.mxu1 %v4195_v37 }
0x1b0a   :  { %4197 = vmatprep.subr.bf16.mxu1 %v4463_v11 }
0x1b0d   :  { %4199 = vmatpush3.bf16.msra.mxu1 %v4198_v57 }
0x1b0e   :  { %4200 = vmatprep.subr.bf16.mxu1 %v4463_v11 }
0x1b11   :  { %4202 = vmatpush3.bf16.msra.mxu1 %v4201_v7 }
0x1b12   :  { %4203 = vmatprep.subr.bf16.mxu1 %v4463_v11 }
0x1b15   :  { %4205 = vmatpush3.bf16.msra.mxu1 %v4204_v59 }
0x1b16   :  { %4206 = vmatprep.subr.bf16.mxu1 %v4463_v11 }
0x1b19   :  { %4208 = vmatpush3.bf16.msra.mxu1 %v4207_v21 }
0x1bcd   :  { %v2968_v13 = vpop.f32.mrb[24].mxu1 }
0x1bce   :  { %v2969_v14 = vadd.f32 %v3258_v12, %v2968_v13  ;;  %v3746_v16 = vpop.f32.mrb[25].mxu1 }
0x1bd0   :  { %4303 = vtanh.f32 %v2969_v14 }
0x1bda   :  { %v4304_v17 = vpop.eup %4303 }
0x1bdb   :  { %3780 = vmatmul.mubr.f32.vlgmr.msra.gmra.mrb[40].mxu0 %v4304_v17 }
0x1cae   :  { %v3062_v15 = vpop.f32.mrb[40].mxu0 }
0x1caf   :  { %v3063_v11 = vadd.f32 %v3259_v22, %v3062_v15  ;;  %v3781_v23 = vpop.f32.mrb[41].mxu0 }
0x1cb1   :  { %v3066_v24 = vmax.f32 %v3063_v11, 0.0 }
0x1cb3   :  { %3815 = vmatmul.mubr.f32.vlgmr.msra.gmra.mrb[26].mxu1 %v3066_v24 }
0x1d86   :  { %v3156_v25 = vpop.f32.mrb[26].mxu1 }
0x1d87   :  { %v3157_v26 = vadd.f32 %v3260_v36, %v3156_v25  ;;  %v3816_v27 = vpop.f32.mrb[27].mxu1 }
0x1d89   :  { %v3163_v30 = vsel %vm3162_vm4, %v3157_v26, -1e+30 }
0x1d8a   :  { %v3165_v31 = vsel %vm3164_vm5, %v3163_v30, -inf }
0x1d8b   :  { %3166 = vmax.xlane.f32.xlu0 %v3165_v31 }
0x1e18   :  { %v3167_v34 = vpop.xlane.xlu0 %3166 }
0x1e19   :  { %v3168_v35 = vsub.f32 %v3163_v30, %v3167_v34 }
0x1e1b   :  { %v3169_v61 = vmul.f32 1.442695, %v3168_v35 }
0x1e1d   :  { %4305 = vpow2.f32 %v3169_v61 }
0x1e27   :  { %v4306_v38 = vpop.eup %4305 }
0x1e28   :  { %v3171_v40 = vsel %vm3162_vm4, %v4306_v38, 0.0 }
0x1e29   :  { %v3172_v42 = vsel %vm3164_vm5, %v3171_v40, 0.0 }
0x1e2a   :  { %3173 = vadd.xlane.f32.xlu1 %v3172_v42 }
0x1eb7   :  { %v3174_v28 = vpop.xlane.xlu1 %3173 }
0x1eb8   :  { %4307 = vlog2.f32 %v3174_v28 }
0x1ec2   :  { %v4308_v29 = vpop.eup %4307 }
0x1ec3   :  { %v3176_v43 = vmul.f32 0.6931472, %v4308_v29 }
0x1ec5   :  { %v3177_v45 = vsub.f32 %v3168_v35, %v3176_v43 }
0x1ec7   :  { %3178 = vst [vmem:[#allocation11] sm:$0x3] %v3177_v45 }
0x1ec8   :  { %4430 = shalt.err (!%p4427_p2)
}
0x1ec9   :  { %s5217_s3 = sld [smem:[#allocation23_spill]] }
0x1ecf   :  { %s4431_s7 = scalar_lea.hbm %s5217_s3, 32 }
0x1ed0   :  { %p4432_p3 = scmp.ne.s32.totalorder %s5217_s3, %s4431_s7  ;;  %p4435_p4 = scmp.lt.u32.totalorder %s4431_s7, %s5217_s3 }
0x1ed2   :  { %p4437_p5 = pnand %p4435_p4, %p4432_p3 }
0x1ed4   :  { %4440 = shalt.err (!%p4437_p5)
}
0x1ed5   :  { %3188 = dma.vmem_to_hbm [thread:$0]  %s3186_s21, 32, %s5217_s3, [#allocation4]  }
0x1ed6   :  { %4447 = dma.done.wait [#allocation4], 32  }
0x1ed7   :  { %4448 = vsyncadd [#allocation4], 4294967264 }
0x1ed8   :  { %3192 = vsyncpa [#allocation3], 1 }
0x1ed9   :  { %3193 = vsyncpa [#allocation6], 1 }
0x1eda   :  { %3194 = vsyncpa [#allocation9], 1 }
0x1edb   :  { %3195 = vsyncpa [#allocation4], 1 }

</bundles_post_ra>
